<compile_context>
chip_gen: v7x
topology: tpu7x:2x2x1
jax: 0.10.0
libtpu: 0.0.40
codegen_flags: <defaults>
</compile_context>

<pallas_src>
import functools
from collections import OrderedDict

import numpy as np
import jax
import jax.numpy as jnp
from jax.experimental import pallas as pl
from jax.experimental.pallas import tpu as pltpu


# ---------------------------------------------------------------------------
# Generation-aware VMEM budget
# ---------------------------------------------------------------------------
@functools.lru_cache(maxsize=None)
def _vmem_limit_bytes():
    """Scoped VMEM limit: half the physical VMEM of the current chip.

    v5e/v6e (128 MiB) -> 64 MiB, v7x (64 MiB/TC) -> 32 MiB; conservative
    fallback if the query is unavailable.
    """
    cap = 64 * 1024 * 1024
    try:
        info = pltpu.get_tpu_info()
        cap = int(getattr(info, "vmem_capacity_bytes", cap))
    except Exception:
        pass
    return max(32 * 1024 * 1024, min(cap // 2, 96 * 1024 * 1024))


def _pick_tile_m(m, per_row_bytes, fixed_bytes, budget, max_tm=1024):
    """Largest power-of-two M tile (>=8) that fits the VMEM byte budget and
    yields >=2 grid blocks (v7x megacore sharding) whenever m allows it.

    The grid uses pl.cdiv(m, tm); a partial last block is handled by Pallas'
    OOB semantics (garbage rows only feed garbage output rows, OOB writes are
    dropped), so m need not be divisible by tm.
    """
    avail = int(budget * 0.6) - fixed_bytes     # 40% headroom for acc/spills
    tm = max_tm
    while tm > 8 and tm * per_row_bytes > avail:
        tm //= 2
    while tm > 8 and pl.cdiv(m, tm) < 2:
        tm //= 2
    return max(tm, 8)


# ---------------------------------------------------------------------------
# Kernel 1: fused matmul + bias (+ReLU)  — backbone convs (im2col) use this.
# ---------------------------------------------------------------------------
def _mm_bias_kernel(x_ref, w_ref, b_ref, o_ref, *, relu):
    acc = jnp.dot(x_ref[...], w_ref[...], preferred_element_type=jnp.float32)
    acc = acc + b_ref[...]
    if relu:
        acc = jnp.maximum(acc, 0.0)
    o_ref[...] = acc.astype(o_ref.dtype)


def _fused_matmul(x2d, w2d, bias, relu, out_dtype=jnp.bfloat16):
    m, k = x2d.shape
    k2, n = w2d.shape
    assert k2 == k
    limit = _vmem_limit_bytes()
    per_row = 2 * k * 2 + 2 * n * 2 + n * 4           # dbl-buf x + out, f32 acc
    fixed = 2 * (k * n * 2 + n * 4)                   # dbl-buf weights + bias
    tm = _pick_tile_m(m, per_row, fixed, limit)
    b = bias.reshape(1, n).astype(jnp.float32)
    return pl.pallas_call(
        functools.partial(_mm_bias_kernel, relu=relu),
        out_shape=jax.ShapeDtypeStruct((m, n), out_dtype),
        grid=(pl.cdiv(m, tm),),
        in_specs=[
            pl.BlockSpec((tm, k), lambda i: (i, 0)),
            pl.BlockSpec((k, n), lambda i: (0, 0)),
            pl.BlockSpec((1, n), lambda i: (0, 0)),
        ],
        out_specs=pl.BlockSpec((tm, n), lambda i: (i, 0)),
        compiler_params=pltpu.CompilerParams(
            dimension_semantics=("parallel",),
            vmem_limit_bytes=limit),
    )(x2d, w2d, b)


# ---------------------------------------------------------------------------
# Kernel 2: fused classifier — relu(x @ w3 + b3) @ w4 + b4 in one pass.
# ---------------------------------------------------------------------------
def _mm_head_kernel(x_ref, w3_ref, b3_ref, w4_ref, b4_ref, o_ref):
    h = jnp.dot(x_ref[...], w3_ref[...], preferred_element_type=jnp.float32)
    h = jnp.maximum(h + b3_ref[...], 0.0).astype(jnp.bfloat16)
    acc = jnp.dot(h, w4_ref[...], preferred_element_type=jnp.float32)
    o_ref[...] = (acc + b4_ref[...]).astype(o_ref.dtype)


def _fused_head_matmul(x2d, w3, b3, w4, b4, out_dtype=jnp.bfloat16):
    m, k = x2d.shape
    n_mid = w3.shape[1]
    n_out = w4.shape[1]
    limit = _vmem_limit_bytes()
    per_row = 2 * k * 2 + 2 * n_out * 2 + n_mid * (4 + 2) + n_out * 4
    fixed = 2 * (k * n_mid * 2 + n_mid * 4 + n_mid * n_out * 2 + n_out * 4)
    tm = _pick_tile_m(m, per_row, fixed, limit)
    b3r = b3.reshape(1, n_mid).astype(jnp.float32)
    b4r = b4.reshape(1, n_out).astype(jnp.float32)
    return pl.pallas_call(
        _mm_head_kernel,
        out_shape=jax.ShapeDtypeStruct((m, n_out), out_dtype),
        grid=(pl.cdiv(m, tm),),
        in_specs=[
            pl.BlockSpec((tm, k), lambda i: (i, 0)),
            pl.BlockSpec((k, n_mid), lambda i: (0, 0)),
            pl.BlockSpec((1, n_mid), lambda i: (0, 0)),
            pl.BlockSpec((n_mid, n_out), lambda i: (0, 0)),
            pl.BlockSpec((1, n_out), lambda i: (0, 0)),
        ],
        out_specs=pl.BlockSpec((tm, n_out), lambda i: (i, 0)),
        compiler_params=pltpu.CompilerParams(
            dimension_semantics=("parallel",),
            vmem_limit_bytes=limit),
    )(x2d, w3, b3r, w4, b4r)


# ---------------------------------------------------------------------------
# im2col (rectangular slices only); K is padded to a multiple of 8.
# ---------------------------------------------------------------------------
def _extract_patches(x_nhwc, ksize, stride, pad):
    x = jnp.pad(x_nhwc, ((0, 0), (pad, pad), (pad, pad), (0, 0)))
    nb, hp, wp, c = x.shape
    ho = (hp - ksize) // stride + 1
    wo = (wp - ksize) // stride + 1
    cols = []
    for kh in range(ksize):
        for kw in range(ksize):
            cols.append(x[:, kh:kh + stride * ho:stride,
                          kw:kw + stride * wo:stride, :])
    kc = ksize * ksize * c
    pad_k = (-kc) % 8
    if pad_k:   # e.g. conv1: 27 -> 32, added inside the concat (no extra copy)
        cols.append(jnp.zeros((nb, ho, wo, pad_k), x.dtype))
    patches = jnp.concatenate(cols, axis=-1)
    return patches, ho, wo, kc + pad_k


def conv2d_fused(x_nhwc, w2d, bias, ksize, stride, pad, relu,
                 out_dtype=jnp.bfloat16):
    """kxk conv (bias-folded BN) + optional ReLU; NHWC in/out (bf16)."""
    n = x_nhwc.shape[0]
    if ksize == 1:
        _, h, w, cin = x_nhwc.shape
        x2d = x_nhwc.reshape(n * h * w, cin)
        ho, wo = h, w
    else:
        patches, ho, wo, kcp = _extract_patches(x_nhwc, ksize, stride, pad)
        x2d = patches.reshape(n * ho * wo, kcp)
    y = _fused_matmul(x2d, w2d, bias, relu, out_dtype)
    return y.reshape(n, ho, wo, w2d.shape[1])


# ---------------------------------------------------------------------------
# Kernel 3: fused bilinear resize (align_corners=False), one kernel per image.
#   H pass: single lane-dense bf16 MXU matmul (Hout,Hin)@(Hin,Win*C).
#   W pass: VPU two-tap lerp with static 128-aligned lane slices (no tiny
#           per-row matmuls, no transpose, no HBM round-trip).
# ---------------------------------------------------------------------------
def _bilinear_taps(out_size, in_size):
    """PyTorch align_corners=False source taps: list of (i0, i1, lam)."""
    if in_size == 1:
        return [(0, 0, 0.0)] * out_size
    taps = []
    scale = in_size / out_size
    for p in range(out_size):
        src = max((p + 0.5) * scale - 0.5, 0.0)
        i0 = min(int(np.floor(src)), in_size - 1)
        i1 = min(i0 + 1, in_size - 1)
        taps.append((i0, i1, float(src - i0)))
    return taps


def _bilinear_matrix(out_size, in_size, dtype=jnp.bfloat16):
    w = np.zeros((out_size, in_size), dtype=np.float32)
    for p, (i0, i1, lam) in enumerate(_bilinear_taps(out_size, in_size)):
        w[p, i0] += 1.0 - lam
        w[p, i1] += lam
    return jnp.asarray(w, dtype=dtype)


def _resize_kernel(x_ref, wh_ref, o_ref, *, w_taps, c):
    # x_ref: (1, Hin, Win*C) bf16, wh_ref: (Hout, Hin) bf16.
    # H interpolation: one bf16 MXU matmul, f32 accumulation.
    t = jnp.dot(wh_ref[...], x_ref[0],
                preferred_element_type=jnp.float32)        # (Hout, Win*C) f32
    # W interpolation: two-tap lerp per output column block, pure VPU work.
    for p, (j0, j1, mu) in enumerate(w_taps):
        col = (1.0 - mu) * t[:, j0 * c:(j0 + 1) * c] \
            + mu * t[:, j1 * c:(j1 + 1) * c]               # (Hout, C)
        o_ref[0, :, p * c:(p + 1) * c] = col.astype(o_ref.dtype)


def bilinear_resize_nhwc(x_nhwc, out_hw):
    n, hin, win, c = x_nhwc.shape
    hout, wout = out_hw
    wh = _bilinear_matrix(hout, hin)                       # (Hout, Hin) bf16
    w_taps = tuple(_bilinear_taps(wout, win))
    limit = _vmem_limit_bytes()
    x2 = x_nhwc.reshape(n, hin, win * c)                   # free (contiguous)
    y2 = pl.pallas_call(
        functools.partial(_resize_kernel, w_taps=w_taps, c=c),
        out_shape=jax.ShapeDtypeStruct((n, hout, wout * c), jnp.bfloat16),
        grid=(n,),
        in_specs=[pl.BlockSpec((1, hin, win * c), lambda i: (i, 0, 0)),
                  pl.BlockSpec((hout, hin), lambda i: (0, 0))],
        out_specs=pl.BlockSpec((1, hout, wout * c), lambda i: (i, 0, 0)),
        compiler_params=pltpu.CompilerParams(
            dimension_semantics=("parallel",),
            vmem_limit_bytes=limit),
    )(x2, wh)
    return y2.reshape(n, hout, wout, c)                    # free (contiguous)


# ---------------------------------------------------------------------------
# Host-side parameter folding: conv + BN (+ input 1/std) -> (w2d bf16, bias f32)
# ---------------------------------------------------------------------------
def _fold_conv_bn(w_oihw, bn_scale, bn_bias, in_scale=None, pad_cout_to=None):
    cout, cin, kh, kw = w_oihw.shape
    w = w_oihw * bn_scale[:, None, None, None]
    if in_scale is not None:                    # fold 1/std into input channels
        w = w * in_scale[None, :, None, None]
    w2d = jnp.transpose(w, (2, 3, 1, 0)).reshape(kh * kw * cin, cout)
    pad_k = (-(kh * kw * cin)) % 8
    if pad_k:
        w2d = jnp.concatenate(
            [w2d, jnp.zeros((pad_k, cout), w2d.dtype)], axis=0)
    bias = bn_bias
    if pad_cout_to is not None and cout < pad_cout_to:
        w2d = jnp.concatenate(
            [w2d, jnp.zeros((w2d.shape[0], pad_cout_to - cout), w2d.dtype)],
            axis=1)
        bias = jnp.concatenate(
            [bias, jnp.zeros((pad_cout_to - cout,), bias.dtype)])
    return w2d.astype(jnp.bfloat16), bias.astype(jnp.float32)


# ---------------------------------------------------------------------------
# DDNTemplate (Pallas) — synthetic deterministic parameters
# ---------------------------------------------------------------------------
class DDNTemplatePallas:
    def __init__(self, num_classes=8, feat_channels=128, out_channels=256,
                 mid_channels=256, pretrained=True, seed=0):
        self.num_classes = num_classes
        self.pretrained = pretrained
        self.norm_mean = jnp.asarray([0.485, 0.456, 0.406], jnp.float32)
        self.norm_std = jnp.asarray([0.229, 0.224, 0.225], jnp.float32)

        ks = jax.random.split(jax.random.PRNGKey(seed), 11)
        rnd = lambda k, s, sc=0.05: sc * jax.random.normal(k, s, jnp.float32)
        pos = lambda k, s: 0.5 + jax.random.uniform(k, s, jnp.float32)

        # backbone: 'features' layer (stride 2), 'out' layer (stride 4 total)
        w1 = rnd(ks[0], (feat_channels, 3, 3, 3))
        bn1_s, bn1_b = pos(ks[1], (feat_channels,)), rnd(ks[2], (feat_channels,), 0.1)
        w2 = rnd(ks[3], (out_channels, feat_channels, 3, 3))
        bn2_s, bn2_b = pos(ks[4], (out_channels,)), rnd(ks[5], (out_channels,), 0.1)
        # classifier: 3x3 conv + BN + ReLU, then 1x1 conv -> num_classes
        wc1 = rnd(ks[6], (mid_channels, out_channels, 3, 3))
        bnc_s, bnc_b = pos(ks[7], (mid_channels,)), rnd(ks[8], (mid_channels,), 0.1)
        wc2 = rnd(ks[9], (num_classes, mid_channels, 1, 1))
        bc2 = rnd(ks[10], (num_classes,), 0.1)

        in_scale = (1.0 / self.norm_std) if pretrained else None
        # Pre-folded, pre-reshaped, bf16 weights (BN scale, 1/std, channel pads).
        self.l1 = _fold_conv_bn(w1, bn1_s, bn1_b, in_scale=in_scale)    # K 27->32, N=128
        self.l2 = _fold_conv_bn(w2, bn2_s, bn2_b)                       # K=1152, N=256
        self.l3 = _fold_conv_bn(wc1, bnc_s, bnc_b)                      # K=2304, N=256
        self.l4 = _fold_conv_bn(wc2, jnp.ones((num_classes,), jnp.float32),
                                bc2, pad_cout_to=128)                   # 1x1, N 8->128

    def forward(self, images_nchw):
        x = jnp.transpose(images_nchw, (0, 2, 3, 1))       # NHWC (only input transpose)
        if self.pretrained:
            # NaN mask + mean subtract fused in XLA; 1/std is folded into
            # conv1's weights.  PyTorch normalizes then zeroes NaN positions:
            # normalized value at NaN pixels is 0, which this reproduces
            # (0 * 1/std = 0); zero padding of (x-mean) equals zero padding of
            # the normalized image for the same reason.
            x = jnp.where(jnp.isnan(x), 0.0, x - self.norm_mean)
        x = x.astype(jnp.bfloat16)

        result = OrderedDict()

        # backbone (NHWC, bf16 activations between layers)
        feat = conv2d_fused(x, *self.l1, ksize=3, stride=2, pad=1, relu=True)
        out = conv2d_fused(feat, *self.l2, ksize=3, stride=2, pad=1, relu=True)
        result['features'] = jnp.transpose(feat, (0, 3, 1, 2)).astype(jnp.float32)
        feat_hw = feat.shape[1:3]

        # classifier (depth_feat_extract_layer is None path):
        # 3x3 conv+BN+ReLU and the 1x1 num_classes head fused in ONE kernel.
        patches, ho, wo, kcp = _extract_patches(out, 3, 1, 1)
        x2d = patches.reshape(out.shape[0] * ho * wo, kcp)
        w3, b3 = self.l3
        w4, b4 = self.l4
        logits2d = _fused_head_matmul(x2d, w3, b3, w4, b4)
        logits_p = logits2d.reshape(out.shape[0], ho, wo, w4.shape[1])

        # bilinear upsample to the 'features' resolution (128 padded channels)
        y = bilinear_resize_nhwc(logits_p, feat_hw)        # (N, Ho, Wo, 128) bf16
        result['logits'] = jnp.transpose(
            y[..., :self.num_classes], (0, 3, 1, 2)).astype(jnp.float32)

        result['logits_ones'] = jnp.ones(
            (images_nchw.shape[0], self.num_classes, feat_hw[0], feat_hw[1]),
            jnp.float32)

        # TODO(synk): aux_classifier branch skipped (aux_loss=None -> model.
        # aux_classifier is None); offset / semantic1 branch disabled
        # (offset=False), matching the default template configuration.
        return result


if __name__ == "__main__":
    key = jax.random.PRNGKey(0)
    images = jax.random.normal(key, (2, 3, 32, 32), jnp.float32)
    # NaN pixels to exercise the preprocess mask path
    images = images.at[0, 0, 0, 0].set(jnp.nan)
    images = images.at[1, 2, 5, 7].set(jnp.nan)

    model = DDNTemplatePallas(num_classes=8, pretrained=True, seed=0)
    fwd = jax.jit(model.forward)
    result = fwd(images)
    for v in result.values():
        jax.block_until_ready(v)

    assert result['features'].shape == (2, 128, 16, 16)
    assert result['logits'].shape == (2, 8, 16, 16)
    assert result['logits_ones'].shape == (2, 8, 16, 16)
    assert not bool(jnp.any(jnp.isnan(result['features'])))
    assert not bool(jnp.any(jnp.isnan(result['logits'])))
    print("KERNEL_OK")
</pallas_src>

<mosaic_0001>
module attributes {stable_mosaic.version = 11 : i64} {
  func.func @_mm_bias_kernel(%arg0: i32, %arg1: memref<256x32xbf16, #tpu.memory_space<vmem>>, %arg2: memref<32x128xbf16, #tpu.memory_space<vmem>>, %arg3: memref<1x128xf32, #tpu.memory_space<vmem>>, %arg4: memref<256x128xbf16, #tpu.memory_space<vmem>>) attributes {dimension_semantics = [#tpu.dimension_semantics<parallel>], iteration_bounds = array<i64: 2>, scalar_prefetch = 0 : i64, scratch_operands = 0 : i64, tpu.core_type = #tpu.core_type<tc>, window_params = [{transform_indices = @transform_0, window_bounds = array<i64: 256, 32>}, {pipeline_mode = #tpu.pipeline_mode<synchronous>, transform_indices = @transform_1, window_bounds = array<i64: 32, 128>}, {pipeline_mode = #tpu.pipeline_mode<synchronous>, transform_indices = @transform_2, window_bounds = array<i64: 1, 128>}, {transform_indices = @transform_3, window_bounds = array<i64: 256, 128>}]} {
    %c0 = arith.constant 0 : index
    %c0_0 = arith.constant 0 : index
    %0 = vector.load %arg1[%c0, %c0_0] : memref<256x32xbf16, #tpu.memory_space<vmem>>, vector<256x32xbf16>
    %c0_1 = arith.constant 0 : index
    %c0_2 = arith.constant 0 : index
    %1 = vector.load %arg2[%c0_1, %c0_2] : memref<32x128xbf16, #tpu.memory_space<vmem>>, vector<32x128xbf16>
    %cst = arith.constant dense<0.000000e+00> : vector<256x128xf32>
    %2 = tpu.matmul %0, %1, %cst {dimension_numbers = #tpu.dot_dimension_numbers<[1], [0], [0], [1], [0, 0, 1, 1], [], []>} : vector<256x32xbf16>, vector<32x128xbf16>, vector<256x128xf32> -> vector<256x128xf32>
    %c0_3 = arith.constant 0 : index
    %c0_4 = arith.constant 0 : index
    %3 = vector.load %arg3[%c0_3, %c0_4] : memref<1x128xf32, #tpu.memory_space<vmem>>, vector<1x128xf32>
    %4 = vector.broadcast %3 : vector<1x128xf32> to vector<256x128xf32>
    %5 = arith.addf %2, %4 : vector<256x128xf32>
    %cst_5 = arith.constant 0.000000e+00 : f32
    %6 = vector.broadcast %cst_5 : f32 to vector<256x128xf32>
    %7 = arith.maximumf %5, %6 : vector<256x128xf32>
    %8 = arith.truncf %7 : vector<256x128xf32> to vector<256x128xbf16>
    %c0_6 = arith.constant 0 : index
    %c0_7 = arith.constant 0 : index
    %9 = vector.load %arg4[%c0_6, %c0_7] : memref<256x128xbf16, #tpu.memory_space<vmem>>, vector<256x128xbf16>
    tpu.vector_store %arg4[%c0_6, %c0_7], %8 {strides = array<i32>} : memref<256x128xbf16, #tpu.memory_space<vmem>>, vector<256x128xbf16>,
    return
  }
  func.func @transform_0(%arg0: i32) -> (i32, i32) {
    %c0_i32 = arith.constant 0 : i32
    %c0_i32_0 = arith.constant 0 : i32
    return %arg0, %c0_i32 : i32, i32
  }
  func.func @transform_1(%arg0: i32) -> (i32, i32) {
    %c0_i32 = arith.constant 0 : i32
    %c0_i32_0 = arith.constant 0 : i32
    %c0_i32_1 = arith.constant 0 : i32
    return %c0_i32, %c0_i32_0 : i32, i32
  }
  func.func @transform_2(%arg0: i32) -> (i32, i32) {
    %c0_i32 = arith.constant 0 : i32
    %c0_i32_0 = arith.constant 0 : i32
    %c0_i32_1 = arith.constant 0 : i32
    return %c0_i32, %c0_i32_0 : i32, i32
  }
  func.func @transform_3(%arg0: i32) -> (i32, i32) {
    %c0_i32 = arith.constant 0 : i32
    %c0_i32_0 = arith.constant 0 : i32
    return %arg0, %c0_i32 : i32, i32
  }
}

module attributes {stable_mosaic.version = 11 : i64} {
  func.func @_mm_bias_kernel(%arg0: i32, %arg1: memref<64x1152xbf16, #tpu.memory_space<vmem>>, %arg2: memref<1152x256xbf16, #tpu.memory_space<vmem>>, %arg3: memref<1x256xf32, #tpu.memory_space<vmem>>, %arg4: memref<64x256xbf16, #tpu.memory_space<vmem>>) attributes {dimension_semantics = [#tpu.dimension_semantics<parallel>], iteration_bounds = array<i64: 2>, scalar_prefetch = 0 : i64, scratch_operands = 0 : i64, tpu.core_type = #tpu.core_type<tc>, window_params = [{transform_indices = @transform_0, window_bounds = array<i64: 64, 1152>}, {pipeline_mode = #tpu.pipeline_mode<synchronous>, transform_indices = @transform_1, window_bounds = array<i64: 1152, 256>}, {pipeline_mode = #tpu.pipeline_mode<synchronous>, transform_indices = @transform_2, window_bounds = array<i64: 1, 256>}, {transform_indices = @transform_3, window_bounds = array<i64: 64, 256>}]} {
    %c0 = arith.constant 0 : index
    %c0_0 = arith.constant 0 : index
    %0 = vector.load %arg1[%c0, %c0_0] : memref<64x1152xbf16, #tpu.memory_space<vmem>>, vector<64x1152xbf16>
    %c0_1 = arith.constant 0 : index
    %c0_2 = arith.constant 0 : index
    %1 = vector.load %arg2[%c0_1, %c0_2] : memref<1152x256xbf16, #tpu.memory_space<vmem>>, vector<1152x256xbf16>
    %cst = arith.constant dense<0.000000e+00> : vector<64x256xf32>
    %2 = tpu.matmul %0, %1, %cst {dimension_numbers = #tpu.dot_dimension_numbers<[1], [0], [0], [1], [0, 0, 1, 1], [], []>} : vector<64x1152xbf16>, vector<1152x256xbf16>, vector<64x256xf32> -> vector<64x256xf32>
    %c0_3 = arith.constant 0 : index
    %c0_4 = arith.constant 0 : index
    %3 = vector.load %arg3[%c0_3, %c0_4] : memref<1x256xf32, #tpu.memory_space<vmem>>, vector<1x256xf32>
    %4 = vector.broadcast %3 : vector<1x256xf32> to vector<64x256xf32>
    %5 = arith.addf %2, %4 : vector<64x256xf32>
    %cst_5 = arith.constant 0.000000e+00 : f32
    %6 = vector.broadcast %cst_5 : f32 to vector<64x256xf32>
    %7 = arith.maximumf %5, %6 : vector<64x256xf32>
    %8 = arith.truncf %7 : vector<64x256xf32> to vector<64x256xbf16>
    %c0_6 = arith.constant 0 : index
    %c0_7 = arith.constant 0 : index
    %9 = vector.load %arg4[%c0_6, %c0_7] : memref<64x256xbf16, #tpu.memory_space<vmem>>, vector<64x256xbf16>
    tpu.vector_store %arg4[%c0_6, %c0_7], %8 {strides = array<i32>} : memref<64x256xbf16, #tpu.memory_space<vmem>>, vector<64x256xbf16>,
    return
  }
  func.func @transform_0(%arg0: i32) -> (i32, i32) {
    %c0_i32 = arith.constant 0 : i32
    %c0_i32_0 = arith.constant 0 : i32
    return %arg0, %c0_i32 : i32, i32
  }
  func.func @transform_1(%arg0: i32) -> (i32, i32) {
    %c0_i32 = arith.constant 0 : i32
    %c0_i32_0 = arith.constant 0 : i32
    %c0_i32_1 = arith.constant 0 : i32
    return %c0_i32, %c0_i32_0 : i32, i32
  }
  func.func @transform_2(%arg0: i32) -> (i32, i32) {
    %c0_i32 = arith.constant 0 : i32
    %c0_i32_0 = arith.constant 0 : i32
    %c0_i32_1 = arith.constant 0 : i32
    return %c0_i32, %c0_i32_0 : i32, i32
  }
  func.func @transform_3(%arg0: i32) -> (i32, i32) {
    %c0_i32 = arith.constant 0 : i32
    %c0_i32_0 = arith.constant 0 : i32
    return %arg0, %c0_i32 : i32, i32
  }
}

module attributes {stable_mosaic.version = 11 : i64} {
  func.func @_mm_head_kernel(%arg0: i32, %arg1: memref<64x2304xbf16, #tpu.memory_space<vmem>>, %arg2: memref<2304x256xbf16, #tpu.memory_space<vmem>>, %arg3: memref<1x256xf32, #tpu.memory_space<vmem>>, %arg4: memref<256x128xbf16, #tpu.memory_space<vmem>>, %arg5: memref<1x128xf32, #tpu.memory_space<vmem>>, %arg6: memref<64x128xbf16, #tpu.memory_space<vmem>>) attributes {dimension_semantics = [#tpu.dimension_semantics<parallel>], iteration_bounds = array<i64: 2>, scalar_prefetch = 0 : i64, scratch_operands = 0 : i64, tpu.core_type = #tpu.core_type<tc>, window_params = [{transform_indices = @transform_0, window_bounds = array<i64: 64, 2304>}, {pipeline_mode = #tpu.pipeline_mode<synchronous>, transform_indices = @transform_1, window_bounds = array<i64: 2304, 256>}, {pipeline_mode = #tpu.pipeline_mode<synchronous>, transform_indices = @transform_2, window_bounds = array<i64: 1, 256>}, {pipeline_mode = #tpu.pipeline_mode<synchronous>, transform_indices = @transform_3, window_bounds = array<i64: 256, 128>}, {pipeline_mode = #tpu.pipeline_mode<synchronous>, transform_indices = @transform_4, window_bounds = array<i64: 1, 128>}, {transform_indices = @transform_5, window_bounds = array<i64: 64, 128>}]} {
    %c0 = arith.constant 0 : index
    %c0_0 = arith.constant 0 : index
    %0 = vector.load %arg1[%c0, %c0_0] : memref<64x2304xbf16, #tpu.memory_space<vmem>>, vector<64x2304xbf16>
    %c0_1 = arith.constant 0 : index
    %c0_2 = arith.constant 0 : index
    %1 = vector.load %arg2[%c0_1, %c0_2] : memref<2304x256xbf16, #tpu.memory_space<vmem>>, vector<2304x256xbf16>
    %cst = arith.constant dense<0.000000e+00> : vector<64x256xf32>
    %2 = tpu.matmul %0, %1, %cst {dimension_numbers = #tpu.dot_dimension_numbers<[1], [0], [0], [1], [0, 0, 1, 1], [], []>} : vector<64x2304xbf16>, vector<2304x256xbf16>, vector<64x256xf32> -> vector<64x256xf32>
    %c0_3 = arith.constant 0 : index
    %c0_4 = arith.constant 0 : index
    %3 = vector.load %arg3[%c0_3, %c0_4] : memref<1x256xf32, #tpu.memory_space<vmem>>, vector<1x256xf32>
    %4 = vector.broadcast %3 : vector<1x256xf32> to vector<64x256xf32>
    %5 = arith.addf %2, %4 : vector<64x256xf32>
    %cst_5 = arith.constant 0.000000e+00 : f32
    %6 = vector.broadcast %cst_5 : f32 to vector<64x256xf32>
    %7 = arith.maximumf %5, %6 : vector<64x256xf32>
    %8 = arith.truncf %7 : vector<64x256xf32> to vector<64x256xbf16>
    %c0_6 = arith.constant 0 : index
    %c0_7 = arith.constant 0 : index
    %9 = vector.load %arg4[%c0_6, %c0_7] : memref<256x128xbf16, #tpu.memory_space<vmem>>, vector<256x128xbf16>
    %cst_8 = arith.constant dense<0.000000e+00> : vector<64x128xf32>
    %10 = tpu.matmul %8, %9, %cst_8 {dimension_numbers = #tpu.dot_dimension_numbers<[1], [0], [0], [1], [0, 0, 1, 1], [], []>} : vector<64x256xbf16>, vector<256x128xbf16>, vector<64x128xf32> -> vector<64x128xf32>
    %c0_9 = arith.constant 0 : index
    %c0_10 = arith.constant 0 : index
    %11 = vector.load %arg5[%c0_9, %c0_10] : memref<1x128xf32, #tpu.memory_space<vmem>>, vector<1x128xf32>
    %12 = vector.broadcast %11 : vector<1x128xf32> to vector<64x128xf32>
    %13 = arith.addf %10, %12 : vector<64x128xf32>
    %14 = arith.truncf %13 : vector<64x128xf32> to vector<64x128xbf16>
    %c0_11 = arith.constant 0 : index
    %c0_12 = arith.constant 0 : index
    %15 = vector.load %arg6[%c0_11, %c0_12] : memref<64x128xbf16, #tpu.memory_space<vmem>>, vector<64x128xbf16>
    tpu.vector_store %arg6[%c0_11, %c0_12], %14 {strides = array<i32>} : memref<64x128xbf16, #tpu.memory_space<vmem>>, vector<64x128xbf16>,
    return
  }
  func.func @transform_0(%arg0: i32) -> (i32, i32) {
    %c0_i32 = arith.constant 0 : i32
    %c0_i32_0 = arith.constant 0 : i32
    return %arg0, %c0_i32 : i32, i32
  }
  func.func @transform_1(%arg0: i32) -> (i32, i32) {
    %c0_i32 = arith.constant 0 : i32
    %c0_i32_0 = arith.constant 0 : i32
    %c0_i32_1 = arith.constant 0 : i32
    return %c0_i32, %c0_i32_0 : i32, i32
  }
  func.func @transform_2(%arg0: i32) -> (i32, i32) {
    %c0_i32 = arith.constant 0 : i32
    %c0_i32_0 = arith.constant 0 : i32
    %c0_i32_1 = arith.constant 0 : i32
    return %c0_i32, %c0_i32_0 : i32, i32
  }
  func.func @transform_3(%arg0: i32) -> (i32, i32) {
    %c0_i32 = arith.constant 0 : i32
    %c0_i32_0 = arith.constant 0 : i32
    %c0_i32_1 = arith.constant 0 : i32
    return %c0_i32, %c0_i32_0 : i32, i32
  }
  func.func @transform_4(%arg0: i32) -> (i32, i32) {
    %c0_i32 = arith.constant 0 : i32
    %c0_i32_0 = arith.constant 0 : i32
    %c0_i32_1 = arith.constant 0 : i32
    return %c0_i32, %c0_i32_0 : i32, i32
  }
  func.func @transform_5(%arg0: i32) -> (i32, i32) {
    %c0_i32 = arith.constant 0 : i32
    %c0_i32_0 = arith.constant 0 : i32
    return %arg0, %c0_i32 : i32, i32
  }
}

module attributes {stable_mosaic.version = 11 : i64} {
  func.func @_resize_kernel(%arg0: i32, %arg1: memref<1x8x1024xbf16, #tpu.memory_space<vmem>>, %arg2: memref<16x8xbf16, #tpu.memory_space<vmem>>, %arg3: memref<1x16x2048xbf16, #tpu.memory_space<vmem>>) attributes {dimension_semantics = [#tpu.dimension_semantics<parallel>], iteration_bounds = array<i64: 2>, scalar_prefetch = 0 : i64, scratch_operands = 0 : i64, tpu.core_type = #tpu.core_type<tc>, window_params = [{transform_indices = @transform_0, window_bounds = array<i64: 1, 8, 1024>}, {pipeline_mode = #tpu.pipeline_mode<synchronous>, transform_indices = @transform_1, window_bounds = array<i64: 16, 8>}, {transform_indices = @transform_2, window_bounds = array<i64: 1, 16, 2048>}]} {
    %c0 = arith.constant 0 : index
    %c0_0 = arith.constant 0 : index
    %0 = vector.load %arg2[%c0, %c0_0] : memref<16x8xbf16, #tpu.memory_space<vmem>>, vector<16x8xbf16>
    %c0_1 = arith.constant 0 : index
    %c0_2 = arith.constant 0 : index
    %c0_3 = arith.constant 0 : index
    %1 = vector.load %arg1[%c0_1, %c0_2, %c0_3] : memref<1x8x1024xbf16, #tpu.memory_space<vmem>>, vector<1x8x1024xbf16>
    %2 = vector.shape_cast %1 : vector<1x8x1024xbf16> to vector<8x1024xbf16>
    %cst = arith.constant dense<0.000000e+00> : vector<16x1024xf32>
    %3 = tpu.matmul %0, %2, %cst {dimension_numbers = #tpu.dot_dimension_numbers<[1], [0], [0], [1], [0, 0, 1, 1], [], []>} : vector<16x8xbf16>, vector<8x1024xbf16>, vector<16x1024xf32> -> vector<16x1024xf32>
    %4 = vector.extract_strided_slice %3 {offsets = [0, 0], sizes = [16, 128], strides = [1, 1]} : vector<16x1024xf32> to vector<16x128xf32>
    %cst_4 = arith.constant 1.000000e+00 : f32
    %5 = vector.broadcast %cst_4 : f32 to vector<16x128xf32>
    %6 = arith.mulf %5, %4 : vector<16x128xf32>
    %7 = vector.extract_strided_slice %3 {offsets = [0, 128], sizes = [16, 128], strides = [1, 1]} : vector<16x1024xf32> to vector<16x128xf32>
    %cst_5 = arith.constant 0.000000e+00 : f32
    %8 = vector.broadcast %cst_5 : f32 to vector<16x128xf32>
    %9 = arith.mulf %8, %7 : vector<16x128xf32>
    %10 = arith.addf %6, %9 : vector<16x128xf32>
    %11 = arith.truncf %10 : vector<16x128xf32> to vector<16x128xbf16>
    %c0_6 = arith.constant 0 : index
    %c0_7 = arith.constant 0 : index
    %c0_8 = arith.constant 0 : index
    %12 = vector.load %arg3[%c0_6, %c0_7, %c0_8] : memref<1x16x2048xbf16, #tpu.memory_space<vmem>>, vector<1x16x128xbf16>
    %13 = vector.shape_cast %12 : vector<1x16x128xbf16> to vector<16x128xbf16>
    %14 = vector.shape_cast %11 : vector<16x128xbf16> to vector<1x16x128xbf16>
    tpu.vector_store %arg3[%c0_6, %c0_7, %c0_8], %14 {strides = array<i32>} : memref<1x16x2048xbf16, #tpu.memory_space<vmem>>, vector<1x16x128xbf16>,
    %15 = vector.extract_strided_slice %3 {offsets = [0, 0], sizes = [16, 128], strides = [1, 1]} : vector<16x1024xf32> to vector<16x128xf32>
    %cst_9 = arith.constant 7.500000e-01 : f32
    %16 = vector.broadcast %cst_9 : f32 to vector<16x128xf32>
    %17 = arith.mulf %16, %15 : vector<16x128xf32>
    %18 = vector.extract_strided_slice %3 {offsets = [0, 128], sizes = [16, 128], strides = [1, 1]} : vector<16x1024xf32> to vector<16x128xf32>
    %cst_10 = arith.constant 2.500000e-01 : f32
    %19 = vector.broadcast %cst_10 : f32 to vector<16x128xf32>
    %20 = arith.mulf %19, %18 : vector<16x128xf32>
    %21 = arith.addf %17, %20 : vector<16x128xf32>
    %22 = arith.truncf %21 : vector<16x128xf32> to vector<16x128xbf16>
    %c0_11 = arith.constant 0 : index
    %c0_12 = arith.constant 0 : index
    %c128 = arith.constant 128 : index
    %23 = vector.load %arg3[%c0_11, %c0_12, %c128] : memref<1x16x2048xbf16, #tpu.memory_space<vmem>>, vector<1x16x128xbf16>
    %24 = vector.shape_cast %23 : vector<1x16x128xbf16> to vector<16x128xbf16>
    %25 = vector.shape_cast %22 : vector<16x128xbf16> to vector<1x16x128xbf16>
    tpu.vector_store %arg3[%c0_11, %c0_12, %c128], %25 {strides = array<i32>} : memref<1x16x2048xbf16, #tpu.memory_space<vmem>>, vector<1x16x128xbf16>,
    %26 = vector.extract_strided_slice %3 {offsets = [0, 0], sizes = [16, 128], strides = [1, 1]} : vector<16x1024xf32> to vector<16x128xf32>
    %cst_13 = arith.constant 2.500000e-01 : f32
    %27 = vector.broadcast %cst_13 : f32 to vector<16x128xf32>
    %28 = arith.mulf %27, %26 : vector<16x128xf32>
    %29 = vector.extract_strided_slice %3 {offsets = [0, 128], sizes = [16, 128], strides = [1, 1]} : vector<16x1024xf32> to vector<16x128xf32>
    %cst_14 = arith.constant 7.500000e-01 : f32
    %30 = vector.broadcast %cst_14 : f32 to vector<16x128xf32>
    %31 = arith.mulf %30, %29 : vector<16x128xf32>
    %32 = arith.addf %28, %31 : vector<16x128xf32>
    %33 = arith.truncf %32 : vector<16x128xf32> to vector<16x128xbf16>
    %c0_15 = arith.constant 0 : index
    %c0_16 = arith.constant 0 : index
    %c256 = arith.constant 256 : index
    %34 = vector.load %arg3[%c0_15, %c0_16, %c256] : memref<1x16x2048xbf16, #tpu.memory_space<vmem>>, vector<1x16x128xbf16>
    %35 = vector.shape_cast %34 : vector<1x16x128xbf16> to vector<16x128xbf16>
    %36 = vector.shape_cast %33 : vector<16x128xbf16> to vector<1x16x128xbf16>
    tpu.vector_store %arg3[%c0_15, %c0_16, %c256], %36 {strides = array<i32>} : memref<1x16x2048xbf16, #tpu.memory_space<vmem>>, vector<1x16x128xbf16>,
    %37 = vector.extract_strided_slice %3 {offsets = [0, 128], sizes = [16, 128], strides = [1, 1]} : vector<16x1024xf32> to vector<16x128xf32>
    %cst_17 = arith.constant 7.500000e-01 : f32
    %38 = vector.broadcast %cst_17 : f32 to vector<16x128xf32>
    %39 = arith.mulf %38, %37 : vector<16x128xf32>
    %40 = vector.extract_strided_slice %3 {offsets = [0, 256], sizes = [16, 128], strides = [1, 1]} : vector<16x1024xf32> to vector<16x128xf32>
    %cst_18 = arith.constant 2.500000e-01 : f32
    %41 = vector.broadcast %cst_18 : f32 to vector<16x128xf32>
    %42 = arith.mulf %41, %40 : vector<16x128xf32>
    %43 = arith.addf %39, %42 : vector<16x128xf32>
    %44 = arith.truncf %43 : vector<16x128xf32> to vector<16x128xbf16>
    %c0_19 = arith.constant 0 : index
    %c0_20 = arith.constant 0 : index
    %c384 = arith.constant 384 : index
    %45 = vector.load %arg3[%c0_19, %c0_20, %c384] : memref<1x16x2048xbf16, #tpu.memory_space<vmem>>, vector<1x16x128xbf16>
    %46 = vector.shape_cast %45 : vector<1x16x128xbf16> to vector<16x128xbf16>
    %47 = vector.shape_cast %44 : vector<16x128xbf16> to vector<1x16x128xbf16>
    tpu.vector_store %arg3[%c0_19, %c0_20, %c384], %47 {strides = array<i32>} : memref<1x16x2048xbf16, #tpu.memory_space<vmem>>, vector<1x16x128xbf16>,
    %48 = vector.extract_strided_slice %3 {offsets = [0, 128], sizes = [16, 128], strides = [1, 1]} : vector<16x1024xf32> to vector<16x128xf32>
    %cst_21 = arith.constant 2.500000e-01 : f32
    %49 = vector.broadcast %cst_21 : f32 to vector<16x128xf32>
    %50 = arith.mulf %49, %48 : vector<16x128xf32>
    %51 = vector.extract_strided_slice %3 {offsets = [0, 256], sizes = [16, 128], strides = [1, 1]} : vector<16x1024xf32> to vector<16x128xf32>
    %cst_22 = arith.constant 7.500000e-01 : f32
    %52 = vector.broadcast %cst_22 : f32 to vector<16x128xf32>
    %53 = arith.mulf %52, %51 : vector<16x128xf32>
    %54 = arith.addf %50, %53 : vector<16x128xf32>
    %55 = arith.truncf %54 : vector<16x128xf32> to vector<16x128xbf16>
    %c0_23 = arith.constant 0 : index
    %c0_24 = arith.constant 0 : index
    %c512 = arith.constant 512 : index
    %56 = vector.load %arg3[%c0_23, %c0_24, %c512] : memref<1x16x2048xbf16, #tpu.memory_space<vmem>>, vector<1x16x128xbf16>
    %57 = vector.shape_cast %56 : vector<1x16x128xbf16> to vector<16x128xbf16>
    %58 = vector.shape_cast %55 : vector<16x128xbf16> to vector<1x16x128xbf16>
    tpu.vector_store %arg3[%c0_23, %c0_24, %c512], %58 {strides = array<i32>} : memref<1x16x2048xbf16, #tpu.memory_space<vmem>>, vector<1x16x128xbf16>,
    %59 = vector.extract_strided_slice %3 {offsets = [0, 256], sizes = [16, 128], strides = [1, 1]} : vector<16x1024xf32> to vector<16x128xf32>
    %cst_25 = arith.constant 7.500000e-01 : f32
    %60 = vector.broadcast %cst_25 : f32 to vector<16x128xf32>
    %61 = arith.mulf %60, %59 : vector<16x128xf32>
    %62 = vector.extract_strided_slice %3 {offsets = [0, 384], sizes = [16, 128], strides = [1, 1]} : vector<16x1024xf32> to vector<16x128xf32>
    %cst_26 = arith.constant 2.500000e-01 : f32
    %63 = vector.broadcast %cst_26 : f32 to vector<16x128xf32>
    %64 = arith.mulf %63, %62 : vector<16x128xf32>
    %65 = arith.addf %61, %64 : vector<16x128xf32>
    %66 = arith.truncf %65 : vector<16x128xf32> to vector<16x128xbf16>
    %c0_27 = arith.constant 0 : index
    %c0_28 = arith.constant 0 : index
    %c640 = arith.constant 640 : index
    %67 = vector.load %arg3[%c0_27, %c0_28, %c640] : memref<1x16x2048xbf16, #tpu.memory_space<vmem>>, vector<1x16x128xbf16>
    %68 = vector.shape_cast %67 : vector<1x16x128xbf16> to vector<16x128xbf16>
    %69 = vector.shape_cast %66 : vector<16x128xbf16> to vector<1x16x128xbf16>
    tpu.vector_store %arg3[%c0_27, %c0_28, %c640], %69 {strides = array<i32>} : memref<1x16x2048xbf16, #tpu.memory_space<vmem>>, vector<1x16x128xbf16>,
    %70 = vector.extract_strided_slice %3 {offsets = [0, 256], sizes = [16, 128], strides = [1, 1]} : vector<16x1024xf32> to vector<16x128xf32>
    %cst_29 = arith.constant 2.500000e-01 : f32
    %71 = vector.broadcast %cst_29 : f32 to vector<16x128xf32>
    %72 = arith.mulf %71, %70 : vector<16x128xf32>
    %73 = vector.extract_strided_slice %3 {offsets = [0, 384], sizes = [16, 128], strides = [1, 1]} : vector<16x1024xf32> to vector<16x128xf32>
    %cst_30 = arith.constant 7.500000e-01 : f32
    %74 = vector.broadcast %cst_30 : f32 to vector<16x128xf32>
    %75 = arith.mulf %74, %73 : vector<16x128xf32>
    %76 = arith.addf %72, %75 : vector<16x128xf32>
    %77 = arith.truncf %76 : vector<16x128xf32> to vector<16x128xbf16>
    %c0_31 = arith.constant 0 : index
    %c0_32 = arith.constant 0 : index
    %c768 = arith.constant 768 : index
    %78 = vector.load %arg3[%c0_31, %c0_32, %c768] : memref<1x16x2048xbf16, #tpu.memory_space<vmem>>, vector<1x16x128xbf16>
    %79 = vector.shape_cast %78 : vector<1x16x128xbf16> to vector<16x128xbf16>
    %80 = vector.shape_cast %77 : vector<16x128xbf16> to vector<1x16x128xbf16>
    tpu.vector_store %arg3[%c0_31, %c0_32, %c768], %80 {strides = array<i32>} : memref<1x16x2048xbf16, #tpu.memory_space<vmem>>, vector<1x16x128xbf16>,
    %81 = vector.extract_strided_slice %3 {offsets = [0, 384], sizes = [16, 128], strides = [1, 1]} : vector<16x1024xf32> to vector<16x128xf32>
    %cst_33 = arith.constant 7.500000e-01 : f32
    %82 = vector.broadcast %cst_33 : f32 to vector<16x128xf32>
    %83 = arith.mulf %82, %81 : vector<16x128xf32>
    %84 = vector.extract_strided_slice %3 {offsets = [0, 512], sizes = [16, 128], strides = [1, 1]} : vector<16x1024xf32> to vector<16x128xf32>
    %cst_34 = arith.constant 2.500000e-01 : f32
    %85 = vector.broadcast %cst_34 : f32 to vector<16x128xf32>
    %86 = arith.mulf %85, %84 : vector<16x128xf32>
    %87 = arith.addf %83, %86 : vector<16x128xf32>
    %88 = arith.truncf %87 : vector<16x128xf32> to vector<16x128xbf16>
    %c0_35 = arith.constant 0 : index
    %c0_36 = arith.constant 0 : index
    %c896 = arith.constant 896 : index
    %89 = vector.load %arg3[%c0_35, %c0_36, %c896] : memref<1x16x2048xbf16, #tpu.memory_space<vmem>>, vector<1x16x128xbf16>
    %90 = vector.shape_cast %89 : vector<1x16x128xbf16> to vector<16x128xbf16>
    %91 = vector.shape_cast %88 : vector<16x128xbf16> to vector<1x16x128xbf16>
    tpu.vector_store %arg3[%c0_35, %c0_36, %c896], %91 {strides = array<i32>} : memref<1x16x2048xbf16, #tpu.memory_space<vmem>>, vector<1x16x128xbf16>,
    %92 = vector.extract_strided_slice %3 {offsets = [0, 384], sizes = [16, 128], strides = [1, 1]} : vector<16x1024xf32> to vector<16x128xf32>
    %cst_37 = arith.constant 2.500000e-01 : f32
    %93 = vector.broadcast %cst_37 : f32 to vector<16x128xf32>
    %94 = arith.mulf %93, %92 : vector<16x128xf32>
    %95 = vector.extract_strided_slice %3 {offsets = [0, 512], sizes = [16, 128], strides = [1, 1]} : vector<16x1024xf32> to vector<16x128xf32>
    %cst_38 = arith.constant 7.500000e-01 : f32
    %96 = vector.broadcast %cst_38 : f32 to vector<16x128xf32>
    %97 = arith.mulf %96, %95 : vector<16x128xf32>
    %98 = arith.addf %94, %97 : vector<16x128xf32>
    %99 = arith.truncf %98 : vector<16x128xf32> to vector<16x128xbf16>
    %c0_39 = arith.constant 0 : index
    %c0_40 = arith.constant 0 : index
    %c1024 = arith.constant 1024 : index
    %100 = vector.load %arg3[%c0_39, %c0_40, %c1024] : memref<1x16x2048xbf16, #tpu.memory_space<vmem>>, vector<1x16x128xbf16>
    %101 = vector.shape_cast %100 : vector<1x16x128xbf16> to vector<16x128xbf16>
    %102 = vector.shape_cast %99 : vector<16x128xbf16> to vector<1x16x128xbf16>
    tpu.vector_store %arg3[%c0_39, %c0_40, %c1024], %102 {strides = array<i32>} : memref<1x16x2048xbf16, #tpu.memory_space<vmem>>, vector<1x16x128xbf16>,
    %103 = vector.extract_strided_slice %3 {offsets = [0, 512], sizes = [16, 128], strides = [1, 1]} : vector<16x1024xf32> to vector<16x128xf32>
    %cst_41 = arith.constant 7.500000e-01 : f32
    %104 = vector.broadcast %cst_41 : f32 to vector<16x128xf32>
    %105 = arith.mulf %104, %103 : vector<16x128xf32>
    %106 = vector.extract_strided_slice %3 {offsets = [0, 640], sizes = [16, 128], strides = [1, 1]} : vector<16x1024xf32> to vector<16x128xf32>
    %cst_42 = arith.constant 2.500000e-01 : f32
    %107 = vector.broadcast %cst_42 : f32 to vector<16x128xf32>
    %108 = arith.mulf %107, %106 : vector<16x128xf32>
    %109 = arith.addf %105, %108 : vector<16x128xf32>
    %110 = arith.truncf %109 : vector<16x128xf32> to vector<16x128xbf16>
    %c0_43 = arith.constant 0 : index
    %c0_44 = arith.constant 0 : index
    %c1152 = arith.constant 1152 : index
    %111 = vector.load %arg3[%c0_43, %c0_44, %c1152] : memref<1x16x2048xbf16, #tpu.memory_space<vmem>>, vector<1x16x128xbf16>
    %112 = vector.shape_cast %111 : vector<1x16x128xbf16> to vector<16x128xbf16>
    %113 = vector.shape_cast %110 : vector<16x128xbf16> to vector<1x16x128xbf16>
    tpu.vector_store %arg3[%c0_43, %c0_44, %c1152], %113 {strides = array<i32>} : memref<1x16x2048xbf16, #tpu.memory_space<vmem>>, vector<1x16x128xbf16>,
    %114 = vector.extract_strided_slice %3 {offsets = [0, 512], sizes = [16, 128], strides = [1, 1]} : vector<16x1024xf32> to vector<16x128xf32>
    %cst_45 = arith.constant 2.500000e-01 : f32
    %115 = vector.broadcast %cst_45 : f32 to vector<16x128xf32>
    %116 = arith.mulf %115, %114 : vector<16x128xf32>
    %117 = vector.extract_strided_slice %3 {offsets = [0, 640], sizes = [16, 128], strides = [1, 1]} : vector<16x1024xf32> to vector<16x128xf32>
    %cst_46 = arith.constant 7.500000e-01 : f32
    %118 = vector.broadcast %cst_46 : f32 to vector<16x128xf32>
    %119 = arith.mulf %118, %117 : vector<16x128xf32>
    %120 = arith.addf %116, %119 : vector<16x128xf32>
    %121 = arith.truncf %120 : vector<16x128xf32> to vector<16x128xbf16>
    %c0_47 = arith.constant 0 : index
    %c0_48 = arith.constant 0 : index
    %c1280 = arith.constant 1280 : index
    %122 = vector.load %arg3[%c0_47, %c0_48, %c1280] : memref<1x16x2048xbf16, #tpu.memory_space<vmem>>, vector<1x16x128xbf16>
    %123 = vector.shape_cast %122 : vector<1x16x128xbf16> to vector<16x128xbf16>
    %124 = vector.shape_cast %121 : vector<16x128xbf16> to vector<1x16x128xbf16>
    tpu.vector_store %arg3[%c0_47, %c0_48, %c1280], %124 {strides = array<i32>} : memref<1x16x2048xbf16, #tpu.memory_space<vmem>>, vector<1x16x128xbf16>,
    %125 = vector.extract_strided_slice %3 {offsets = [0, 640], sizes = [16, 128], strides = [1, 1]} : vector<16x1024xf32> to vector<16x128xf32>
    %cst_49 = arith.constant 7.500000e-01 : f32
    %126 = vector.broadcast %cst_49 : f32 to vector<16x128xf32>
    %127 = arith.mulf %126, %125 : vector<16x128xf32>
    %128 = vector.extract_strided_slice %3 {offsets = [0, 768], sizes = [16, 128], strides = [1, 1]} : vector<16x1024xf32> to vector<16x128xf32>
    %cst_50 = arith.constant 2.500000e-01 : f32
    %129 = vector.broadcast %cst_50 : f32 to vector<16x128xf32>
    %130 = arith.mulf %129, %128 : vector<16x128xf32>
    %131 = arith.addf %127, %130 : vector<16x128xf32>
    %132 = arith.truncf %131 : vector<16x128xf32> to vector<16x128xbf16>
    %c0_51 = arith.constant 0 : index
    %c0_52 = arith.constant 0 : index
    %c1408 = arith.constant 1408 : index
    %133 = vector.load %arg3[%c0_51, %c0_52, %c1408] : memref<1x16x2048xbf16, #tpu.memory_space<vmem>>, vector<1x16x128xbf16>
    %134 = vector.shape_cast %133 : vector<1x16x128xbf16> to vector<16x128xbf16>
    %135 = vector.shape_cast %132 : vector<16x128xbf16> to vector<1x16x128xbf16>
    tpu.vector_store %arg3[%c0_51, %c0_52, %c1408], %135 {strides = array<i32>} : memref<1x16x2048xbf16, #tpu.memory_space<vmem>>, vector<1x16x128xbf16>,
    %136 = vector.extract_strided_slice %3 {offsets = [0, 640], sizes = [16, 128], strides = [1, 1]} : vector<16x1024xf32> to vector<16x128xf32>
    %cst_53 = arith.constant 2.500000e-01 : f32
    %137 = vector.broadcast %cst_53 : f32 to vector<16x128xf32>
    %138 = arith.mulf %137, %136 : vector<16x128xf32>
    %139 = vector.extract_strided_slice %3 {offsets = [0, 768], sizes = [16, 128], strides = [1, 1]} : vector<16x1024xf32> to vector<16x128xf32>
    %cst_54 = arith.constant 7.500000e-01 : f32
    %140 = vector.broadcast %cst_54 : f32 to vector<16x128xf32>
    %141 = arith.mulf %140, %139 : vector<16x128xf32>
    %142 = arith.addf %138, %141 : vector<16x128xf32>
    %143 = arith.truncf %142 : vector<16x128xf32> to vector<16x128xbf16>
    %c0_55 = arith.constant 0 : index
    %c0_56 = arith.constant 0 : index
    %c1536 = arith.constant 1536 : index
    %144 = vector.load %arg3[%c0_55, %c0_56, %c1536] : memref<1x16x2048xbf16, #tpu.memory_space<vmem>>, vector<1x16x128xbf16>
    %145 = vector.shape_cast %144 : vector<1x16x128xbf16> to vector<16x128xbf16>
    %146 = vector.shape_cast %143 : vector<16x128xbf16> to vector<1x16x128xbf16>
    tpu.vector_store %arg3[%c0_55, %c0_56, %c1536], %146 {strides = array<i32>} : memref<1x16x2048xbf16, #tpu.memory_space<vmem>>, vector<1x16x128xbf16>,
    %147 = vector.extract_strided_slice %3 {offsets = [0, 768], sizes = [16, 128], strides = [1, 1]} : vector<16x1024xf32> to vector<16x128xf32>
    %cst_57 = arith.constant 7.500000e-01 : f32
    %148 = vector.broadcast %cst_57 : f32 to vector<16x128xf32>
    %149 = arith.mulf %148, %147 : vector<16x128xf32>
    %150 = vector.extract_strided_slice %3 {offsets = [0, 896], sizes = [16, 128], strides = [1, 1]} : vector<16x1024xf32> to vector<16x128xf32>
    %cst_58 = arith.constant 2.500000e-01 : f32
    %151 = vector.broadcast %cst_58 : f32 to vector<16x128xf32>
    %152 = arith.mulf %151, %150 : vector<16x128xf32>
    %153 = arith.addf %149, %152 : vector<16x128xf32>
    %154 = arith.truncf %153 : vector<16x128xf32> to vector<16x128xbf16>
    %c0_59 = arith.constant 0 : index
    %c0_60 = arith.constant 0 : index
    %c1664 = arith.constant 1664 : index
    %155 = vector.load %arg3[%c0_59, %c0_60, %c1664] : memref<1x16x2048xbf16, #tpu.memory_space<vmem>>, vector<1x16x128xbf16>
    %156 = vector.shape_cast %155 : vector<1x16x128xbf16> to vector<16x128xbf16>
    %157 = vector.shape_cast %154 : vector<16x128xbf16> to vector<1x16x128xbf16>
    tpu.vector_store %arg3[%c0_59, %c0_60, %c1664], %157 {strides = array<i32>} : memref<1x16x2048xbf16, #tpu.memory_space<vmem>>, vector<1x16x128xbf16>,
    %158 = vector.extract_strided_slice %3 {offsets = [0, 768], sizes = [16, 128], strides = [1, 1]} : vector<16x1024xf32> to vector<16x128xf32>
    %cst_61 = arith.constant 2.500000e-01 : f32
    %159 = vector.broadcast %cst_61 : f32 to vector<16x128xf32>
    %160 = arith.mulf %159, %158 : vector<16x128xf32>
    %161 = vector.extract_strided_slice %3 {offsets = [0, 896], sizes = [16, 128], strides = [1, 1]} : vector<16x1024xf32> to vector<16x128xf32>
    %cst_62 = arith.constant 7.500000e-01 : f32
    %162 = vector.broadcast %cst_62 : f32 to vector<16x128xf32>
    %163 = arith.mulf %162, %161 : vector<16x128xf32>
    %164 = arith.addf %160, %163 : vector<16x128xf32>
    %165 = arith.truncf %164 : vector<16x128xf32> to vector<16x128xbf16>
    %c0_63 = arith.constant 0 : index
    %c0_64 = arith.constant 0 : index
    %c1792 = arith.constant 1792 : index
    %166 = vector.load %arg3[%c0_63, %c0_64, %c1792] : memref<1x16x2048xbf16, #tpu.memory_space<vmem>>, vector<1x16x128xbf16>
    %167 = vector.shape_cast %166 : vector<1x16x128xbf16> to vector<16x128xbf16>
    %168 = vector.shape_cast %165 : vector<16x128xbf16> to vector<1x16x128xbf16>
    tpu.vector_store %arg3[%c0_63, %c0_64, %c1792], %168 {strides = array<i32>} : memref<1x16x2048xbf16, #tpu.memory_space<vmem>>, vector<1x16x128xbf16>,
    %169 = vector.extract_strided_slice %3 {offsets = [0, 896], sizes = [16, 128], strides = [1, 1]} : vector<16x1024xf32> to vector<16x128xf32>
    %cst_65 = arith.constant 7.500000e-01 : f32
    %170 = vector.broadcast %cst_65 : f32 to vector<16x128xf32>
    %171 = arith.mulf %170, %169 : vector<16x128xf32>
    %172 = vector.extract_strided_slice %3 {offsets = [0, 896], sizes = [16, 128], strides = [1, 1]} : vector<16x1024xf32> to vector<16x128xf32>
    %cst_66 = arith.constant 2.500000e-01 : f32
    %173 = vector.broadcast %cst_66 : f32 to vector<16x128xf32>
    %174 = arith.mulf %173, %172 : vector<16x128xf32>
    %175 = arith.addf %171, %174 : vector<16x128xf32>
    %176 = arith.truncf %175 : vector<16x128xf32> to vector<16x128xbf16>
    %c0_67 = arith.constant 0 : index
    %c0_68 = arith.constant 0 : index
    %c1920 = arith.constant 1920 : index
    %177 = vector.load %arg3[%c0_67, %c0_68, %c1920] : memref<1x16x2048xbf16, #tpu.memory_space<vmem>>, vector<1x16x128xbf16>
    %178 = vector.shape_cast %177 : vector<1x16x128xbf16> to vector<16x128xbf16>
    %179 = vector.shape_cast %176 : vector<16x128xbf16> to vector<1x16x128xbf16>
    tpu.vector_store %arg3[%c0_67, %c0_68, %c1920], %179 {strides = array<i32>} : memref<1x16x2048xbf16, #tpu.memory_space<vmem>>, vector<1x16x128xbf16>,
    return
  }
  func.func @transform_0(%arg0: i32) -> (i32, i32, i32) {
    %c0_i32 = arith.constant 0 : i32
    %c0_i32_0 = arith.constant 0 : i32
    %c0_i32_1 = arith.constant 0 : i32
    return %arg0, %c0_i32, %c0_i32_0 : i32, i32, i32
  }
  func.func @transform_1(%arg0: i32) -> (i32, i32) {
    %c0_i32 = arith.constant 0 : i32
    %c0_i32_0 = arith.constant 0 : i32
    %c0_i32_1 = arith.constant 0 : i32
    return %c0_i32, %c0_i32_0 : i32, i32
  }
  func.func @transform_2(%arg0: i32) -> (i32, i32, i32) {
    %c0_i32 = arith.constant 0 : i32
    %c0_i32_0 = arith.constant 0 : i32
    %c0_i32_1 = arith.constant 0 : i32
    return %arg0, %c0_i32, %c0_i32_0 : i32, i32, i32
  }
}

</mosaic_0001>

<bundles_post_ra>
// kernel: forward.4
= control target key start
LH: loop header
LB: loop body
LE: loop exit
PB: predicated region body
PF: predicated region fallthrough
CT: control target
= control target key end

     0   :  { %s1085_s12 = smov 0   ;;  %s1204_s0 = inlined_call_operand.vmem [shape: bf16[512,32], index: 0, kind: input, shape index: {}]   ;;  %s1205_s1 = inlined_call_operand.vmem [shape: bf16[32,128], index: 1, kind: input, shape index: {}]   ;;  %s1206_s2 = inlined_call_operand.vmem [shape: f32[1,128], index: 2, kind: input, shape index: {}]   ;;  %s1207_s3 = inlined_call_operand.vmem [shape: bf16[512,128], index: 3, kind: output, shape index: {}]  }
   0x1 LB: > { %s768_s13 = sadd.s32 4294967295, %s1063_s12   ;;  %p772_p0 = scmp.ge.s32.totalorder %s1063_s12, 1  ;;  %s1063_s12 = sphi %s1085_s12, %s13_s12  }
   0x2   : > { %p138_p1 = scmp.lt.s32.totalorder %s1063_s12, 3 }
   0x4   : > { %p139_p2 = pnand %p772_p0, %p138_p1 }
   0x5   : > { %v1039_v0 = vld [vmem:[%s1205_s1] sm:$0xff] (!%p139_p2)   ;;  %s773_s16 = sshll.u32 (!%p139_p2), %s768_s13, 5  ;;  %v1040_v1 = vld [vmem:[%s1205_s1 + $0x8] sm:$0xff] (!%p139_p2)   ;;  %vm310_vm0 = vcmask (!%p139_p2), 261120  }
   0x6   : > { %142 = sbr.rel (%p139_p2) target bundleno = 265 (0x109), region = 32  ;;  %p163_p3 = scmp.lt.s32.totalorder (!%p139_p2), %s773_s16, 63  ;;  %991 = vmatprep.subr.bf16.mxu0 (!%p139_p2), %v1039_v0  ;;  %1027 = vmatprep.subr.bf16.mxu1 (!%p139_p2), %v1039_v0  ;;  %v1144_v18 = vld [vmem:[%s1206_s2] ss:$0 sm:$0xff] (!%p139_p2) }
   0x7   : > { %992 = vmatpush3.bf16.msra.mxu0 (!%p139_p2), %v1039_v0  ;;  %1029 = vmatpush3.bf16.msra.mxu1 (!%p139_p2), %v1039_v0 }
   0x8   : > { %993 = vmatprep.subr.bf16.mxu0 (!%p139_p2), %v1040_v1  ;;  %1028 = vmatprep.subr.bf16.mxu1 (!%p139_p2), %v1040_v1 }
   0xb   : > { %994 = vmatpush3.bf16.msra.mxu0 (!%p139_p2), %v1040_v1  ;;  %1030 = vmatpush3.bf16.msra.mxu1 (!%p139_p2), %v1040_v1 }
   0xd   : > { %s1209_s16 = smov (!%p163_p3, %s773_s16), 63 }
   0xe   : > { %s774_s19 = sshll.u32 %s1209_s16, 2 }
   0xf   : > { %s1107_s22 = scalar_lea.vmem %s1204_s0, %s774_s19  ;;  %s1159_s27 = scalar_lea.vmem %s1207_s3, %s774_s19 }
  0x10   : > { %v1041_v2 = vld [vmem:[%s1107_s22] sm:$0xff]   ;;  %v1043_v4 = vld [vmem:[%s1107_s22 + $0x8] sm:$0xff]   ;;  %v1045_v6 = vld [vmem:[%s1107_s22 + $0x10] sm:$0xff]  }
  0x11   : > { %v1042_v3 = vld [vmem:[%s1107_s22 + $0x40] sm:$0xff]   ;;  %995 = vmatprep.mubr.msk.bf16.mxu0 %vm310_vm0, %v1041_v2  ;;  %v1044_v5 = vld [vmem:[%s1107_s22 + $0x48] sm:$0xff]   ;;  %v1046_v7 = vld [vmem:[%s1107_s22 + $0x50] sm:$0xff]  }
  0x12   : > { %1011 = vmatprep.mubr.msk.bf16.mxu1 %vm310_vm0, %v1042_v3  ;;  %996 = vmatmul.mubr.msk.bf16.vlgmr.msra.gmra.mrb[0].mxu0 %vm310_vm0, %v1043_v4  ;;  %v1047_v8 = vld [vmem:[%s1107_s22 + $0x18] sm:$0xff]   ;;  %v1049_v10 = vld [vmem:[%s1107_s22 + $0x20] sm:$0xff]   ;;  %v1051_v12 = vld [vmem:[%s1107_s22 + $0x28] sm:$0xff]  }
  0x13   : > { %1012 = vmatmul.mubr.msk.bf16.vlgmr.msra.gmra.mrb[0].mxu1 %vm310_vm0, %v1044_v5  ;;  %999 = vmatprep.mubr.msk.bf16.mxu0 %vm310_vm0, %v1045_v6  ;;  %v1048_v9 = vld [vmem:[%s1107_s22 + $0x58] sm:$0xff]   ;;  %v1050_v11 = vld [vmem:[%s1107_s22 + $0x60] sm:$0xff]   ;;  %v1052_v13 = vld [vmem:[%s1107_s22 + $0x68] sm:$0xff]  }
  0x14   : > { %1015 = vmatprep.mubr.msk.bf16.mxu1 %vm310_vm0, %v1046_v7  ;;  %v1053_v14 = vld [vmem:[%s1107_s22 + $0x30] sm:$0xff]   ;;  %v1055_v16 = vld [vmem:[%s1107_s22 + $0x38] sm:$0xff]  }
  0x15   : > { %v1054_v15 = vld [vmem:[%s1107_s22 + $0x70] sm:$0xff]   ;;  %v1056_v17 = vld [vmem:[%s1107_s22 + $0x78] sm:$0xff]  }
  0x1a   : > { %1000 = vmatmul.mubr.msk.bf16.gmra.mrb[4].mxu0 %vm310_vm0, %v1047_v8 }
  0x1b   : > { %1016 = vmatmul.mubr.msk.bf16.gmra.mrb[4].mxu1 %vm310_vm0, %v1048_v9  ;;  %1003 = vmatprep.mubr.msk.bf16.mxu0 %vm310_vm0, %v1049_v10 }
  0x1c   : > { %1019 = vmatprep.mubr.msk.bf16.mxu1 %vm310_vm0, %v1050_v11 }
  0x22   : > { %1004 = vmatmul.mubr.msk.bf16.gmra.mrb[8].mxu0 %vm310_vm0, %v1051_v12 }
  0x23   : > { %1020 = vmatmul.mubr.msk.bf16.gmra.mrb[8].mxu1 %vm310_vm0, %v1052_v13  ;;  %1007 = vmatprep.mubr.msk.bf16.mxu0 %vm310_vm0, %v1053_v14 }
  0x24   : > { %1023 = vmatprep.mubr.msk.bf16.mxu1 %vm310_vm0, %v1054_v15 }
  0x2a   : > { %1008 = vmatmul.mubr.msk.bf16.gmra.mrb[12].mxu0 %vm310_vm0, %v1055_v16 }
  0x2b   : > { %1024 = vmatmul.mubr.msk.bf16.gmra.mrb[12].mxu1 %vm310_vm0, %v1056_v17 }
  0xe5   : > { %v997_v19 = vpop.f32.mrb[0].mxu0 }
  0xe6   : > { %v402_v20 = vadd.f32 %v997_v19, %v1144_v18  ;;  %v1013_v21 = vpop.f32.mrb[0].mxu1  ;;  %v393_v22 = vpop.f32.mrb[1].mxu0 }
  0xe7   : > { %v466_v23 = vadd.f32 %v1013_v21, %v1144_v18  ;;  %v394_v24 = vadd.f32 %v1144_v18, %v393_v22  ;;  %v457_v25 = vpop.f32.mrb[1].mxu1  ;;  %v998_v26 = vpop.f32.mrb[2].mxu0 }
  0xe8   : > { %v458_v27 = vadd.f32 %v1144_v18, %v457_v25  ;;  %v405_v28 = vadd.f32 %v998_v26, %v1144_v18  ;;  %v1014_v29 = vpop.f32.mrb[2].mxu1  ;;  %v396_v30 = vpop.f32.mrb[3].mxu0  ;;  %v522_v34 = vmax.f32 %v402_v20, 0.0 }
  0xe9   : > { %v469_v31 = vadd.f32 %v1014_v29, %v1144_v18  ;;  %v397_v32 = vadd.f32 %v1144_v18, %v396_v30  ;;  %v460_v33 = vpop.f32.mrb[3].mxu1  ;;  %v538_v37 = vmax.f32 %v466_v23, 0.0  ;;  %v520_v38 = vmax.f32 %v394_v24, 0.0 }
  0xea   : > { %v523_v35 = vmax.f32 %v405_v28, 0.0  ;;  %v461_v36 = vadd.f32 %v1144_v18, %v460_v33  ;;  %v536_v41 = vmax.f32 %v458_v27, 0.0 }
  0xeb   : > { %v539_v39 = vmax.f32 %v469_v31, 0.0  ;;  %v521_v40 = vmax.f32 %v397_v32, 0.0 }
  0xec   : > { %v886_v42 = vpack.c.bf16 %v523_v35, %v522_v34  ;;  %v537_v43 = vmax.f32 %v461_v36, 0.0 }
  0xed   : > { %v926_v44 = vpack.c.bf16 %v539_v39, %v538_v37  ;;  %v881_v45 = vpack.c.bf16 %v521_v40, %v520_v38  ;;  %v1001_v46 = vpop.f32.mrb[4].mxu0 }
  0xee   : > { %958 = vst [vmem:[%s1159_s27 + $0x8] sm:$0xff] %v886_v42   ;;  %v921_v47 = vpack.c.bf16 %v537_v43, %v536_v41  ;;  %v418_v48 = vadd.f32 %v1001_v46, %v1144_v18  ;;  %v1017_v49 = vpop.f32.mrb[4].mxu1  ;;  %v409_v50 = vpop.f32.mrb[5].mxu0 }
  0xef   : > { %966 = vst [vmem:[%s1159_s27 + $0x48] sm:$0xff] %v926_v44   ;;  %882 = vst [vmem:[%s1159_s27] sm:$0xff] %v881_v45   ;;  %v482_v51 = vadd.f32 %v1017_v49, %v1144_v18  ;;  %v410_v52 = vadd.f32 %v1144_v18, %v409_v50  ;;  %v473_v53 = vpop.f32.mrb[5].mxu1  ;;  %v1002_v54 = vpop.f32.mrb[6].mxu0 }
  0xf0   : > { %965 = vst [vmem:[%s1159_s27 + $0x40] sm:$0xff] %v921_v47   ;;  %v474_v55 = vadd.f32 %v1144_v18, %v473_v53  ;;  %v421_v56 = vadd.f32 %v1002_v54, %v1144_v18  ;;  %v1018_v57 = vpop.f32.mrb[6].mxu1  ;;  %v412_v58 = vpop.f32.mrb[7].mxu0  ;;  %v526_v62 = vmax.f32 %v418_v48, 0.0 }
  0xf1   : > { %v485_v59 = vadd.f32 %v1018_v57, %v1144_v18  ;;  %v413_v60 = vadd.f32 %v1144_v18, %v412_v58  ;;  %v476_v61 = vpop.f32.mrb[7].mxu1  ;;  %v542_v1 = vmax.f32 %v482_v51, 0.0  ;;  %v524_v2 = vmax.f32 %v410_v52, 0.0 }
  0xf2   : > { %v527_v63 = vmax.f32 %v421_v56, 0.0  ;;  %v477_v0 = vadd.f32 %v1144_v18, %v476_v61  ;;  %v540_v5 = vmax.f32 %v474_v55, 0.0 }
  0xf3   : > { %v543_v3 = vmax.f32 %v485_v59, 0.0  ;;  %v525_v4 = vmax.f32 %v413_v60, 0.0 }
  0xf4   : > { %v896_v6 = vpack.c.bf16 %v527_v63, %v526_v62  ;;  %v541_v7 = vmax.f32 %v477_v0, 0.0 }
  0xf5   : > { %v936_v8 = vpack.c.bf16 %v543_v3, %v542_v1  ;;  %v891_v9 = vpack.c.bf16 %v525_v4, %v524_v2  ;;  %v1005_v10 = vpop.f32.mrb[8].mxu0 }
  0xf6   : > { %960 = vst [vmem:[%s1159_s27 + $0x18] sm:$0xff] %v896_v6   ;;  %v931_v11 = vpack.c.bf16 %v541_v7, %v540_v5  ;;  %v434_v12 = vadd.f32 %v1005_v10, %v1144_v18  ;;  %v1021_v13 = vpop.f32.mrb[8].mxu1  ;;  %v425_v14 = vpop.f32.mrb[9].mxu0 }
  0xf7   : > { %968 = vst [vmem:[%s1159_s27 + $0x58] sm:$0xff] %v936_v8   ;;  %959 = vst [vmem:[%s1159_s27 + $0x10] sm:$0xff] %v891_v9   ;;  %v498_v15 = vadd.f32 %v1021_v13, %v1144_v18  ;;  %v426_v16 = vadd.f32 %v1144_v18, %v425_v14  ;;  %v489_v17 = vpop.f32.mrb[9].mxu1  ;;  %v1006_v19 = vpop.f32.mrb[10].mxu0 }
  0xf8   : > { %967 = vst [vmem:[%s1159_s27 + $0x50] sm:$0xff] %v931_v11   ;;  %v490_v20 = vadd.f32 %v1144_v18, %v489_v17  ;;  %v437_v21 = vadd.f32 %v1006_v19, %v1144_v18  ;;  %v1022_v22 = vpop.f32.mrb[10].mxu1  ;;  %v428_v23 = vpop.f32.mrb[11].mxu0  ;;  %v530_v27 = vmax.f32 %v434_v12, 0.0 }
  0xf9   : > { %v501_v24 = vadd.f32 %v1022_v22, %v1144_v18  ;;  %v429_v25 = vadd.f32 %v1144_v18, %v428_v23  ;;  %v492_v26 = vpop.f32.mrb[11].mxu1  ;;  %v546_v30 = vmax.f32 %v498_v15, 0.0  ;;  %v528_v31 = vmax.f32 %v426_v16, 0.0 }
  0xfa   : > { %v531_v28 = vmax.f32 %v437_v21, 0.0  ;;  %v493_v29 = vadd.f32 %v1144_v18, %v492_v26  ;;  %v544_v34 = vmax.f32 %v490_v20, 0.0 }
  0xfb   : > { %v547_v32 = vmax.f32 %v501_v24, 0.0  ;;  %v529_v33 = vmax.f32 %v429_v25, 0.0 }
  0xfc   : > { %v906_v35 = vpack.c.bf16 %v531_v28, %v530_v27  ;;  %v545_v36 = vmax.f32 %v493_v29, 0.0 }
  0xfd   : > { %v946_v37 = vpack.c.bf16 %v547_v32, %v546_v30  ;;  %v901_v38 = vpack.c.bf16 %v529_v33, %v528_v31  ;;  %v1009_v39 = vpop.f32.mrb[12].mxu0 }
  0xfe   : > { %962 = vst [vmem:[%s1159_s27 + $0x28] sm:$0xff] %v906_v35   ;;  %v941_v40 = vpack.c.bf16 %v545_v36, %v544_v34  ;;  %v450_v41 = vadd.f32 %v1009_v39, %v1144_v18  ;;  %v1025_v42 = vpop.f32.mrb[12].mxu1  ;;  %v441_v43 = vpop.f32.mrb[13].mxu0 }
  0xff   : > { %970 = vst [vmem:[%s1159_s27 + $0x68] sm:$0xff] %v946_v37   ;;  %961 = vst [vmem:[%s1159_s27 + $0x20] sm:$0xff] %v901_v38   ;;  %v514_v44 = vadd.f32 %v1025_v42, %v1144_v18  ;;  %v442_v45 = vadd.f32 %v1144_v18, %v441_v43  ;;  %v505_v46 = vpop.f32.mrb[13].mxu1  ;;  %v1010_v47 = vpop.f32.mrb[14].mxu0 }
 0x100   : > { %969 = vst [vmem:[%s1159_s27 + $0x60] sm:$0xff] %v941_v40   ;;  %v506_v48 = vadd.f32 %v1144_v18, %v505_v46  ;;  %v453_v49 = vadd.f32 %v1010_v47, %v1144_v18  ;;  %v1026_v50 = vpop.f32.mrb[14].mxu1  ;;  %v444_v51 = vpop.f32.mrb[15].mxu0  ;;  %v534_v55 = vmax.f32 %v450_v41, 0.0 }
 0x101   : > { %v517_v52 = vadd.f32 %v1026_v50, %v1144_v18  ;;  %v445_v53 = vadd.f32 %v1144_v18, %v444_v51  ;;  %v508_v54 = vpop.f32.mrb[15].mxu1  ;;  %v550_v58 = vmax.f32 %v514_v44, 0.0  ;;  %v532_v59 = vmax.f32 %v442_v45, 0.0 }
 0x102   : > { %v535_v56 = vmax.f32 %v453_v49, 0.0  ;;  %v509_v57 = vadd.f32 %v1144_v18, %v508_v54  ;;  %v548_v62 = vmax.f32 %v506_v48, 0.0 }
 0x103   : > { %v551_v60 = vmax.f32 %v517_v52, 0.0  ;;  %v533_v61 = vmax.f32 %v445_v53, 0.0 }
 0x104   : > { %v916_v63 = vpack.c.bf16 %v535_v56, %v534_v55  ;;  %v549_v0 = vmax.f32 %v509_v57, 0.0 }
 0x105   : > { %v956_v1 = vpack.c.bf16 %v551_v60, %v550_v58  ;;  %v911_v2 = vpack.c.bf16 %v533_v61, %v532_v59 }
 0x106   : > { %964 = vst [vmem:[%s1159_s27 + $0x38] sm:$0xff] %v916_v63   ;;  %v951_v3 = vpack.c.bf16 %v549_v0, %v548_v62 }
 0x107   : > { %972 = vst [vmem:[%s1159_s27 + $0x78] sm:$0xff] %v956_v1   ;;  %963 = vst [vmem:[%s1159_s27 + $0x30] sm:$0xff] %v911_v2  }
 0x108   : > { %971 = vst [vmem:[%s1159_s27 + $0x70] sm:$0xff] %v951_v3  }
 0x109 PF: > { %s13_s12 = sadd.s32 1, %s1063_s12  }
 0x10a   : > { %p10_p4 = scmp.ge.s32.totalorder %s13_s12, 4  }
 0x10c   :  { %12 = sbr.rel (!%p10_p4) target bundleno = 1 (0x1), region = 62 }

// kernel: forward.5
= control target key start
LH: loop header
LB: loop body
LE: loop exit
PB: predicated region body
PF: predicated region fallthrough
CT: control target
= control target key end

     0   :  { %s2387_s12 = smov 0   ;;  %s2925_s0 = inlined_call_operand.vmem [shape: bf16[128,1152], index: 0, kind: input, shape index: {}]   ;;  %s2926_s1 = inlined_call_operand.vmem [shape: bf16[1152,256], index: 1, kind: input, shape index: {}]   ;;  %s2927_s2 = inlined_call_operand.vmem [shape: f32[1,256], index: 2, kind: input, shape index: {}]   ;;  %s2928_s3 = inlined_call_operand.vmem [shape: bf16[128,256], index: 3, kind: output, shape index: {}]  }
   0x1 LB: > { %s1775_s13 = sadd.s32 4294967295, %s2364_s12   ;;  %p1779_p0 = scmp.ge.s32.totalorder %s2364_s12, 1  ;;  %s2364_s12 = sphi %s2387_s12, %s13_s12  }
   0x2   : > { %p139_p1 = scmp.lt.s32.totalorder %s2364_s12, 3 }
   0x4   : > { %p140_p2 = pnand %p1779_p0, %p139_p1 }
   0x5   : > { %v2090_v0 = vld [vmem:[%s2926_s1 + $0x4] ss:$8 sps:$4 sm:$0xff] (!%p140_p2)   ;;  %v2094_v2 = vld [vmem:[%s2926_s1] ss:$8 sps:$4 sm:$0xff] (!%p140_p2)   ;;  %v2096_v4 = vld [vmem:[%s2926_s1 + $0x14] ss:$8 sps:$4 sm:$0xff] (!%p140_p2)  }
   0x6   : > { %143 = sbr.rel (%p140_p2) target bundleno = 397 (0x18d), region = 32  ;;  %v2092_v1 = vld [vmem:[%s2926_s1 + $0x204] ss:$8 sps:$4 sm:$0xff] (!%p140_p2)   ;;  %1280 = vmatprep.subr.bf16.mxu1 (!%p140_p2), %v2090_v0  ;;  %v2095_v3 = vld [vmem:[%s2926_s1 + $0x200] ss:$8 sps:$4 sm:$0xff] (!%p140_p2)   ;;  %s1780_s24 = sshll.u32 (!%p140_p2), %s1775_s13, 3 }
   0x7   : > { %1426 = vmatprep.subr.bf16.mxu0 (!%p140_p2), %v2092_v1  ;;  %1281 = vmatpush1.bf16.msra.mxu1 (!%p140_p2), %v2094_v2  ;;  %v2098_v5 = vld [vmem:[%s2926_s1 + $0x214] ss:$8 sps:$4 sm:$0xff] (!%p140_p2)   ;;  %v2100_v6 = vld [vmem:[%s2926_s1 + $0x10] ss:$8 sps:$4 sm:$0xff] (!%p140_p2)   ;;  %v2102_v8 = vld [vmem:[%s2926_s1 + $0x24] ss:$8 sps:$4 sm:$0xff] (!%p140_p2)  }
   0x8   : > { %1427 = vmatpush1.bf16.msra.mxu0 (!%p140_p2), %v2095_v3  ;;  %1282 = vmatprep.subr.bf16.mxu1 (!%p140_p2), %v2096_v4  ;;  %v2101_v7 = vld [vmem:[%s2926_s1 + $0x210] ss:$8 sps:$4 sm:$0xff] (!%p140_p2)   ;;  %v2104_v9 = vld [vmem:[%s2926_s1 + $0x224] ss:$8 sps:$4 sm:$0xff] (!%p140_p2)   ;;  %v2106_v10 = vld [vmem:[%s2926_s1 + $0x20] ss:$8 sps:$4 sm:$0xff] (!%p140_p2)  }
   0x9   : > { %1428 = vmatprep.subr.bf16.mxu0 (!%p140_p2), %v2098_v5  ;;  %v2107_v11 = vld [vmem:[%s2926_s1 + $0x220] ss:$8 sps:$4 sm:$0xff] (!%p140_p2)   ;;  %v2108_v12 = vld [vmem:[%s2926_s1 + $0x34] ss:$8 sps:$4 sm:$0xff] (!%p140_p2)   ;;  %v2112_v14 = vld [vmem:[%s2926_s1 + $0x30] ss:$8 sps:$4 sm:$0xff] (!%p140_p2)  }
   0xa   : > { %v2110_v13 = vld [vmem:[%s2926_s1 + $0x234] ss:$8 sps:$4 sm:$0xff] (!%p140_p2)   ;;  %v2113_v15 = vld [vmem:[%s2926_s1 + $0x230] ss:$8 sps:$4 sm:$0xff] (!%p140_p2)   ;;  %v2114_v16 = vld [vmem:[%s2926_s1 + $0x44] ss:$8 sps:$4 sm:$0xff] (!%p140_p2)  }
   0xb   : > { %1283 = vmatpush1.bf16.msra.mxu1 (!%p140_p2), %v2100_v6  ;;  %v2116_v17 = vld [vmem:[%s2926_s1 + $0x244] ss:$8 sps:$4 sm:$0xff] (!%p140_p2)   ;;  %v2118_v18 = vld [vmem:[%s2926_s1 + $0x40] ss:$8 sps:$4 sm:$0xff] (!%p140_p2)   ;;  %v2120_v20 = vld [vmem:[%s2926_s1 + $0x54] ss:$8 sps:$4 sm:$0xff] (!%p140_p2)  }
   0xc   : > { %1429 = vmatpush1.bf16.msra.mxu0 (!%p140_p2), %v2101_v7  ;;  %1284 = vmatprep.subr.bf16.mxu1 (!%p140_p2), %v2102_v8  ;;  %v2119_v19 = vld [vmem:[%s2926_s1 + $0x240] ss:$8 sps:$4 sm:$0xff] (!%p140_p2)   ;;  %v2122_v21 = vld [vmem:[%s2926_s1 + $0x254] ss:$8 sps:$4 sm:$0xff] (!%p140_p2)   ;;  %v2124_v22 = vld [vmem:[%s2926_s1 + $0x50] ss:$8 sps:$4 sm:$0xff] (!%p140_p2)  }
   0xd   : > { %1430 = vmatprep.subr.bf16.mxu0 %v2104_v9  ;;  %v2125_v23 = vld [vmem:[%s2926_s1 + $0x250] ss:$8 sps:$4 sm:$0xff]   ;;  %v2126_v24 = vld [vmem:[%s2926_s1 + $0x64] ss:$8 sps:$4 sm:$0xff]   ;;  %v2130_v26 = vld [vmem:[%s2926_s1 + $0x60] ss:$8 sps:$4 sm:$0xff]  }
   0xe   : > { %v2128_v25 = vld [vmem:[%s2926_s1 + $0x264] ss:$8 sps:$4 sm:$0xff]   ;;  %v2131_v27 = vld [vmem:[%s2926_s1 + $0x260] ss:$8 sps:$4 sm:$0xff]   ;;  %v2132_v28 = vld [vmem:[%s2926_s1 + $0x74] ss:$8 sps:$4 sm:$0xff]  }
   0xf   : > { %1285 = vmatpush1.bf16.msra.mxu1 %v2106_v10  ;;  %v2134_v29 = vld [vmem:[%s2926_s1 + $0x274] ss:$8 sps:$4 sm:$0xff]   ;;  %v2136_v30 = vld [vmem:[%s2926_s1 + $0x70] ss:$8 sps:$4 sm:$0xff]   ;;  %v2138_v32 = vld [vmem:[%s2926_s1 + $0x84] ss:$8 sps:$4 sm:$0xff]  }
  0x10   : > { %1431 = vmatpush1.bf16.msra.mxu0 %v2107_v11  ;;  %1286 = vmatprep.subr.bf16.mxu1 %v2108_v12  ;;  %v2137_v31 = vld [vmem:[%s2926_s1 + $0x270] ss:$8 sps:$4 sm:$0xff]   ;;  %p166_p3 = scmp.lt.s32.totalorder %s1780_s24, 15  ;;  %v2140_v33 = vld [vmem:[%s2926_s1 + $0x284] ss:$8 sps:$4 sm:$0xff]  }
  0x11   : > { %1432 = vmatprep.subr.bf16.mxu0 %v2110_v13  ;;  %v2142_v34 = vld [vmem:[%s2926_s1 + $0x80] ss:$8 sps:$4 sm:$0xff]   ;;  %v2144_v36 = vld [vmem:[%s2926_s1 + $0x94] ss:$8 sps:$4 sm:$0xff]   ;;  %v2148_v38 = vld [vmem:[%s2926_s1 + $0x90] ss:$8 sps:$4 sm:$0xff]  }
  0x12   : > { %v2143_v35 = vld [vmem:[%s2926_s1 + $0x280] ss:$8 sps:$4 sm:$0xff]   ;;  %s2930_s24 = smov (!%p166_p3, %s1780_s24), 15  ;;  %v2146_v37 = vld [vmem:[%s2926_s1 + $0x294] ss:$8 sps:$4 sm:$0xff]  }
  0x13   : > { %1287 = vmatpush1.bf16.msra.mxu1 %v2112_v14  ;;  %v2149_v39 = vld [vmem:[%s2926_s1 + $0x290] ss:$8 sps:$4 sm:$0xff]   ;;  %v2150_v40 = vld [vmem:[%s2926_s1 + $0xa4] ss:$8 sps:$4 sm:$0xff]   ;;  %s2080_s21 = smul.u32 36, %s2930_s24 }
  0x14   : > { %1433 = vmatpush1.bf16.msra.mxu0 %v2113_v15  ;;  %1288 = vmatprep.subr.bf16.mxu1 %v2114_v16  ;;  %v2152_v41 = vld [vmem:[%s2926_s1 + $0x2a4] ss:$8 sps:$4 sm:$0xff]   ;;  %v2154_v42 = vld [vmem:[%s2926_s1 + $0xa0] ss:$8 sps:$4 sm:$0xff]   ;;  %v2156_v44 = vld [vmem:[%s2926_s1 + $0xb4] ss:$8 sps:$4 sm:$0xff]  }
  0x15   : > { %1434 = vmatprep.subr.bf16.mxu0 %v2116_v17  ;;  %v2155_v43 = vld [vmem:[%s2926_s1 + $0x2a0] ss:$8 sps:$4 sm:$0xff]   ;;  %s2538_s13 = scalar_lea.vmem %s2925_s0, %s2080_s21  ;;  %v2158_v45 = vld [vmem:[%s2926_s1 + $0x2b4] ss:$8 sps:$4 sm:$0xff]   ;;  %v2160_v46 = vld [vmem:[%s2926_s1 + $0xb0] ss:$8 sps:$4 sm:$0xff]  }
  0x16   : > { %v2161_v47 = vld [vmem:[%s2926_s1 + $0x2b0] ss:$8 sps:$4 sm:$0xff]   ;;  %v2188_v48 = vld [vmem:[%s2538_s13 + $0x4] ss:$36 sps:$4 sm:$0xff]   ;;  %v2168_v54 = vld [vmem:[%s2926_s1 + $0xd4] ss:$8 sps:$4 sm:$0xff]  }
  0x17   : > { %1289 = vmatpush1.bf16.msra.mxu1 %v2118_v18  ;;  %v2162_v49 = vld [vmem:[%s2926_s1 + $0xc4] ss:$8 sps:$4 sm:$0xff]   ;;  %1312 = vmatprep.mubr.bf16.mxu1 %v2188_v48  ;;  %v2194_v51 = vld [vmem:[%s2538_s13 + $0x14] ss:$36 sps:$4 sm:$0xff]   ;;  %v2166_v52 = vld [vmem:[%s2926_s1 + $0xc0] ss:$8 sps:$4 sm:$0xff]  }
  0x18   : > { %1435 = vmatpush1.bf16.msra.mxu0 %v2119_v19  ;;  %1290 = vmatprep.subr.bf16.mxu1 %v2120_v20  ;;  %v2164_v50 = vld [vmem:[%s2926_s1 + $0x2c4] ss:$8 sps:$4 sm:$0xff]   ;;  %v2167_v53 = vld [vmem:[%s2926_s1 + $0x2c0] ss:$8 sps:$4 sm:$0xff]   ;;  %v2170_v55 = vld [vmem:[%s2926_s1 + $0x2d4] ss:$8 sps:$4 sm:$0xff]  }
  0x19   : > { %1436 = vmatprep.subr.bf16.mxu0 %v2122_v21  ;;  %1458 = vmatprep.mubr.bf16.mxu0 %v2194_v51  ;;  %v2172_v56 = vld [vmem:[%s2926_s1 + $0xd0] ss:$8 sps:$4 sm:$0xff]   ;;  %v2174_v58 = vld [vmem:[%s2926_s1 + $0xe4] ss:$8 sps:$4 sm:$0xff]   ;;  %v2178_v60 = vld [vmem:[%s2926_s1 + $0xe0] ss:$8 sps:$4 sm:$0xff]  }
  0x1a   : > { %v2173_v57 = vld [vmem:[%s2926_s1 + $0x2d0] ss:$8 sps:$4 sm:$0xff]   ;;  %v2176_v59 = vld [vmem:[%s2926_s1 + $0x2e4] ss:$8 sps:$4 sm:$0xff]   ;;  %v2179_v61 = vld [vmem:[%s2926_s1 + $0x2e0] ss:$8 sps:$4 sm:$0xff]  }
  0x1b   : > { %1291 = vmatpush1.bf16.msra.mxu1 %v2124_v22  ;;  %v2180_v62 = vld [vmem:[%s2926_s1 + $0xf4] ss:$8 sps:$4 sm:$0xff]   ;;  %v2184_v0 = vld [vmem:[%s2926_s1 + $0xf0] ss:$8 sps:$4 sm:$0xff]   ;;  %v2191_v2 = vld [vmem:[%s2926_s1 + $0x104] ss:$8 sps:$4 sm:$0xff]  }
  0x1c   : > { %1437 = vmatpush1.bf16.msra.mxu0 %v2125_v23  ;;  %1292 = vmatprep.subr.bf16.mxu1 %v2126_v24  ;;  %v2182_v63 = vld [vmem:[%s2926_s1 + $0x2f4] ss:$8 sps:$4 sm:$0xff]   ;;  %v2185_v1 = vld [vmem:[%s2926_s1 + $0x2f0] ss:$8 sps:$4 sm:$0xff]   ;;  %v2197_v3 = vld [vmem:[%s2926_s1 + $0x304] ss:$8 sps:$4 sm:$0xff]  }
  0x1d   : > { %1438 = vmatprep.subr.bf16.mxu0 %v2128_v25  ;;  %v2186_v4 = vld [vmem:[%s2538_s13] ss:$36 sps:$4 sm:$0xff]   ;;  %v2192_v6 = vld [vmem:[%s2538_s13 + $0x10] ss:$36 sps:$4 sm:$0xff]   ;;  %v2256_v20 = vld [vmem:[%s2538_s13 + $0x48] ss:$36 sps:$4 sm:$0xff]  }
  0x1e   : > { %v2189_v5 = vld [vmem:[%s2926_s1 + $0x100] ss:$8 sps:$4 sm:$0xff]   ;;  %v2200_v8 = vld [vmem:[%s2926_s1 + $0x114] ss:$8 sps:$4 sm:$0xff]   ;;  %v2198_v10 = vld [vmem:[%s2926_s1 + $0x110] ss:$8 sps:$4 sm:$0xff]  }
  0x1f   : > { %1293 = vmatpush1.bf16.msra.mxu1 %v2130_v26  ;;  %v2195_v7 = vld [vmem:[%s2926_s1 + $0x300] ss:$8 sps:$4 sm:$0xff]   ;;  %v2203_v9 = vld [vmem:[%s2926_s1 + $0x314] ss:$8 sps:$4 sm:$0xff]   ;;  %v2201_v11 = vld [vmem:[%s2926_s1 + $0x310] ss:$8 sps:$4 sm:$0xff]  }
  0x20   : > { %1439 = vmatpush1.bf16.msra.mxu0 %v2131_v27  ;;  %1294 = vmatprep.subr.bf16.mxu1 %v2132_v28  ;;  %v2206_v12 = vld [vmem:[%s2926_s1 + $0x124] ss:$8 sps:$4 sm:$0xff]   ;;  %v2204_v14 = vld [vmem:[%s2926_s1 + $0x120] ss:$8 sps:$4 sm:$0xff]   ;;  %v2212_v16 = vld [vmem:[%s2926_s1 + $0x134] ss:$8 sps:$4 sm:$0xff]  }
  0x21   : > { %1440 = vmatprep.subr.bf16.mxu0 %v2134_v29  ;;  %v2209_v13 = vld [vmem:[%s2926_s1 + $0x324] ss:$8 sps:$4 sm:$0xff]   ;;  %v2207_v15 = vld [vmem:[%s2926_s1 + $0x320] ss:$8 sps:$4 sm:$0xff]   ;;  %v2215_v17 = vld [vmem:[%s2926_s1 + $0x334] ss:$8 sps:$4 sm:$0xff]  }
  0x22   : > { %v2252_v18 = vld [vmem:[%s2538_s13 + $0x4c] ss:$36 sps:$4 sm:$0xff]   ;;  %v2254_v19 = vld [vmem:[%s2538_s13 + $0x5c] ss:$36 sps:$4 sm:$0xff]  }
  0x23   : > { %1295 = vmatpush1.bf16.msra.mxu1 %v2136_v30  ;;  %v2210_v21 = vld [vmem:[%s2926_s1 + $0x130] ss:$8 sps:$4 sm:$0xff]   ;;  %v2218_v24 = vld [vmem:[%s2926_s1 + $0x144] ss:$8 sps:$4 sm:$0xff]   ;;  %v2216_v26 = vld [vmem:[%s2926_s1 + $0x140] ss:$8 sps:$4 sm:$0xff]  }
  0x24   : > { %1441 = vmatpush1.bf16.msra.mxu0 %v2137_v31  ;;  %1296 = vmatprep.subr.bf16.mxu1 %v2138_v32  ;;  %v2213_v22 = vld [vmem:[%s2926_s1 + $0x330] ss:$8 sps:$4 sm:$0xff]   ;;  %v2221_v25 = vld [vmem:[%s2926_s1 + $0x344] ss:$8 sps:$4 sm:$0xff]   ;;  %v2219_v27 = vld [vmem:[%s2926_s1 + $0x340] ss:$8 sps:$4 sm:$0xff]  }
  0x25   : > { %1442 = vmatprep.subr.bf16.mxu0 %v2140_v33  ;;  %v2260_v23 = vld [vmem:[%s2538_s13 + $0x58] ss:$36 sps:$4 sm:$0xff]   ;;  %v2272_v31 = vld [vmem:[%s2538_s13 + $0xa4] ss:$36 sps:$4 sm:$0xff]   ;;  %v2274_v32 = vld [vmem:[%s2538_s13 + $0x90] ss:$36 sps:$4 sm:$0xff]  }
  0x26   : > { %v2224_v28 = vld [vmem:[%s2926_s1 + $0x154] ss:$8 sps:$4 sm:$0xff]   ;;  %v2222_v33 = vld [vmem:[%s2926_s1 + $0x150] ss:$8 sps:$4 sm:$0xff]   ;;  %v2242_v48 = vld [vmem:[%s2926_s1 + $0x184] ss:$8 sps:$4 sm:$0xff]  }
  0x27   : > { %1297 = vmatpush1.bf16.msra.mxu1 %v2142_v34  ;;  %v2227_v29 = vld [vmem:[%s2926_s1 + $0x354] ss:$8 sps:$4 sm:$0xff]   ;;  %v2225_v34 = vld [vmem:[%s2926_s1 + $0x350] ss:$8 sps:$4 sm:$0xff]   ;;  %v2243_v51 = vld [vmem:[%s2926_s1 + $0x380] ss:$8 sps:$4 sm:$0xff]  }
  0x28   : > { %1443 = vmatpush1.bf16.msra.mxu0 %v2143_v35  ;;  %1298 = vmatprep.subr.bf16.mxu1 %v2144_v36  ;;  %v2270_v30 = vld [vmem:[%s2538_s13 + $0x94] ss:$36 sps:$4 sm:$0xff]   ;;  %v2278_v35 = vld [vmem:[%s2538_s13 + $0xa0] ss:$36 sps:$4 sm:$0xff]  }
  0x29   : > { %1444 = vmatprep.subr.bf16.mxu0 %v2146_v37  ;;  %v2230_v36 = vld [vmem:[%s2926_s1 + $0x164] ss:$8 sps:$4 sm:$0xff]  }
  0x2a   : > { %v2233_v37 = vld [vmem:[%s2926_s1 + $0x364] ss:$8 sps:$4 sm:$0xff]  }
  0x2b   : > { %1299 = vmatpush1.bf16.msra.mxu1 %v2148_v38  ;;  %v2228_v38 = vld [vmem:[%s2926_s1 + $0x160] ss:$8 sps:$4 sm:$0xff]  }
  0x2c   : > { %1445 = vmatpush1.bf16.msra.mxu0 %v2149_v39  ;;  %1300 = vmatprep.subr.bf16.mxu1 %v2150_v40  ;;  %v2231_v39 = vld [vmem:[%s2926_s1 + $0x360] ss:$8 sps:$4 sm:$0xff]   ;;  %v2236_v40 = vld [vmem:[%s2926_s1 + $0x174] ss:$8 sps:$4 sm:$0xff]  }
  0x2d   : > { %1446 = vmatprep.subr.bf16.mxu0 %v2152_v41  ;;  %v2239_v41 = vld [vmem:[%s2926_s1 + $0x374] ss:$8 sps:$4 sm:$0xff]  }
  0x2f   : > { %1301 = vmatpush1.bf16.msra.mxu1 %v2154_v42  ;;  %v2288_v42 = vld [vmem:[%s2538_s13 + $0xdc] ss:$36 sps:$4 sm:$0xff]  }
  0x30   : > { %1447 = vmatpush1.bf16.msra.mxu0 %v2155_v43  ;;  %1302 = vmatprep.subr.bf16.mxu1 %v2156_v44  ;;  %v2290_v43 = vld [vmem:[%s2538_s13 + $0xec] ss:$36 sps:$4 sm:$0xff]   ;;  %v2292_v44 = vld [vmem:[%s2538_s13 + $0xd8] ss:$36 sps:$4 sm:$0xff]  }
  0x31   : > { %1448 = vmatprep.subr.bf16.mxu0 %v2158_v45  ;;  %v2234_v45 = vld [vmem:[%s2926_s1 + $0x170] ss:$8 sps:$4 sm:$0xff]  }
  0x33   : > { %1303 = vmatpush1.bf16.msra.mxu1 %v2160_v46  ;;  %v2237_v46 = vld [vmem:[%s2926_s1 + $0x370] ss:$8 sps:$4 sm:$0xff]  }
  0x34   : > { %1449 = vmatpush1.bf16.msra.mxu0 %v2161_v47  ;;  %1304 = vmatprep.subr.bf16.mxu1 %v2162_v49  ;;  %v2296_v47 = vld [vmem:[%s2538_s13 + $0xe8] ss:$36 sps:$4 sm:$0xff]  }
  0x35   : > { %1450 = vmatprep.subr.bf16.mxu0 %v2164_v50  ;;  %v2245_v49 = vld [vmem:[%s2926_s1 + $0x384] ss:$8 sps:$4 sm:$0xff]   ;;  %v2240_v50 = vld [vmem:[%s2926_s1 + $0x180] ss:$8 sps:$4 sm:$0xff]  }
  0x37   : > { %1305 = vmatpush1.bf16.msra.mxu1 %v2166_v52  ;;  %v2248_v52 = vld [vmem:[%s2926_s1 + $0x194] ss:$8 sps:$4 sm:$0xff]  }
  0x38   : > { %1451 = vmatpush1.bf16.msra.mxu0 %v2167_v53  ;;  %1306 = vmatprep.subr.bf16.mxu1 %v2168_v54  ;;  %v2251_v53 = vld [vmem:[%s2926_s1 + $0x394] ss:$8 sps:$4 sm:$0xff]   ;;  %v2308_v54 = vld [vmem:[%s2538_s13 + $0xc] ss:$36 sps:$4 sm:$0xff]  }
  0x39   : > { %1452 = vmatprep.subr.bf16.mxu0 %v2170_v55  ;;  %v2311_v55 = vld [vmem:[%s2538_s13 + $0x1c] ss:$36 sps:$4 sm:$0xff]  }
  0x3b   : > { %1307 = vmatpush1.bf16.msra.mxu1 %v2172_v56  ;;  %v2246_v56 = vld [vmem:[%s2926_s1 + $0x190] ss:$8 sps:$4 sm:$0xff]  }
  0x3c   : > { %1453 = vmatpush1.bf16.msra.mxu0 %v2173_v57  ;;  %1308 = vmatprep.subr.bf16.mxu1 %v2174_v58  ;;  %v2249_v57 = vld [vmem:[%s2926_s1 + $0x390] ss:$8 sps:$4 sm:$0xff]   ;;  %v2259_v58 = vld [vmem:[%s2926_s1 + $0x1a4] ss:$8 sps:$4 sm:$0xff]  }
  0x3d   : > { %1454 = vmatprep.subr.bf16.mxu0 %v2176_v59  ;;  %v2263_v59 = vld [vmem:[%s2926_s1 + $0x3a4] ss:$8 sps:$4 sm:$0xff]  }
  0x3f   : > { %1309 = vmatpush1.bf16.msra.mxu1 %v2178_v60  ;;  %v2257_v60 = vld [vmem:[%s2926_s1 + $0x1a0] ss:$8 sps:$4 sm:$0xff]  }
  0x40   : > { %1455 = vmatpush1.bf16.msra.mxu0 %v2179_v61  ;;  %1310 = vmatprep.subr.bf16.mxu1 %v2180_v62  ;;  %v2261_v61 = vld [vmem:[%s2926_s1 + $0x3a0] ss:$8 sps:$4 sm:$0xff]   ;;  %v2266_v62 = vld [vmem:[%s2926_s1 + $0x1b4] ss:$8 sps:$4 sm:$0xff]  }
  0x41   : > { %1456 = vmatprep.subr.bf16.mxu0 %v2182_v63  ;;  %v2269_v63 = vld [vmem:[%s2926_s1 + $0x3b4] ss:$8 sps:$4 sm:$0xff]  }
  0x43   : > { %1311 = vmatpush1.bf16.msra.mxu1 %v2184_v0  ;;  %v2264_v0 = vld [vmem:[%s2926_s1 + $0x1b0] ss:$8 sps:$4 sm:$0xff]  }
  0x44   : > { %1457 = vmatpush1.bf16.msra.mxu0 %v2185_v1  ;;  %1353 = vmatprep.subr.bf16.mxu1 %v2191_v2  ;;  %v2267_v1 = vld [vmem:[%s2926_s1 + $0x3b0] ss:$8 sps:$4 sm:$0xff]   ;;  %v2277_v2 = vld [vmem:[%s2926_s1 + $0x1c4] ss:$8 sps:$4 sm:$0xff]  }
  0x45   : > { %1499 = vmatprep.subr.bf16.mxu0 %v2197_v3  ;;  %v2281_v3 = vld [vmem:[%s2926_s1 + $0x3c4] ss:$8 sps:$4 sm:$0xff]  }
  0x46   : > { %1313 = vmatmul.mubr.bf16.vlgmr.msra.gmra.mrb[0].mxu1 %v2186_v4  ;;  %v2275_v4 = vld [vmem:[%s2926_s1 + $0x1c0] ss:$8 sps:$4 sm:$0xff]  }
  0x47   : > { %1459 = vmatmul.mubr.bf16.vlgmr.msra.gmra.mrb[0].mxu0 %v2192_v6  ;;  %1354 = vmatpush1.bf16.msra.mxu1 %v2189_v5  ;;  %v2279_v5 = vld [vmem:[%s2926_s1 + $0x3c0] ss:$8 sps:$4 sm:$0xff]   ;;  %v2284_v6 = vld [vmem:[%s2926_s1 + $0x1d4] ss:$8 sps:$4 sm:$0xff]  }
  0x48   : > { %1500 = vmatpush1.bf16.msra.mxu0 %v2195_v7  ;;  %1355 = vmatprep.subr.bf16.mxu1 %v2200_v8  ;;  %v2287_v7 = vld [vmem:[%s2926_s1 + $0x3d4] ss:$8 sps:$4 sm:$0xff]   ;;  %v2282_v8 = vld [vmem:[%s2926_s1 + $0x1d0] ss:$8 sps:$4 sm:$0xff]  }
  0x49   : > { %1501 = vmatprep.subr.bf16.mxu0 %v2203_v9  ;;  %1322 = vmatprep.mubr.bf16.mxu1 %v2252_v18  ;;  %v2285_v9 = vld [vmem:[%s2926_s1 + $0x3d0] ss:$8 sps:$4 sm:$0xff]   ;;  %v2314_v18 = vld [vmem:[%s2926_s1 + $0x404] ss:$8 sps:$4 sm:$0xff]  }
  0x4a   : > { %1468 = vmatprep.mubr.bf16.mxu0 %v2254_v19  ;;  %v2306_v19 = vld [vmem:[%s2538_s13 + $0x8] ss:$36 sps:$4 sm:$0xff]  }
  0x4b   : > { %1356 = vmatpush1.bf16.msra.mxu1 %v2198_v10  ;;  %v2295_v10 = vld [vmem:[%s2926_s1 + $0x1e4] ss:$8 sps:$4 sm:$0xff]  }
  0x4c   : > { %1502 = vmatpush1.bf16.msra.mxu0 %v2201_v11  ;;  %1357 = vmatprep.subr.bf16.mxu1 %v2206_v12  ;;  %v2299_v11 = vld [vmem:[%s2926_s1 + $0x3e4] ss:$8 sps:$4 sm:$0xff]   ;;  %v2293_v12 = vld [vmem:[%s2926_s1 + $0x1e0] ss:$8 sps:$4 sm:$0xff]  }
  0x4d   : > { %1503 = vmatprep.subr.bf16.mxu0 %v2209_v13  ;;  %v2297_v13 = vld [vmem:[%s2926_s1 + $0x3e0] ss:$8 sps:$4 sm:$0xff]  }
  0x4e   : > { %1323 = vmatmul.mubr.bf16.gmra.mrb[4].mxu1 %v2256_v20  ;;  %v2309_v20 = vld [vmem:[%s2538_s13 + $0x18] ss:$36 sps:$4 sm:$0xff]  }
  0x4f   : > { %1358 = vmatpush1.bf16.msra.mxu1 %v2204_v14  ;;  %1469 = vmatmul.mubr.bf16.gmra.mrb[4].mxu0 %v2260_v23  ;;  %v2302_v14 = vld [vmem:[%s2926_s1 + $0x1f4] ss:$8 sps:$4 sm:$0xff]  }
  0x50   : > { %1504 = vmatpush1.bf16.msra.mxu0 %v2207_v15  ;;  %1359 = vmatprep.subr.bf16.mxu1 %v2212_v16  ;;  %v2305_v15 = vld [vmem:[%s2926_s1 + $0x3f4] ss:$8 sps:$4 sm:$0xff]   ;;  %v2300_v16 = vld [vmem:[%s2926_s1 + $0x1f0] ss:$8 sps:$4 sm:$0xff]  }
  0x51   : > { %1505 = vmatprep.subr.bf16.mxu0 %v2215_v17  ;;  %1332 = vmatprep.mubr.bf16.mxu1 %v2270_v30  ;;  %v2303_v17 = vld [vmem:[%s2926_s1 + $0x3f0] ss:$8 sps:$4 sm:$0xff]   ;;  %v2329_v30 = vld [vmem:[%s2926_s1 + $0x434] ss:$8 sps:$4 sm:$0xff]  }
  0x52   : > { %1478 = vmatprep.mubr.bf16.mxu0 %v2272_v31  ;;  %v2318_v23 = vld [vmem:[%s2538_s13 + $0x54] ss:$36 sps:$4 sm:$0xff]   ;;  %v2330_v31 = vld [vmem:[%s2538_s13 + $0x9c] ss:$36 sps:$4 sm:$0xff]  }
  0x53   : > { %1360 = vmatpush1.bf16.msra.mxu1 %v2210_v21  ;;  %v2312_v21 = vld [vmem:[%s2926_s1 + $0x400] ss:$8 sps:$4 sm:$0xff]  }
  0x54   : > { %1506 = vmatpush1.bf16.msra.mxu0 %v2213_v22  ;;  %1361 = vmatprep.subr.bf16.mxu1 %v2218_v24  ;;  %v2317_v22 = vld [vmem:[%s2926_s1 + $0x414] ss:$8 sps:$4 sm:$0xff]   ;;  %v2320_v24 = vld [vmem:[%s2538_s13 + $0x64] ss:$36 sps:$4 sm:$0xff]  }
  0x55   : > { %1507 = vmatprep.subr.bf16.mxu0 %v2221_v25  ;;  %v2315_v25 = vld [vmem:[%s2926_s1 + $0x410] ss:$8 sps:$4 sm:$0xff]  }
  0x56   : > { %1333 = vmatmul.mubr.bf16.gmra.mrb[8].mxu1 %v2274_v32  ;;  %v2332_v32 = vld [vmem:[%s2538_s13 + $0xac] ss:$36 sps:$4 sm:$0xff]  }
  0x57   : > { %1362 = vmatpush1.bf16.msra.mxu1 %v2216_v26  ;;  %1479 = vmatmul.mubr.bf16.gmra.mrb[8].mxu0 %v2278_v35  ;;  %v2326_v26 = vld [vmem:[%s2926_s1 + $0x424] ss:$8 sps:$4 sm:$0xff]   ;;  %v2334_v35 = vld [vmem:[%s2538_s13 + $0x98] ss:$36 sps:$4 sm:$0xff]  }
  0x58   : > { %1508 = vmatpush1.bf16.msra.mxu0 %v2219_v27  ;;  %1363 = vmatprep.subr.bf16.mxu1 %v2224_v28  ;;  %v2322_v27 = vld [vmem:[%s2538_s13 + $0x50] ss:$36 sps:$4 sm:$0xff]   ;;  %v2323_v28 = vld [vmem:[%s2538_s13 + $0x60] ss:$36 sps:$4 sm:$0xff]  }
  0x59   : > { %1509 = vmatprep.subr.bf16.mxu0 %v2227_v29  ;;  %1342 = vmatprep.mubr.bf16.mxu1 %v2288_v42  ;;  %v2324_v29 = vld [vmem:[%s2926_s1 + $0x420] ss:$8 sps:$4 sm:$0xff]   ;;  %v2350_v42 = vld [vmem:[%s2926_s1 + $0x464] ss:$8 sps:$4 sm:$0xff]  }
  0x5a   : > { %1488 = vmatprep.mubr.bf16.mxu0 %v2290_v43  ;;  %v2346_v43 = vld [vmem:[%s2538_s13 + $0xe0] ss:$36 sps:$4 sm:$0xff]  }
  0x5b   : > { %1364 = vmatpush1.bf16.msra.mxu1 %v2222_v33  ;;  %v2327_v33 = vld [vmem:[%s2926_s1 + $0x430] ss:$8 sps:$4 sm:$0xff]  }
  0x5c   : > { %1510 = vmatpush1.bf16.msra.mxu0 %v2225_v34  ;;  %1365 = vmatprep.subr.bf16.mxu1 %v2230_v36  ;;  %v2338_v34 = vld [vmem:[%s2926_s1 + $0x444] ss:$8 sps:$4 sm:$0xff]  }
  0x5d   : > { %1511 = vmatprep.subr.bf16.mxu0 %v2233_v37  ;;  %v2335_v36 = vld [vmem:[%s2538_s13 + $0xa8] ss:$36 sps:$4 sm:$0xff]  }
  0x5e   : > { %1343 = vmatmul.mubr.bf16.gmra.mrb[12].mxu1 %v2292_v44  ;;  %v2336_v37 = vld [vmem:[%s2926_s1 + $0x440] ss:$8 sps:$4 sm:$0xff]   ;;  %v2347_v44 = vld [vmem:[%s2538_s13 + $0xf0] ss:$36 sps:$4 sm:$0xff]  }
  0x5f   : > { %1366 = vmatpush1.bf16.msra.mxu1 %v2228_v38  ;;  %1489 = vmatmul.mubr.bf16.gmra.mrb[12].mxu0 %v2296_v47  ;;  %v2341_v38 = vld [vmem:[%s2926_s1 + $0x454] ss:$8 sps:$4 sm:$0xff]   ;;  %v2351_v47 = vld [vmem:[%s2926_s1 + $0x470] ss:$8 sps:$4 sm:$0xff]  }
  0x60   : > { %1512 = vmatpush1.bf16.msra.mxu0 %v2231_v39  ;;  %1367 = vmatprep.subr.bf16.mxu1 %v2236_v40  ;;  %v2342_v39 = vld [vmem:[%s2538_s13 + $0xe4] ss:$36 sps:$4 sm:$0xff]   ;;  %v2344_v40 = vld [vmem:[%s2538_s13 + $0xf4] ss:$36 sps:$4 sm:$0xff]  }
  0x61   : > { %1513 = vmatprep.subr.bf16.mxu0 %v2239_v41  ;;  %1385 = vmatprep.mubr.bf16.mxu1 %v2308_v54  ;;  %v2339_v41 = vld [vmem:[%s2926_s1 + $0x450] ss:$8 sps:$4 sm:$0xff]  }
  0x62   : > { %1531 = vmatprep.mubr.bf16.mxu0 %v2311_v55 }
  0x63   : > { %1368 = vmatpush1.bf16.msra.mxu1 %v2234_v45  ;;  %v2348_v45 = vld [vmem:[%s2926_s1 + $0x460] ss:$8 sps:$4 sm:$0xff]  }
  0x64   : > { %1514 = vmatpush1.bf16.msra.mxu0 %v2237_v46  ;;  %1369 = vmatprep.subr.bf16.mxu1 %v2242_v48  ;;  %v2353_v46 = vld [vmem:[%s2926_s1 + $0x474] ss:$8 sps:$4 sm:$0xff]   ;;  %v2366_v48 = vmov 0  }
  0x65   : > { %1515 = vmatprep.subr.bf16.mxu0 %v2245_v49  ;;  %v2354_v49 = vld [vmem:[%s2538_s13 + $0x20] ss:$36 sps:$4 sm:$0xff]  }
  0x67   : > { %1370 = vmatpush1.bf16.msra.mxu1 %v2240_v50  ;;  %v2355_v50 = vld [vmem:[%s2538_s13 + $0xb0] ss:$36 sps:$4 sm:$0xff]  }
  0x68   : > { %1516 = vmatpush1.bf16.msra.mxu0 %v2243_v51  ;;  %1371 = vmatprep.subr.bf16.mxu1 %v2248_v52  ;;  %v2356_v51 = vld [vmem:[%s2538_s13 + $0x68] ss:$36 sps:$4 sm:$0xff]   ;;  %v2357_v52 = vld [vmem:[%s2538_s13 + $0xf8] ss:$36 sps:$4 sm:$0xff]   ;;  %s1975_s13 = sshll.u32 %s2930_s24, 3 }
  0x69   : > { %1517 = vmatprep.subr.bf16.mxu0 %v2251_v53  ;;  %s2904_s18 = scalar_lea.vmem %s2928_s3, %s1975_s13 }
  0x6b   : > { %1372 = vmatpush1.bf16.msra.mxu1 %v2246_v56  ;;  %v366_v56 = vlaneseq }
  0x6c   : > { %1518 = vmatpush1.bf16.msra.mxu0 %v2249_v57  ;;  %1373 = vmatprep.subr.bf16.mxu1 %v2259_v58 }
  0x6d   : > { %1519 = vmatprep.subr.bf16.mxu0 %v2263_v59  ;;  %v367_v58 = vshrl.u32 %v366_v56, 7 }
  0x6f   : > { %1374 = vmatpush1.bf16.msra.mxu1 %v2257_v60 }
  0x70   : > { %1520 = vmatpush1.bf16.msra.mxu0 %v2261_v61  ;;  %1375 = vmatprep.subr.bf16.mxu1 %v2266_v62  ;;  %v368_v62 = vsub.s32 0, %v367_v58 }
  0x71   : > { %1521 = vmatprep.subr.bf16.mxu0 %v2269_v63 }
  0x73   : > { %1376 = vmatpush1.bf16.msra.mxu1 %v2264_v0  ;;  %v364_v0 = vld [vmem:[%s2927_s2] sm:$0x3] }
  0x74   : > { %1522 = vmatpush1.bf16.msra.mxu0 %v2267_v1  ;;  %1377 = vmatprep.subr.bf16.mxu1 %v2277_v2  ;;  %v372_v1 = vsub.s32 1, %v367_v58  ;;  %v2884_v2 = vrot.slane %v364_v0, %v368_v62 }
  0x75   : > { %1523 = vmatprep.subr.bf16.mxu0 %v2281_v3 }
  0x76   : > { %v2886_v3 = vrot.slane %v364_v0, %v372_v1 }
  0x77   : > { %1378 = vmatpush1.bf16.msra.mxu1 %v2275_v4 }
  0x78   : > { %1524 = vmatpush1.bf16.msra.mxu0 %v2279_v5  ;;  %1379 = vmatprep.subr.bf16.mxu1 %v2284_v6 }
  0x79   : > { %1525 = vmatprep.subr.bf16.mxu0 %v2287_v7 }
  0x7b   : > { %1380 = vmatpush1.bf16.msra.mxu1 %v2282_v8 }
  0x7c   : > { %1526 = vmatpush1.bf16.msra.mxu0 %v2285_v9  ;;  %1381 = vmatprep.subr.bf16.mxu1 %v2295_v10 }
  0x7d   : > { %1527 = vmatprep.subr.bf16.mxu0 %v2299_v11 }
  0x7f   : > { %1382 = vmatpush1.bf16.msra.mxu1 %v2293_v12 }
  0x80   : > { %1528 = vmatpush1.bf16.msra.mxu0 %v2297_v13  ;;  %1383 = vmatprep.subr.bf16.mxu1 %v2302_v14 }
  0x81   : > { %1529 = vmatprep.subr.bf16.mxu0 %v2305_v15 }
  0x83   : > { %1384 = vmatpush1.bf16.msra.mxu1 %v2300_v16 }
  0x84   : > { %1530 = vmatpush1.bf16.msra.mxu0 %v2303_v17  ;;  %1984 = vmatprep.subr.bf16.mxu1 %v2314_v18 }
  0x85   : > { %1572 = vmatprep.subr.bf16.mxu0 %v2314_v18 }
  0x86   : > { %1386 = vmatmul.mubr.bf16.vlgmr.msra.gmra.mrb[0].mxu1 %v2306_v19 }
  0x87   : > { %1532 = vmatmul.mubr.bf16.vlgmr.msra.gmra.mrb[0].mxu0 %v2309_v20  ;;  %1992 = vmatpush1.bf16.msra.mxu1 %v2312_v21 }
  0x88   : > { %1573 = vmatpush1.bf16.msra.mxu0 %v2312_v21  ;;  %1985 = vmatprep.subr.bf16.mxu1 %v2317_v22 }
  0x89   : > { %1574 = vmatprep.subr.bf16.mxu0 %v2317_v22  ;;  %1395 = vmatprep.mubr.bf16.mxu1 %v2318_v23 }
  0x8a   : > { %1541 = vmatprep.mubr.bf16.mxu0 %v2320_v24 }
  0x8b   : > { %1993 = vmatpush1.bf16.msra.mxu1 %v2315_v25 }
  0x8c   : > { %1575 = vmatpush1.bf16.msra.mxu0 %v2315_v25  ;;  %1986 = vmatprep.subr.bf16.mxu1 %v2326_v26 }
  0x8d   : > { %1576 = vmatprep.subr.bf16.mxu0 %v2326_v26 }
  0x8e   : > { %1396 = vmatmul.mubr.bf16.gmra.mrb[4].mxu1 %v2322_v27 }
  0x8f   : > { %1542 = vmatmul.mubr.bf16.gmra.mrb[4].mxu0 %v2323_v28  ;;  %1994 = vmatpush1.bf16.msra.mxu1 %v2324_v29 }
  0x90   : > { %1577 = vmatpush1.bf16.msra.mxu0 %v2324_v29  ;;  %1987 = vmatprep.subr.bf16.mxu1 %v2329_v30 }
  0x91   : > { %1578 = vmatprep.subr.bf16.mxu0 %v2329_v30  ;;  %1405 = vmatprep.mubr.bf16.mxu1 %v2330_v31 }
  0x92   : > { %1551 = vmatprep.mubr.bf16.mxu0 %v2332_v32 }
  0x93   : > { %1995 = vmatpush1.bf16.msra.mxu1 %v2327_v33 }
  0x94   : > { %1579 = vmatpush1.bf16.msra.mxu0 %v2327_v33  ;;  %1988 = vmatprep.subr.bf16.mxu1 %v2338_v34 }
  0x95   : > { %1580 = vmatprep.subr.bf16.mxu0 %v2338_v34 }
  0x96   : > { %1406 = vmatmul.mubr.bf16.gmra.mrb[8].mxu1 %v2334_v35 }
  0x97   : > { %1552 = vmatmul.mubr.bf16.gmra.mrb[8].mxu0 %v2335_v36  ;;  %1996 = vmatpush1.bf16.msra.mxu1 %v2336_v37 }
  0x98   : > { %1581 = vmatpush1.bf16.msra.mxu0 %v2336_v37  ;;  %1989 = vmatprep.subr.bf16.mxu1 %v2341_v38 }
  0x99   : > { %1582 = vmatprep.subr.bf16.mxu0 %v2341_v38  ;;  %1415 = vmatprep.mubr.bf16.mxu1 %v2342_v39 }
  0x9a   : > { %1561 = vmatprep.mubr.bf16.mxu0 %v2344_v40 }
  0x9b   : > { %1997 = vmatpush1.bf16.msra.mxu1 %v2339_v41 }
  0x9c   : > { %1583 = vmatpush1.bf16.msra.mxu0 %v2339_v41  ;;  %1990 = vmatprep.subr.bf16.mxu1 %v2350_v42 }
  0x9d   : > { %1584 = vmatprep.subr.bf16.mxu0 %v2350_v42 }
  0x9e   : > { %1416 = vmatmul.mubr.bf16.gmra.mrb[12].mxu1 %v2346_v43 }
  0x9f   : > { %1562 = vmatmul.mubr.bf16.gmra.mrb[12].mxu0 %v2347_v44  ;;  %1998 = vmatpush1.bf16.msra.mxu1 %v2348_v45 }
  0xa0   : > { %1585 = vmatpush1.bf16.msra.mxu0 %v2348_v45  ;;  %1991 = vmatprep.subr.bf16.mxu1 %v2353_v46 }
  0xa1   : > { %1586 = vmatprep.subr.bf16.mxu0 %v2353_v46  ;;  %1604 = vmatprep.mubr.bf16.mxu0 %v2366_v48 }
  0xa2   : > { %1624 = vmatprep.mubr.bf16.mxu1 %v2366_v48 }
  0xa3   : > { %1999 = vmatpush1.bf16.msra.mxu1 %v2351_v47 }
  0xa4   : > { %1587 = vmatpush1.bf16.msra.mxu0 %v2351_v47 }
  0xa6   : > { %1625 = vmatmul.mubr.bf16.vlgmr.msra.gmra.mrb[16].mxu1 %v2355_v50 }
  0xa7   : > { %1605 = vmatmul.mubr.bf16.vlgmr.msra.gmra.mrb[0].mxu0 %v2354_v49  ;;  %1634 = vmatprep.mubr.bf16.mxu1 %v2366_v48 }
  0xa8   : > { %1614 = vmatprep.mubr.bf16.mxu0 %v2366_v48 }
  0xae   : > { %1635 = vmatmul.mubr.bf16.gmra.mrb[20].mxu1 %v2357_v52 }
  0xaf   : > { %1615 = vmatmul.mubr.bf16.gmra.mrb[4].mxu0 %v2356_v51 }
 0x159   : > { %v1387_v53 = vpop.f32.mrb[0].mxu1 }
 0x15a   : > { %v1389_v54 = vpop.f32.mrb[1].mxu1  ;;  %v2000_v36 = vadd.f32 %v1387_v53, %v2884_v2 }
 0x15b   : > { %v1391_v55 = vpop.f32.mrb[2].mxu1  ;;  %v2002_v37 = vadd.f32 %v1389_v54, %v2886_v3 }
 0x15c   : > { %v1393_v57 = vpop.f32.mrb[3].mxu1  ;;  %v2004_v40 = vadd.f32 %v1391_v55, %v2884_v2 }
 0x15d   : > { %v2006_v45 = vadd.f32 %v1393_v57, %v2886_v3 }
 0x161   : > { %v2873_v59 = vpop.f32.mrb[4].mxu1 }
 0x162   : > { %v2875_v60 = vpop.f32.mrb[5].mxu1 }
 0x163   : > { %v2877_v61 = vpop.f32.mrb[6].mxu1 }
 0x164   : > { %v2879_v63 = vpop.f32.mrb[7].mxu1 }
 0x169   : > { %v1407_v4 = vpop.f32.mrb[8].mxu1 }
 0x16a   : > { %v1553_v5 = vpop.f32.mrb[8].mxu0  ;;  %v2016_v6 = vadd.f32 %v1407_v4, %v2884_v2  ;;  %v1409_v7 = vpop.f32.mrb[9].mxu1 }
 0x16b   : > { %v1555_v8 = vpop.f32.mrb[9].mxu0  ;;  %v2019_v9 = vadd.f32 %v1409_v7, %v2886_v3  ;;  %v1411_v10 = vpop.f32.mrb[10].mxu1 }
 0x16c   : > { %v1557_v11 = vpop.f32.mrb[10].mxu0  ;;  %v2017_v12 = vadd.f32 %v2016_v6, %v1553_v5  ;;  %v2022_v13 = vadd.f32 %v1411_v10, %v2884_v2  ;;  %v1413_v14 = vpop.f32.mrb[11].mxu1 }
 0x16d   : > { %v1559_v15 = vpop.f32.mrb[11].mxu0  ;;  %v2020_v16 = vadd.f32 %v2019_v9, %v1555_v8  ;;  %v2025_v17 = vadd.f32 %v1413_v14, %v2886_v3  ;;  %v2008_v8 = vadd.f32 %v2873_v59, %v2884_v2  ;;  %v2010_v9 = vadd.f32 %v2875_v60, %v2886_v3 }
 0x16e   : > { %v2023_v18 = vadd.f32 %v2022_v13, %v1557_v11  ;;  %v2012_v14 = vadd.f32 %v2877_v61, %v2884_v2 }
 0x16f   : > { %v2026_v19 = vadd.f32 %v2025_v17, %v1559_v15 }
 0x171   : > { %v1417_v20 = vpop.f32.mrb[12].mxu1 }
 0x172   : > { %v1563_v21 = vpop.f32.mrb[12].mxu0  ;;  %v2028_v22 = vadd.f32 %v1417_v20, %v2884_v2  ;;  %v1419_v23 = vpop.f32.mrb[13].mxu1 }
 0x173   : > { %v1565_v24 = vpop.f32.mrb[13].mxu0  ;;  %v2031_v25 = vadd.f32 %v1419_v23, %v2886_v3  ;;  %v1421_v26 = vpop.f32.mrb[14].mxu1 }
 0x174   : > { %v1567_v27 = vpop.f32.mrb[14].mxu0  ;;  %v2029_v28 = vadd.f32 %v2028_v22, %v1563_v21  ;;  %v2034_v29 = vadd.f32 %v1421_v26, %v2884_v2  ;;  %v1423_v30 = vpop.f32.mrb[15].mxu1 }
 0x175   : > { %v1569_v31 = vpop.f32.mrb[15].mxu0  ;;  %v2032_v32 = vadd.f32 %v2031_v25, %v1565_v24  ;;  %v2037_v33 = vadd.f32 %v1423_v30, %v2886_v3 }
 0x176   : > { %v2035_v34 = vadd.f32 %v2034_v29, %v1567_v27 }
 0x177   : > { %v2038_v35 = vadd.f32 %v2037_v33, %v1569_v31 }
 0x179   : > { %v1626_v39 = vpop.f32.mrb[16].mxu1 }
 0x17a   : > { %v1606_v38 = vpop.f32.mrb[0].mxu0  ;;  %v2018_v42 = vadd.f32 %v2017_v12, %v1626_v39  ;;  %v1628_v44 = vpop.f32.mrb[17].mxu1 }
 0x17b   : > { %v2001_v41 = vadd.f32 %v2000_v36, %v1606_v38  ;;  %v1608_v43 = vpop.f32.mrb[1].mxu0  ;;  %v2021_v47 = vadd.f32 %v2020_v16, %v1628_v44  ;;  %v1630_v49 = vpop.f32.mrb[18].mxu1 }
 0x17c   : > { %v2003_v46 = vadd.f32 %v2002_v37, %v1608_v43  ;;  %v1610_v48 = vpop.f32.mrb[2].mxu0  ;;  %v1653_v51 = vmax.f32 %v2018_v42, 0.0  ;;  %v2024_v53 = vadd.f32 %v2023_v18, %v1630_v49  ;;  %v1632_v56 = vpop.f32.mrb[19].mxu1 }
 0x17d   : > { %v1645_v50 = vmax.f32 %v2001_v41, 0.0  ;;  %v2005_v52 = vadd.f32 %v2004_v40, %v1610_v48  ;;  %v1612_v54 = vpop.f32.mrb[3].mxu0  ;;  %v1654_v62 = vmax.f32 %v2021_v47, 0.0  ;;  %v2027_v0 = vadd.f32 %v2026_v19, %v1632_v56 }
 0x17e   : > { %v1646_v58 = vmax.f32 %v2003_v46, 0.0  ;;  %v2007_v55 = vadd.f32 %v2006_v45, %v1612_v54  ;;  %v1655_v1 = vmax.f32 %v2024_v53, 0.0  ;;  %v2014_v19 = vadd.f32 %v2879_v63, %v2886_v3 }
 0x17f   : > { %v1647_v57 = vmax.f32 %v2005_v52, 0.0  ;;  %v1980_v5 = vpack.c.bf16 %v1654_v62, %v1653_v51  ;;  %v1656_v7 = vmax.f32 %v2027_v0, 0.0 }
 0x180   : > { %v1976_v4 = vpack.c.bf16 %v1646_v58, %v1645_v50  ;;  %v1648_v6 = vmax.f32 %v2007_v55, 0.0 }
 0x181   : > { %1713 = vst [vmem:[%s2904_s18 + $0x20] sm:$0xff] %v1980_v5  ;;  %v1981_v11 = vpack.c.bf16 %v1656_v7, %v1655_v1  ;;  %v1636_v13 = vpop.f32.mrb[20].mxu1 }
 0x182   : > { %1709 = vst [vmem:[%s2904_s18] sm:$0xff] %v1976_v4  ;;  %v1977_v10 = vpack.c.bf16 %v1648_v6, %v1647_v57  ;;  %v1616_v12 = vpop.f32.mrb[4].mxu0  ;;  %v2030_v16 = vadd.f32 %v2029_v28, %v1636_v13  ;;  %v1638_v18 = vpop.f32.mrb[21].mxu1 }
 0x183   : > { %v2009_v15 = vadd.f32 %v2008_v8, %v1616_v12  ;;  %v1618_v17 = vpop.f32.mrb[5].mxu0  ;;  %1714 = vst [vmem:[%s2904_s18 + $0x28] sm:$0xff] %v1981_v11  ;;  %v2033_v60 = vadd.f32 %v2032_v32, %v1638_v18  ;;  %v1640_v21 = vpop.f32.mrb[22].mxu1 }
 0x184   : > { %1710 = vst [vmem:[%s2904_s18 + $0x8] sm:$0xff] %v1977_v10  ;;  %v2011_v59 = vadd.f32 %v2010_v9, %v1618_v17  ;;  %v1620_v20 = vpop.f32.mrb[6].mxu0  ;;  %v1657_v23 = vmax.f32 %v2030_v16, 0.0  ;;  %v2036_v25 = vadd.f32 %v2035_v34, %v1640_v21  ;;  %v1642_v2 = vpop.f32.mrb[23].mxu1 }
 0x185   : > { %v1649_v22 = vmax.f32 %v2009_v15, 0.0  ;;  %v2013_v24 = vadd.f32 %v2012_v14, %v1620_v20  ;;  %v1622_v61 = vpop.f32.mrb[7].mxu0  ;;  %v1658_v27 = vmax.f32 %v2033_v60, 0.0  ;;  %v2039_v63 = vadd.f32 %v2038_v35, %v1642_v2 }
 0x186   : > { %v1650_v26 = vmax.f32 %v2011_v59, 0.0  ;;  %v2015_v28 = vadd.f32 %v2014_v19, %v1622_v61  ;;  %v1659_v29 = vmax.f32 %v2036_v25, 0.0 }
 0x187   : > { %v1651_v3 = vmax.f32 %v2013_v24, 0.0  ;;  %v1982_v31 = vpack.c.bf16 %v1658_v27, %v1657_v23  ;;  %v1660_v33 = vmax.f32 %v2039_v63, 0.0 }
 0x188   : > { %v1978_v30 = vpack.c.bf16 %v1650_v26, %v1649_v22  ;;  %v1652_v32 = vmax.f32 %v2015_v28, 0.0 }
 0x189   : > { %1715 = vst [vmem:[%s2904_s18 + $0x30] sm:$0xff] %v1982_v31  ;;  %v1983_v37 = vpack.c.bf16 %v1660_v33, %v1659_v29 }
 0x18a   : > { %1711 = vst [vmem:[%s2904_s18 + $0x10] sm:$0xff] %v1978_v30  ;;  %v1979_v36 = vpack.c.bf16 %v1652_v32, %v1651_v3 }
 0x18b   : > { %1716 = vst [vmem:[%s2904_s18 + $0x38] sm:$0xff] %v1983_v37 }
 0x18c   : > { %1712 = vst [vmem:[%s2904_s18 + $0x18] sm:$0xff] %v1979_v36 }
 0x18d PF: > { %s13_s12 = sadd.s32 1, %s2364_s12  }
 0x18e   : > { %p10_p4 = scmp.ge.s32.totalorder %s13_s12, 4  }
 0x190   :  { %12 = sbr.rel (!%p10_p4) target bundleno = 1 (0x1), region = 62 }

// kernel: forward.7
= control target key start
LH: loop header
LB: loop body
LE: loop exit
PB: predicated region body
PF: predicated region fallthrough
CT: control target
= control target key end

     0   :  { %s794_s9 = smov 0   ;;  %s868_s0 = inlined_call_operand.vmem [shape: bf16[2,8,1024], index: 0, kind: input, shape index: {}]   ;;  %s869_s1 = inlined_call_operand.vmem [shape: bf16[16,8], index: 1, kind: input, shape index: {}]   ;;  %s870_s2 = inlined_call_operand.vmem [shape: bf16[2,16,2048], index: 2, kind: output, shape index: {}]  }
   0x1 LB: > { %s658_s10 = sadd.s32 4294967295, %s776_s9   ;;  %p662_p0 = scmp.ge.s32.totalorder %s776_s9, 1  ;;  %s776_s9 = sphi %s794_s9, %s12_s9  }
   0x2   : > { %p112_p1 = scmp.lt.s32.totalorder %s776_s9, 3 }
   0x4   : > { %p113_p2 = pnand %p662_p0, %p112_p1 }
   0x5   : > { %p134_p3 = scmp.lt.s32.totalorder (!%p113_p2), %s658_s10, 1  ;;  %v778_v0 = vmov (!%p113_p2), 0   ;;  %vm180_vm0 = vcmask (!%p113_p2), 1043456   ;;  %v765_v15 = vld [vmem:[%s869_s1] sm:$0xff] (!%p113_p2)   ;;  %vm176_vm1 = vcmask (!%p113_p2), 64512  }
   0x6   : > { %116 = sbr.rel (%p113_p2) target bundleno = 266 (0x10a), region = 28  ;;  %237 = vmatprep.mubr.bf16.mxu0 (!%p113_p2), %v778_v0  ;;  %280 = vmatprep.mubr.bf16.mxu1 (!%p113_p2), %v778_v0 }
   0xd   : > { %s872_s10 = smov (!%p134_p3, %s658_s10), 1 }
   0xe   : > { %s718_s11 = sshll.u32 %s872_s10, 5  ;;  %s719_s17 = sshll.u32 %s872_s10, 7 }
   0xf   : > { %s138_s14 = scalar_lea.vmem %s868_s0, %s718_s11  ;;  %s825_s20 = scalar_lea.vmem %s870_s2, %s719_s17 }
  0x10   : > { %v147_v1 = vld [vmem:[%s138_s14] sm:$0xff]  ;;  %v148_v2 = vld [vmem:[%s138_s14 + $0x8] sm:$0xff]  ;;  %v149_v3 = vld [vmem:[%s138_s14 + $0x10] sm:$0xff] }
  0x11   : > { %v669_v4 = vcombine.high %v147_v1, %v147_v1  ;;  %v671_v5 = vcombine.high %v148_v2, %v148_v2  ;;  %v668_v6 = vcombine.low %v147_v1, %v147_v1  ;;  %v670_v7 = vcombine.low %v148_v2, %v148_v2  ;;  %v150_v8 = vld [vmem:[%s138_s14 + $0x18] sm:$0xff] }
  0x12   : > { %v673_v9 = vcombine.high %v149_v3, %v149_v3  ;;  %v675_v10 = vcombine.high %v150_v8, %v150_v8  ;;  %v672_v11 = vcombine.low %v149_v3, %v149_v3  ;;  %v674_v12 = vcombine.low %v150_v8, %v150_v8 }
  0x13   : > { %676 = vmatprep.subr.msk.bf16.mxu0 %vm180_vm0, %v669_v4  ;;  %678 = vmatprep.subr.msk.bf16.mxu1 %vm180_vm0, %v671_v5  ;;  %v182_v13 = vsel %vm180_vm0, %v668_v6, 0  ;;  %v188_v14 = vsel %vm180_vm0, %v670_v7, 0 }
  0x14   : > { %206 = vmatpush1.bf16.msra.mxu0 %v182_v13  ;;  %249 = vmatpush1.bf16.msra.mxu1 %v188_v14  ;;  %v194_v16 = vsel %vm180_vm0, %v672_v11, 0  ;;  %v200_v17 = vsel %vm180_vm0, %v674_v12, 0 }
  0x15   : > { %680 = vmatprep.subr.msk.bf16.mxu0 %vm180_vm0, %v673_v9  ;;  %682 = vmatprep.subr.msk.bf16.mxu1 %vm180_vm0, %v675_v10 }
  0x17   : > { %677 = vmatmul.mubr.msk.bf16.vlgmr.msra.gmra.mrb[0].mxu0 %vm176_vm1, %v765_v15  ;;  %679 = vmatmul.mubr.msk.bf16.vlgmr.msra.gmra.mrb[0].mxu1 %vm176_vm1, %v765_v15 }
  0x18   : > { %292 = vmatpush1.bf16.msra.mxu0 %v194_v16  ;;  %335 = vmatpush1.bf16.msra.mxu1 %v200_v17 }
  0x19   : > { %323 = vmatprep.mubr.bf16.mxu0 %v778_v0  ;;  %366 = vmatprep.mubr.bf16.mxu1 %v778_v0 }
  0x1f   : > { %681 = vmatmul.mubr.msk.bf16.vlgmr.msra.gmra.mrb[4].mxu0 %vm176_vm1, %v765_v15  ;;  %683 = vmatmul.mubr.msk.bf16.vlgmr.msra.gmra.mrb[4].mxu1 %vm176_vm1, %v765_v15 }
  0xea   : > { %v239_v18 = vpop.f32.mrb[0].mxu0  ;;  %v282_v19 = vpop.f32.mrb[0].mxu1 }
  0xeb   : > { %v391_v20 = vmul.f32 0.75, %v239_v18  ;;  %v407_v21 = vmul.f32 0.25, %v239_v18  ;;  %v423_v22 = vmul.f32 0.25, %v282_v19  ;;  %v437_v23 = vmul.f32 0.75, %v282_v19  ;;  %v241_v24 = vpop.f32.mrb[1].mxu0  ;;  %v284_v25 = vpop.f32.mrb[1].mxu1 }
  0xec   : > { %v377_v26 = vmul.f32 0.0, %v241_v24  ;;  %v393_v27 = vmul.f32 0.25, %v241_v24  ;;  %v409_v28 = vmul.f32 0.75, %v241_v24  ;;  %v820_v29 = vmul.f32 0.25, %v284_v25  ;;  %v243_v30 = vpop.f32.mrb[2].mxu0  ;;  %v286_v31 = vpop.f32.mrb[2].mxu1 }
  0xed   : > { %v465_v32 = vmul.f32 0.75, %v284_v25  ;;  %v392_v33 = vmul.f32 0.75, %v243_v30  ;;  %v408_v34 = vmul.f32 0.25, %v243_v30  ;;  %v424_v35 = vmul.f32 0.25, %v286_v31  ;;  %v245_v36 = vpop.f32.mrb[3].mxu0  ;;  %v288_v37 = vpop.f32.mrb[3].mxu1 }
  0xee   : > { %v379_v38 = vadd.f32 %v377_v26, %v239_v18  ;;  %v395_v39 = vadd.f32 %v393_v27, %v391_v20  ;;  %v411_v40 = vadd.f32 %v409_v28, %v407_v21  ;;  %v425_v41 = vadd.f32 %v423_v22, %v409_v28 }
  0xef   : > { %v439_v42 = vadd.f32 %v437_v23, %v393_v27  ;;  %v453_v43 = vadd.f32 %v820_v29, %v437_v23  ;;  %v467_v44 = vadd.f32 %v465_v32, %v423_v22  ;;  %v438_v45 = vmul.f32 0.75, %v286_v31 }
  0xf0   : > { %v720_v46 = vpack.c.bf16 %v379_v38, %v379_v38  ;;  %v722_v47 = vpack.c.bf16 %v395_v39, %v395_v39  ;;  %v724_v48 = vpack.c.bf16 %v411_v40, %v411_v40  ;;  %v726_v49 = vpack.c.bf16 %v425_v41, %v425_v41 }
  0xf1   : > { %v728_v50 = vpack.c.bf16 %v439_v42, %v439_v42  ;;  %v730_v51 = vpack.c.bf16 %v453_v43, %v453_v43  ;;  %v732_v52 = vpack.c.bf16 %v467_v44, %v467_v44  ;;  %v378_v53 = vmul.f32 0.0, %v245_v36 }
  0xf2   : > { %389 = vst [vmem:[%s825_s20] sm:$0xf] %v720_v46  ;;  %405 = vst [vmem:[%s825_s20 + $0x4] sm:$0xf] %v722_v47  ;;  %v394_v54 = vmul.f32 0.25, %v245_v36  ;;  %v410_v55 = vmul.f32 0.75, %v245_v36  ;;  %v832_v56 = vmul.f32 0.25, %v288_v37 }
  0xf3   : > { %421 = vst [vmem:[%s825_s20 + $0x8] sm:$0xf] %v724_v48  ;;  %435 = vst [vmem:[%s825_s20 + $0xc] sm:$0xf] %v726_v49  ;;  %v466_v57 = vmul.f32 0.75, %v288_v37  ;;  %v325_v58 = vpop.f32.mrb[4].mxu0  ;;  %v380_v60 = vadd.f32 %v378_v53, %v243_v30 }
  0xf4   : > { %v368_v59 = vpop.f32.mrb[4].mxu1  ;;  %449 = vst [vmem:[%s825_s20 + $0x10] sm:$0xf] %v728_v50  ;;  %463 = vst [vmem:[%s825_s20 + $0x14] sm:$0xf] %v730_v51  ;;  %v479_v61 = vmul.f32 0.25, %v325_v58  ;;  %v396_v2 = vadd.f32 %v394_v54, %v392_v33  ;;  %v412_v3 = vadd.f32 %v410_v55, %v408_v34  ;;  %v426_v4 = vadd.f32 %v424_v35, %v410_v55 }
  0xf5   : > { %477 = vst [vmem:[%s825_s20 + $0x18] sm:$0xf] %v732_v52  ;;  %v493_v62 = vmul.f32 0.75, %v325_v58  ;;  %v535_v63 = vmul.f32 0.25, %v368_v59  ;;  %v327_v0 = vpop.f32.mrb[5].mxu0  ;;  %v370_v1 = vpop.f32.mrb[5].mxu1  ;;  %v440_v5 = vadd.f32 %v438_v45, %v394_v54  ;;  %v721_v8 = vpack.c.bf16 %v380_v60, %v380_v60 }
  0xf6   : > { %v329_v6 = vpop.f32.mrb[6].mxu0  ;;  %v372_v7 = vpop.f32.mrb[6].mxu1  ;;  %v454_v9 = vadd.f32 %v832_v56, %v438_v45  ;;  %v468_v10 = vadd.f32 %v466_v57, %v424_v35  ;;  %v481_v11 = vadd.f32 %v479_v61, %v465_v32  ;;  %v723_v14 = vpack.c.bf16 %v396_v2, %v396_v2 }
  0xf7   : > { %v331_v12 = vpop.f32.mrb[7].mxu0  ;;  %v374_v13 = vpop.f32.mrb[7].mxu1  ;;  %v725_v15 = vpack.c.bf16 %v412_v3, %v412_v3  ;;  %v727_v16 = vpack.c.bf16 %v426_v4, %v426_v4  ;;  %v729_v17 = vpack.c.bf16 %v440_v5, %v440_v5  ;;  %390 = vst [vmem:[%s825_s20 + $0x40] sm:$0xf] %v721_v8  ;;  %v495_v21 = vadd.f32 %v493_v62, %v820_v29 }
  0xf8   : > { %v731_v18 = vpack.c.bf16 %v454_v9, %v454_v9  ;;  %v733_v19 = vpack.c.bf16 %v468_v10, %v468_v10  ;;  %v734_v20 = vpack.c.bf16 %v481_v11, %v481_v11  ;;  %406 = vst [vmem:[%s825_s20 + $0x44] sm:$0xf] %v723_v14  ;;  %v549_v22 = vmul.f32 0.75, %v368_v59 }
  0xf9   : > { %422 = vst [vmem:[%s825_s20 + $0x48] sm:$0xf] %v725_v15  ;;  %436 = vst [vmem:[%s825_s20 + $0x4c] sm:$0xf] %v727_v16  ;;  %v507_v23 = vmul.f32 0.25, %v327_v0  ;;  %v521_v24 = vmul.f32 0.75, %v327_v0  ;;  %v736_v26 = vpack.c.bf16 %v495_v21, %v495_v21 }
  0xfa   : > { %450 = vst [vmem:[%s825_s20 + $0x50] sm:$0xf] %v729_v17  ;;  %v563_v25 = vmul.f32 0.25, %v370_v1  ;;  %464 = vst [vmem:[%s825_s20 + $0x54] sm:$0xf] %v731_v18  ;;  %v577_v27 = vmul.f32 0.75, %v370_v1 }
  0xfb   : > { %478 = vst [vmem:[%s825_s20 + $0x58] sm:$0xf] %v733_v19  ;;  %491 = vst [vmem:[%s825_s20 + $0x1c] sm:$0xf] %v734_v20  ;;  %v480_v28 = vmul.f32 0.25, %v329_v6  ;;  %v494_v30 = vmul.f32 0.75, %v329_v6  ;;  %v509_v31 = vadd.f32 %v507_v23, %v493_v62  ;;  %v523_v32 = vadd.f32 %v521_v24, %v479_v61 }
  0xfc   : > { %v537_v29 = vadd.f32 %v535_v63, %v521_v24  ;;  %v551_v33 = vadd.f32 %v549_v22, %v507_v23  ;;  %505 = vst [vmem:[%s825_s20 + $0x20] sm:$0xf] %v736_v26  ;;  %v565_v34 = vadd.f32 %v563_v25, %v549_v22  ;;  %v579_v35 = vadd.f32 %v577_v27, %v535_v63 }
  0xfd   : > { %v591_v36 = vadd.f32 %v577_v27, %v563_v25  ;;  %v482_v37 = vadd.f32 %v480_v28, %v466_v57  ;;  %v738_v38 = vpack.c.bf16 %v509_v31, %v509_v31  ;;  %v740_v39 = vpack.c.bf16 %v523_v32, %v523_v32 }
  0xfe   : > { %v742_v40 = vpack.c.bf16 %v537_v29, %v537_v29  ;;  %v744_v41 = vpack.c.bf16 %v551_v33, %v551_v33  ;;  %v746_v42 = vpack.c.bf16 %v565_v34, %v565_v34  ;;  %v748_v43 = vpack.c.bf16 %v579_v35, %v579_v35 }
  0xff   : > { %v750_v44 = vpack.c.bf16 %v591_v36, %v591_v36  ;;  %v735_v45 = vpack.c.bf16 %v482_v37, %v482_v37  ;;  %519 = vst [vmem:[%s825_s20 + $0x24] sm:$0xf] %v738_v38  ;;  %533 = vst [vmem:[%s825_s20 + $0x28] sm:$0xf] %v740_v39  ;;  %v496_v46 = vadd.f32 %v494_v30, %v832_v56  ;;  %v536_v47 = vmul.f32 0.25, %v372_v7 }
 0x100   : > { %547 = vst [vmem:[%s825_s20 + $0x2c] sm:$0xf] %v742_v40  ;;  %561 = vst [vmem:[%s825_s20 + $0x30] sm:$0xf] %v744_v41  ;;  %v550_v48 = vmul.f32 0.75, %v372_v7  ;;  %v508_v49 = vmul.f32 0.25, %v331_v12 }
 0x101   : > { %575 = vst [vmem:[%s825_s20 + $0x34] sm:$0xf] %v746_v42  ;;  %589 = vst [vmem:[%s825_s20 + $0x38] sm:$0xf] %v748_v43  ;;  %v522_v50 = vmul.f32 0.75, %v331_v12  ;;  %v564_v51 = vmul.f32 0.25, %v374_v13  ;;  %v737_v53 = vpack.c.bf16 %v496_v46, %v496_v46 }
 0x102   : > { %601 = vst [vmem:[%s825_s20 + $0x3c] sm:$0xf] %v750_v44  ;;  %492 = vst [vmem:[%s825_s20 + $0x5c] sm:$0xf] %v735_v45  ;;  %v578_v52 = vmul.f32 0.75, %v374_v13  ;;  %v510_v54 = vadd.f32 %v508_v49, %v494_v30  ;;  %v552_v55 = vadd.f32 %v550_v48, %v508_v49 }
 0x103   : > { %v524_v57 = vadd.f32 %v522_v50, %v480_v28  ;;  %v538_v56 = vadd.f32 %v536_v47, %v522_v50  ;;  %v566_v58 = vadd.f32 %v564_v51, %v550_v48  ;;  %506 = vst [vmem:[%s825_s20 + $0x60] sm:$0xf] %v737_v53 }
 0x104   : > { %v580_v59 = vadd.f32 %v578_v52, %v536_v47  ;;  %v739_v60 = vpack.c.bf16 %v510_v54, %v510_v54  ;;  %v745_v61 = vpack.c.bf16 %v552_v55, %v552_v55  ;;  %v592_v62 = vadd.f32 %v578_v52, %v564_v51 }
 0x105   : > { %v741_v63 = vpack.c.bf16 %v524_v57, %v524_v57  ;;  %v743_v0 = vpack.c.bf16 %v538_v56, %v538_v56  ;;  %v747_v1 = vpack.c.bf16 %v566_v58, %v566_v58 }
 0x106   : > { %v749_v2 = vpack.c.bf16 %v580_v59, %v580_v59  ;;  %520 = vst [vmem:[%s825_s20 + $0x64] sm:$0xf] %v739_v60  ;;  %562 = vst [vmem:[%s825_s20 + $0x70] sm:$0xf] %v745_v61  ;;  %v751_v3 = vpack.c.bf16 %v592_v62, %v592_v62 }
 0x107   : > { %534 = vst [vmem:[%s825_s20 + $0x68] sm:$0xf] %v741_v63  ;;  %548 = vst [vmem:[%s825_s20 + $0x6c] sm:$0xf] %v743_v0 }
 0x108   : > { %576 = vst [vmem:[%s825_s20 + $0x74] sm:$0xf] %v747_v1  ;;  %590 = vst [vmem:[%s825_s20 + $0x78] sm:$0xf] %v749_v2 }
 0x109   : > { %602 = vst [vmem:[%s825_s20 + $0x7c] sm:$0xf] %v751_v3 }
 0x10a PF: > { %s12_s9 = sadd.s32 1, %s776_s9  }
 0x10b   : > { %p9_p4 = scmp.ge.s32.totalorder %s12_s9, 4  }
 0x10d   :  { %11 = sbr.rel (!%p9_p4) target bundleno = 1 (0x1), region = 58 }

// kernel: forward.6
= control target key start
LH: loop header
LB: loop body
LE: loop exit
PB: predicated region body
PF: predicated region fallthrough
CT: control target
= control target key end

     0   :  { %s4595_s18 = smov 0   ;;  %s5648_s0 = inlined_call_operand.vmem [shape: bf16[128,2304], index: 0, kind: input, shape index: {}]   ;;  %s5649_s1 = inlined_call_operand.vmem [shape: bf16[2304,256], index: 1, kind: input, shape index: {}]   ;;  %s5650_s2 = inlined_call_operand.vmem [shape: f32[1,256], index: 2, kind: input, shape index: {}]   ;;  %s5651_s3 = inlined_call_operand.vmem [shape: bf16[256,128], index: 3, kind: input, shape index: {}]   ;;  %s5652_s4 = inlined_call_operand.vmem [shape: f32[1,128], index: 4, kind: input, shape index: {}]   ;;  %s5653_s5 = inlined_call_operand.vmem [shape: bf16[128,128], index: 5, kind: output, shape index: {}]  }
   0x1 LB: > { %s3381_s19 = sadd.s32 4294967295, %s4563_s18   ;;  %p3385_p0 = scmp.ge.s32.totalorder %s4563_s18, 1  ;;  %s4563_s18 = sphi %s4595_s18, %s15_s18  }
   0x2   : > { %p189_p1 = scmp.lt.s32.totalorder %s4563_s18, 3 }
   0x4   : > { %p190_p2 = pnand %p3385_p0, %p189_p1 }
   0x5   : > { %v4001_v0 = vld [vmem:[%s5649_s1 + $0x4] ss:$8 sps:$4 sm:$0xff] (!%p190_p2)   ;;  %v4005_v2 = vld [vmem:[%s5649_s1] ss:$8 sps:$4 sm:$0xff] (!%p190_p2)   ;;  %v4007_v4 = vld [vmem:[%s5649_s1 + $0x14] ss:$8 sps:$4 sm:$0xff] (!%p190_p2)  }
   0x6   : > { %193 = sbr.rel (%p190_p2) target bundleno = 795 (0x31b), region = 40  ;;  %v4003_v1 = vld [vmem:[%s5649_s1 + $0x404] ss:$8 sps:$4 sm:$0xff] (!%p190_p2)   ;;  %2404 = vmatprep.subr.bf16.mxu1 (!%p190_p2), %v4001_v0  ;;  %v4006_v3 = vld [vmem:[%s5649_s1 + $0x400] ss:$8 sps:$4 sm:$0xff] (!%p190_p2)   ;;  %s3386_s9 = sshll.u32 (!%p190_p2), %s3381_s19, 3 }
   0x7   : > { %2696 = vmatprep.subr.bf16.mxu0 (!%p190_p2), %v4003_v1  ;;  %2405 = vmatpush1.bf16.msra.mxu1 (!%p190_p2), %v4005_v2  ;;  %v4009_v5 = vld [vmem:[%s5649_s1 + $0x414] ss:$8 sps:$4 sm:$0xff] (!%p190_p2)   ;;  %v4011_v6 = vld [vmem:[%s5649_s1 + $0x10] ss:$8 sps:$4 sm:$0xff] (!%p190_p2)   ;;  %v4013_v8 = vld [vmem:[%s5649_s1 + $0x24] ss:$8 sps:$4 sm:$0xff] (!%p190_p2)  }
   0x8   : > { %2697 = vmatpush1.bf16.msra.mxu0 (!%p190_p2), %v4006_v3  ;;  %2406 = vmatprep.subr.bf16.mxu1 (!%p190_p2), %v4007_v4  ;;  %v4012_v7 = vld [vmem:[%s5649_s1 + $0x410] ss:$8 sps:$4 sm:$0xff] (!%p190_p2)   ;;  %v4015_v9 = vld [vmem:[%s5649_s1 + $0x424] ss:$8 sps:$4 sm:$0xff] (!%p190_p2)   ;;  %v4017_v10 = vld [vmem:[%s5649_s1 + $0x20] ss:$8 sps:$4 sm:$0xff] (!%p190_p2)  }
   0x9   : > { %2698 = vmatprep.subr.bf16.mxu0 (!%p190_p2), %v4009_v5  ;;  %v4018_v11 = vld [vmem:[%s5649_s1 + $0x420] ss:$8 sps:$4 sm:$0xff] (!%p190_p2)   ;;  %v4019_v12 = vld [vmem:[%s5649_s1 + $0x34] ss:$8 sps:$4 sm:$0xff] (!%p190_p2)   ;;  %v4023_v14 = vld [vmem:[%s5649_s1 + $0x30] ss:$8 sps:$4 sm:$0xff] (!%p190_p2)  }
   0xa   : > { %v4021_v13 = vld [vmem:[%s5649_s1 + $0x434] ss:$8 sps:$4 sm:$0xff] (!%p190_p2)   ;;  %v4024_v15 = vld [vmem:[%s5649_s1 + $0x430] ss:$8 sps:$4 sm:$0xff] (!%p190_p2)   ;;  %v4025_v16 = vld [vmem:[%s5649_s1 + $0x44] ss:$8 sps:$4 sm:$0xff] (!%p190_p2)  }
   0xb   : > { %2407 = vmatpush1.bf16.msra.mxu1 (!%p190_p2), %v4011_v6  ;;  %v4027_v17 = vld [vmem:[%s5649_s1 + $0x444] ss:$8 sps:$4 sm:$0xff] (!%p190_p2)   ;;  %v4029_v18 = vld [vmem:[%s5649_s1 + $0x40] ss:$8 sps:$4 sm:$0xff] (!%p190_p2)   ;;  %v4031_v20 = vld [vmem:[%s5649_s1 + $0x54] ss:$8 sps:$4 sm:$0xff] (!%p190_p2)  }
   0xc   : > { %2699 = vmatpush1.bf16.msra.mxu0 (!%p190_p2), %v4012_v7  ;;  %2408 = vmatprep.subr.bf16.mxu1 (!%p190_p2), %v4013_v8  ;;  %v4030_v19 = vld [vmem:[%s5649_s1 + $0x440] ss:$8 sps:$4 sm:$0xff] (!%p190_p2)   ;;  %v4033_v21 = vld [vmem:[%s5649_s1 + $0x454] ss:$8 sps:$4 sm:$0xff] (!%p190_p2)   ;;  %v4035_v22 = vld [vmem:[%s5649_s1 + $0x50] ss:$8 sps:$4 sm:$0xff] (!%p190_p2)  }
   0xd   : > { %2700 = vmatprep.subr.bf16.mxu0 %v4015_v9  ;;  %v4036_v23 = vld [vmem:[%s5649_s1 + $0x450] ss:$8 sps:$4 sm:$0xff]   ;;  %v4037_v24 = vld [vmem:[%s5649_s1 + $0x64] ss:$8 sps:$4 sm:$0xff]   ;;  %v4041_v26 = vld [vmem:[%s5649_s1 + $0x60] ss:$8 sps:$4 sm:$0xff]  }
   0xe   : > { %v4039_v25 = vld [vmem:[%s5649_s1 + $0x464] ss:$8 sps:$4 sm:$0xff]   ;;  %v4042_v27 = vld [vmem:[%s5649_s1 + $0x460] ss:$8 sps:$4 sm:$0xff]   ;;  %v4043_v28 = vld [vmem:[%s5649_s1 + $0x74] ss:$8 sps:$4 sm:$0xff]  }
   0xf   : > { %2409 = vmatpush1.bf16.msra.mxu1 %v4017_v10  ;;  %v4045_v29 = vld [vmem:[%s5649_s1 + $0x474] ss:$8 sps:$4 sm:$0xff]   ;;  %v4047_v30 = vld [vmem:[%s5649_s1 + $0x70] ss:$8 sps:$4 sm:$0xff]   ;;  %v4049_v32 = vld [vmem:[%s5649_s1 + $0x84] ss:$8 sps:$4 sm:$0xff]  }
  0x10   : > { %2701 = vmatpush1.bf16.msra.mxu0 %v4018_v11  ;;  %2410 = vmatprep.subr.bf16.mxu1 %v4019_v12  ;;  %v4048_v31 = vld [vmem:[%s5649_s1 + $0x470] ss:$8 sps:$4 sm:$0xff]   ;;  %p219_p3 = scmp.lt.s32.totalorder %s3386_s9, 15  ;;  %v4051_v33 = vld [vmem:[%s5649_s1 + $0x484] ss:$8 sps:$4 sm:$0xff]  }
  0x11   : > { %2702 = vmatprep.subr.bf16.mxu0 %v4021_v13  ;;  %v4053_v34 = vld [vmem:[%s5649_s1 + $0x80] ss:$8 sps:$4 sm:$0xff]   ;;  %v4055_v36 = vld [vmem:[%s5649_s1 + $0x94] ss:$8 sps:$4 sm:$0xff]   ;;  %v4059_v38 = vld [vmem:[%s5649_s1 + $0x90] ss:$8 sps:$4 sm:$0xff]  }
  0x12   : > { %v4054_v35 = vld [vmem:[%s5649_s1 + $0x480] ss:$8 sps:$4 sm:$0xff]   ;;  %s5655_s9 = smov (!%p219_p3, %s3386_s9), 15  ;;  %v4057_v37 = vld [vmem:[%s5649_s1 + $0x494] ss:$8 sps:$4 sm:$0xff]  }
  0x13   : > { %2411 = vmatpush1.bf16.msra.mxu1 %v4023_v14  ;;  %v4060_v39 = vld [vmem:[%s5649_s1 + $0x490] ss:$8 sps:$4 sm:$0xff]   ;;  %v4061_v40 = vld [vmem:[%s5649_s1 + $0xa4] ss:$8 sps:$4 sm:$0xff]   ;;  %s3992_s8 = smul.u32 72, %s5655_s9  ;;  %s3389_s12 = sshll.u32 %s5655_s9, 2 }
  0x14   : > { %2703 = vmatpush1.bf16.msra.mxu0 %v4024_v15  ;;  %2412 = vmatprep.subr.bf16.mxu1 %v4025_v16  ;;  %v4063_v41 = vld [vmem:[%s5649_s1 + $0x4a4] ss:$8 sps:$4 sm:$0xff]   ;;  %v4065_v42 = vld [vmem:[%s5649_s1 + $0xa0] ss:$8 sps:$4 sm:$0xff]   ;;  %v4067_v44 = vld [vmem:[%s5649_s1 + $0xb4] ss:$8 sps:$4 sm:$0xff]   ;;  %s5639_s15 = scalar_lea.vmem %s5653_s5, %s3389_s12 }
  0x15   : > { %2704 = vmatprep.subr.bf16.mxu0 %v4027_v17  ;;  %v4066_v43 = vld [vmem:[%s5649_s1 + $0x4a0] ss:$8 sps:$4 sm:$0xff]   ;;  %s4746_s21 = scalar_lea.vmem %s5648_s0, %s3992_s8  ;;  %v4069_v45 = vld [vmem:[%s5649_s1 + $0x4b4] ss:$8 sps:$4 sm:$0xff]   ;;  %v4071_v46 = vld [vmem:[%s5649_s1 + $0xb0] ss:$8 sps:$4 sm:$0xff]  }
  0x16   : > { %v4072_v47 = vld [vmem:[%s5649_s1 + $0x4b0] ss:$8 sps:$4 sm:$0xff]   ;;  %v4099_v48 = vld [vmem:[%s4746_s21 + $0x4] ss:$72 sps:$4 sm:$0xff]   ;;  %v4077_v52 = vld [vmem:[%s5649_s1 + $0xc0] ss:$8 sps:$4 sm:$0xff]  }
  0x17   : > { %2413 = vmatpush1.bf16.msra.mxu1 %v4029_v18  ;;  %v4073_v49 = vld [vmem:[%s5649_s1 + $0xc4] ss:$8 sps:$4 sm:$0xff]   ;;  %2436 = vmatprep.mubr.bf16.mxu1 %v4099_v48  ;;  %v4078_v53 = vld [vmem:[%s5649_s1 + $0x4c0] ss:$8 sps:$4 sm:$0xff]   ;;  %v4079_v54 = vld [vmem:[%s5649_s1 + $0xd4] ss:$8 sps:$4 sm:$0xff]  }
  0x18   : > { %2705 = vmatpush1.bf16.msra.mxu0 %v4030_v19  ;;  %2414 = vmatprep.subr.bf16.mxu1 %v4031_v20  ;;  %v4075_v50 = vld [vmem:[%s5649_s1 + $0x4c4] ss:$8 sps:$4 sm:$0xff]   ;;  %v4081_v55 = vld [vmem:[%s5649_s1 + $0x4d4] ss:$8 sps:$4 sm:$0xff]   ;;  %v4083_v56 = vld [vmem:[%s5649_s1 + $0xd0] ss:$8 sps:$4 sm:$0xff]  }
  0x19   : > { %2706 = vmatprep.subr.bf16.mxu0 %v4033_v21  ;;  %v4105_v51 = vld [vmem:[%s4746_s21 + $0x24] ss:$72 sps:$4 sm:$0xff]   ;;  %v4084_v57 = vld [vmem:[%s5649_s1 + $0x4d0] ss:$8 sps:$4 sm:$0xff]   ;;  %v4089_v60 = vld [vmem:[%s5649_s1 + $0xe0] ss:$8 sps:$4 sm:$0xff]  }
  0x1a   : > { %2728 = vmatprep.mubr.bf16.mxu0 %v4105_v51  ;;  %v4085_v58 = vld [vmem:[%s5649_s1 + $0xe4] ss:$8 sps:$4 sm:$0xff]   ;;  %v4090_v61 = vld [vmem:[%s5649_s1 + $0x4e0] ss:$8 sps:$4 sm:$0xff]   ;;  %v4091_v62 = vld [vmem:[%s5649_s1 + $0xf4] ss:$8 sps:$4 sm:$0xff]  }
  0x1b   : > { %2415 = vmatpush1.bf16.msra.mxu1 %v4035_v22  ;;  %v4087_v59 = vld [vmem:[%s5649_s1 + $0x4e4] ss:$8 sps:$4 sm:$0xff]   ;;  %v4093_v63 = vld [vmem:[%s5649_s1 + $0x4f4] ss:$8 sps:$4 sm:$0xff]   ;;  %v4095_v0 = vld [vmem:[%s5649_s1 + $0xf0] ss:$8 sps:$4 sm:$0xff]  }
  0x1c   : > { %2707 = vmatpush1.bf16.msra.mxu0 %v4036_v23  ;;  %2416 = vmatprep.subr.bf16.mxu1 %v4037_v24  ;;  %v4096_v1 = vld [vmem:[%s5649_s1 + $0x4f0] ss:$8 sps:$4 sm:$0xff]   ;;  %v4102_v2 = vld [vmem:[%s5649_s1 + $0x104] ss:$8 sps:$4 sm:$0xff]   ;;  %v4097_v4 = vld [vmem:[%s4746_s21] ss:$72 sps:$4 sm:$0xff]  }
  0x1d   : > { %2708 = vmatprep.subr.bf16.mxu0 %v4039_v25  ;;  %v4108_v3 = vld [vmem:[%s5649_s1 + $0x504] ss:$8 sps:$4 sm:$0xff]   ;;  %v4100_v5 = vld [vmem:[%s5649_s1 + $0x100] ss:$8 sps:$4 sm:$0xff]   ;;  %v4111_v8 = vld [vmem:[%s5649_s1 + $0x114] ss:$8 sps:$4 sm:$0xff]  }
  0x1e   : > { %v4103_v6 = vld [vmem:[%s4746_s21 + $0x20] ss:$72 sps:$4 sm:$0xff]   ;;  %v4114_v9 = vld [vmem:[%s5649_s1 + $0x514] ss:$8 sps:$4 sm:$0xff]   ;;  %v4109_v10 = vld [vmem:[%s5649_s1 + $0x110] ss:$8 sps:$4 sm:$0xff]  }
  0x1f   : > { %2417 = vmatpush1.bf16.msra.mxu1 %v4041_v26  ;;  %v4106_v7 = vld [vmem:[%s5649_s1 + $0x500] ss:$8 sps:$4 sm:$0xff]   ;;  %v4112_v11 = vld [vmem:[%s5649_s1 + $0x510] ss:$8 sps:$4 sm:$0xff]   ;;  %v4117_v12 = vld [vmem:[%s5649_s1 + $0x124] ss:$8 sps:$4 sm:$0xff]  }
  0x20   : > { %2709 = vmatpush1.bf16.msra.mxu0 %v4042_v27  ;;  %2418 = vmatprep.subr.bf16.mxu1 %v4043_v28  ;;  %v4120_v13 = vld [vmem:[%s5649_s1 + $0x524] ss:$8 sps:$4 sm:$0xff]   ;;  %v4115_v14 = vld [vmem:[%s5649_s1 + $0x120] ss:$8 sps:$4 sm:$0xff]   ;;  %v4123_v16 = vld [vmem:[%s5649_s1 + $0x134] ss:$8 sps:$4 sm:$0xff]  }
  0x21   : > { %2710 = vmatprep.subr.bf16.mxu0 %v4045_v29  ;;  %v4118_v15 = vld [vmem:[%s5649_s1 + $0x520] ss:$8 sps:$4 sm:$0xff]   ;;  %v4163_v17 = vld [vmem:[%s4746_s21 + $0x94] ss:$72 sps:$4 sm:$0xff]   ;;  %v4121_v19 = vld [vmem:[%s5649_s1 + $0x130] ss:$8 sps:$4 sm:$0xff]  }
  0x22   : > { %v4126_v18 = vld [vmem:[%s5649_s1 + $0x534] ss:$8 sps:$4 sm:$0xff]   ;;  %v4124_v20 = vld [vmem:[%s5649_s1 + $0x530] ss:$8 sps:$4 sm:$0xff]   ;;  %v4129_v22 = vld [vmem:[%s5649_s1 + $0x144] ss:$8 sps:$4 sm:$0xff]  }
  0x23   : > { %2419 = vmatpush1.bf16.msra.mxu1 %v4047_v30  ;;  %v4168_v21 = vld [vmem:[%s4746_s21 + $0xb4] ss:$72 sps:$4 sm:$0xff]   ;;  %v4132_v23 = vld [vmem:[%s5649_s1 + $0x544] ss:$8 sps:$4 sm:$0xff]   ;;  %v4173_v24 = vld [vmem:[%s4746_s21 + $0x90] ss:$72 sps:$4 sm:$0xff]  }
  0x24   : > { %2711 = vmatpush1.bf16.msra.mxu0 %v4048_v31  ;;  %2420 = vmatprep.subr.bf16.mxu1 %v4049_v32  ;;  %v4174_v25 = vld [vmem:[%s4746_s21 + $0xb0] ss:$72 sps:$4 sm:$0xff]   ;;  %v4127_v26 = vld [vmem:[%s5649_s1 + $0x140] ss:$8 sps:$4 sm:$0xff]   ;;  %v4135_v28 = vld [vmem:[%s5649_s1 + $0x154] ss:$8 sps:$4 sm:$0xff]  }
  0x25   : > { %2712 = vmatprep.subr.bf16.mxu0 %v4051_v33  ;;  %v4130_v27 = vld [vmem:[%s5649_s1 + $0x540] ss:$8 sps:$4 sm:$0xff]   ;;  %v4181_v29 = vld [vmem:[%s4746_s21 + $0x124] ss:$72 sps:$4 sm:$0xff]   ;;  %v4138_v30 = vld [vmem:[%s5649_s1 + $0x554] ss:$8 sps:$4 sm:$0xff]  }
  0x26   : > { %v4133_v31 = vld [vmem:[%s5649_s1 + $0x150] ss:$8 sps:$4 sm:$0xff]   ;;  %v4186_v33 = vld [vmem:[%s4746_s21 + $0x144] ss:$72 sps:$4 sm:$0xff]   ;;  %v4154_v51 = vld [vmem:[%s5649_s1 + $0x580] ss:$8 sps:$4 sm:$0xff]  }
  0x27   : > { %2421 = vmatpush1.bf16.msra.mxu1 %v4053_v34  ;;  %v4136_v32 = vld [vmem:[%s5649_s1 + $0x550] ss:$8 sps:$4 sm:$0xff]   ;;  %v4141_v34 = vld [vmem:[%s5649_s1 + $0x164] ss:$8 sps:$4 sm:$0xff]  }
  0x28   : > { %2713 = vmatpush1.bf16.msra.mxu0 %v4054_v35  ;;  %2422 = vmatprep.subr.bf16.mxu1 %v4055_v36  ;;  %v4144_v35 = vld [vmem:[%s5649_s1 + $0x564] ss:$8 sps:$4 sm:$0xff]   ;;  %v4191_v36 = vld [vmem:[%s4746_s21 + $0x120] ss:$72 sps:$4 sm:$0xff]   ;;  %v4209_v48 = vld [vmem:[%s4746_s21 + $0x1b0] ss:$72 sps:$4 sm:$0xff]  }
  0x29   : > { %2714 = vmatprep.subr.bf16.mxu0 %v4057_v37  ;;  %v4192_v37 = vld [vmem:[%s4746_s21 + $0x140] ss:$72 sps:$4 sm:$0xff]  }
  0x2b   : > { %2423 = vmatpush1.bf16.msra.mxu1 %v4059_v38  ;;  %v4139_v38 = vld [vmem:[%s5649_s1 + $0x160] ss:$8 sps:$4 sm:$0xff]  }
  0x2c   : > { %2715 = vmatpush1.bf16.msra.mxu0 %v4060_v39  ;;  %2424 = vmatprep.subr.bf16.mxu1 %v4061_v40  ;;  %v4142_v39 = vld [vmem:[%s5649_s1 + $0x560] ss:$8 sps:$4 sm:$0xff]   ;;  %v4147_v40 = vld [vmem:[%s5649_s1 + $0x174] ss:$8 sps:$4 sm:$0xff]  }
  0x2d   : > { %2716 = vmatprep.subr.bf16.mxu0 %v4063_v41  ;;  %v4199_v41 = vld [vmem:[%s4746_s21 + $0x1b4] ss:$72 sps:$4 sm:$0xff]  }
  0x2f   : > { %2425 = vmatpush1.bf16.msra.mxu1 %v4065_v42  ;;  %v4150_v42 = vld [vmem:[%s5649_s1 + $0x574] ss:$8 sps:$4 sm:$0xff]  }
  0x30   : > { %2717 = vmatpush1.bf16.msra.mxu0 %v4066_v43  ;;  %2426 = vmatprep.subr.bf16.mxu1 %v4067_v44  ;;  %v4145_v43 = vld [vmem:[%s5649_s1 + $0x170] ss:$8 sps:$4 sm:$0xff]  }
  0x31   : > { %2718 = vmatprep.subr.bf16.mxu0 %v4069_v45  ;;  %v4148_v44 = vld [vmem:[%s5649_s1 + $0x570] ss:$8 sps:$4 sm:$0xff]   ;;  %v4204_v45 = vld [vmem:[%s4746_s21 + $0x1d4] ss:$72 sps:$4 sm:$0xff]  }
  0x33   : > { %2427 = vmatpush1.bf16.msra.mxu1 %v4071_v46  ;;  %v4153_v46 = vld [vmem:[%s5649_s1 + $0x184] ss:$8 sps:$4 sm:$0xff]  }
  0x34   : > { %2719 = vmatpush1.bf16.msra.mxu0 %v4072_v47  ;;  %2428 = vmatprep.subr.bf16.mxu1 %v4073_v49  ;;  %v4156_v47 = vld [vmem:[%s5649_s1 + $0x584] ss:$8 sps:$4 sm:$0xff]   ;;  %v4210_v49 = vld [vmem:[%s4746_s21 + $0x1d0] ss:$72 sps:$4 sm:$0xff]  }
  0x35   : > { %2720 = vmatprep.subr.bf16.mxu0 %v4075_v50  ;;  %v4151_v50 = vld [vmem:[%s5649_s1 + $0x180] ss:$8 sps:$4 sm:$0xff]  }
  0x37   : > { %2429 = vmatpush1.bf16.msra.mxu1 %v4077_v52  ;;  %v4159_v52 = vld [vmem:[%s5649_s1 + $0x194] ss:$8 sps:$4 sm:$0xff]  }
  0x38   : > { %2721 = vmatpush1.bf16.msra.mxu0 %v4078_v53  ;;  %2430 = vmatprep.subr.bf16.mxu1 %v4079_v54  ;;  %v4162_v53 = vld [vmem:[%s5649_s1 + $0x594] ss:$8 sps:$4 sm:$0xff]  }
  0x39   : > { %2722 = vmatprep.subr.bf16.mxu0 %v4081_v55  ;;  %v4219_v54 = vld [vmem:[%s4746_s21 + $0xc] ss:$72 sps:$4 sm:$0xff]   ;;  %v4157_v55 = vld [vmem:[%s5649_s1 + $0x190] ss:$8 sps:$4 sm:$0xff]  }
  0x3b   : > { %2431 = vmatpush1.bf16.msra.mxu1 %v4083_v56  ;;  %v4160_v56 = vld [vmem:[%s5649_s1 + $0x590] ss:$8 sps:$4 sm:$0xff]  }
  0x3c   : > { %2723 = vmatpush1.bf16.msra.mxu0 %v4084_v57  ;;  %2432 = vmatprep.subr.bf16.mxu1 %v4085_v58  ;;  %v4225_v57 = vld [vmem:[%s4746_s21 + $0x2c] ss:$72 sps:$4 sm:$0xff]  }
  0x3d   : > { %2724 = vmatprep.subr.bf16.mxu0 %v4087_v59  ;;  %v4167_v58 = vld [vmem:[%s5649_s1 + $0x1a4] ss:$8 sps:$4 sm:$0xff]  }
  0x3e   : > { %v4172_v59 = vld [vmem:[%s5649_s1 + $0x5a4] ss:$8 sps:$4 sm:$0xff]  }
  0x3f   : > { %2433 = vmatpush1.bf16.msra.mxu1 %v4089_v60  ;;  %v4165_v60 = vld [vmem:[%s5649_s1 + $0x1a0] ss:$8 sps:$4 sm:$0xff]  }
  0x40   : > { %2725 = vmatpush1.bf16.msra.mxu0 %v4090_v61  ;;  %2434 = vmatprep.subr.bf16.mxu1 %v4091_v62  ;;  %v4170_v61 = vld [vmem:[%s5649_s1 + $0x5a0] ss:$8 sps:$4 sm:$0xff]   ;;  %v4177_v62 = vld [vmem:[%s5649_s1 + $0x1b4] ss:$8 sps:$4 sm:$0xff]  }
  0x41   : > { %2726 = vmatprep.subr.bf16.mxu0 %v4093_v63  ;;  %v4180_v63 = vld [vmem:[%s5649_s1 + $0x5b4] ss:$8 sps:$4 sm:$0xff]  }
  0x43   : > { %2435 = vmatpush1.bf16.msra.mxu1 %v4095_v0  ;;  %v4175_v0 = vld [vmem:[%s5649_s1 + $0x1b0] ss:$8 sps:$4 sm:$0xff]  }
  0x44   : > { %2727 = vmatpush1.bf16.msra.mxu0 %v4096_v1  ;;  %2477 = vmatprep.subr.bf16.mxu1 %v4102_v2  ;;  %v4178_v1 = vld [vmem:[%s5649_s1 + $0x5b0] ss:$8 sps:$4 sm:$0xff]   ;;  %v4185_v2 = vld [vmem:[%s5649_s1 + $0x1c4] ss:$8 sps:$4 sm:$0xff]  }
  0x45   : > { %2769 = vmatprep.subr.bf16.mxu0 %v4108_v3  ;;  %v4190_v3 = vld [vmem:[%s5649_s1 + $0x5c4] ss:$8 sps:$4 sm:$0xff]  }
  0x46   : > { %2437 = vmatmul.mubr.bf16.vlgmr.msra.gmra.mrb[0].mxu1 %v4097_v4  ;;  %v4183_v4 = vld [vmem:[%s5649_s1 + $0x1c0] ss:$8 sps:$4 sm:$0xff]  }
  0x47   : > { %2729 = vmatmul.mubr.bf16.vlgmr.msra.gmra.mrb[0].mxu0 %v4103_v6  ;;  %2478 = vmatpush1.bf16.msra.mxu1 %v4100_v5  ;;  %v4188_v5 = vld [vmem:[%s5649_s1 + $0x5c0] ss:$8 sps:$4 sm:$0xff]   ;;  %v4195_v6 = vld [vmem:[%s5649_s1 + $0x1d4] ss:$8 sps:$4 sm:$0xff]  }
  0x48   : > { %2770 = vmatpush1.bf16.msra.mxu0 %v4106_v7  ;;  %2479 = vmatprep.subr.bf16.mxu1 %v4111_v8  ;;  %v4198_v7 = vld [vmem:[%s5649_s1 + $0x5d4] ss:$8 sps:$4 sm:$0xff]   ;;  %v4193_v8 = vld [vmem:[%s5649_s1 + $0x1d0] ss:$8 sps:$4 sm:$0xff]  }
  0x49   : > { %2771 = vmatprep.subr.bf16.mxu0 %v4114_v9  ;;  %2446 = vmatprep.mubr.bf16.mxu1 %v4163_v17  ;;  %v4196_v9 = vld [vmem:[%s5649_s1 + $0x5d0] ss:$8 sps:$4 sm:$0xff]  }
  0x4a   : > { %2738 = vmatprep.mubr.bf16.mxu0 %v4168_v21  ;;  %v4214_v17 = vld [vmem:[%s5649_s1 + $0x5f0] ss:$8 sps:$4 sm:$0xff]   ;;  %v4220_v21 = vld [vmem:[%s5649_s1 + $0x200] ss:$8 sps:$4 sm:$0xff]  }
  0x4b   : > { %2480 = vmatpush1.bf16.msra.mxu1 %v4109_v10  ;;  %v4203_v10 = vld [vmem:[%s5649_s1 + $0x1e4] ss:$8 sps:$4 sm:$0xff]  }
  0x4c   : > { %2772 = vmatpush1.bf16.msra.mxu0 %v4112_v11  ;;  %2481 = vmatprep.subr.bf16.mxu1 %v4117_v12  ;;  %v4208_v11 = vld [vmem:[%s5649_s1 + $0x5e4] ss:$8 sps:$4 sm:$0xff]   ;;  %v4201_v12 = vld [vmem:[%s5649_s1 + $0x1e0] ss:$8 sps:$4 sm:$0xff]  }
  0x4d   : > { %2773 = vmatprep.subr.bf16.mxu0 %v4120_v13  ;;  %v4206_v13 = vld [vmem:[%s5649_s1 + $0x5e0] ss:$8 sps:$4 sm:$0xff]  }
  0x4e   : > { %2447 = vmatmul.mubr.bf16.gmra.mrb[4].mxu1 %v4173_v24  ;;  %v4231_v24 = vld [vmem:[%s5649_s1 + $0x214] ss:$8 sps:$4 sm:$0xff]  }
  0x4f   : > { %2482 = vmatpush1.bf16.msra.mxu1 %v4115_v14  ;;  %2739 = vmatmul.mubr.bf16.gmra.mrb[4].mxu0 %v4174_v25  ;;  %v4213_v14 = vld [vmem:[%s5649_s1 + $0x1f4] ss:$8 sps:$4 sm:$0xff]  }
  0x50   : > { %2774 = vmatpush1.bf16.msra.mxu0 %v4118_v15  ;;  %2483 = vmatprep.subr.bf16.mxu1 %v4123_v16  ;;  %v4216_v15 = vld [vmem:[%s5649_s1 + $0x5f4] ss:$8 sps:$4 sm:$0xff]   ;;  %v4211_v16 = vld [vmem:[%s5649_s1 + $0x1f0] ss:$8 sps:$4 sm:$0xff]  }
  0x51   : > { %2775 = vmatprep.subr.bf16.mxu0 %v4126_v18  ;;  %2456 = vmatprep.mubr.bf16.mxu1 %v4181_v29  ;;  %v4222_v18 = vld [vmem:[%s5649_s1 + $0x204] ss:$8 sps:$4 sm:$0xff]   ;;  %v4234_v25 = vld [vmem:[%s5649_s1 + $0x614] ss:$8 sps:$4 sm:$0xff]   ;;  %v4232_v29 = vld [vmem:[%s5649_s1 + $0x610] ss:$8 sps:$4 sm:$0xff]  }
  0x52   : > { %2748 = vmatprep.mubr.bf16.mxu0 %v4186_v33  ;;  %v4293_v33 = vld [vmem:[%s4746_s21 + $0x98] ss:$72 sps:$4 sm:$0xff]  }
  0x53   : > { %2484 = vmatpush1.bf16.msra.mxu1 %v4121_v19  ;;  %v4228_v19 = vld [vmem:[%s5649_s1 + $0x604] ss:$8 sps:$4 sm:$0xff]  }
  0x54   : > { %2776 = vmatpush1.bf16.msra.mxu0 %v4124_v20  ;;  %2485 = vmatprep.subr.bf16.mxu1 %v4129_v22  ;;  %v4217_v20 = vld [vmem:[%s4746_s21 + $0x8] ss:$72 sps:$4 sm:$0xff]  }
  0x55   : > { %2777 = vmatprep.subr.bf16.mxu0 %v4132_v23  ;;  %v4223_v22 = vld [vmem:[%s4746_s21 + $0x28] ss:$72 sps:$4 sm:$0xff]  }
  0x56   : > { %2457 = vmatmul.mubr.bf16.gmra.mrb[8].mxu1 %v4191_v36  ;;  %v4226_v23 = vld [vmem:[%s5649_s1 + $0x600] ss:$8 sps:$4 sm:$0xff]   ;;  %v4243_v36 = vld [vmem:[%s5649_s1 + $0x234] ss:$8 sps:$4 sm:$0xff]  }
  0x57   : > { %2486 = vmatpush1.bf16.msra.mxu1 %v4127_v26  ;;  %2749 = vmatmul.mubr.bf16.gmra.mrb[8].mxu0 %v4192_v37  ;;  %v4283_v26 = vld [vmem:[%s4746_s21 + $0x9c] ss:$72 sps:$4 sm:$0xff]  }
  0x58   : > { %2778 = vmatpush1.bf16.msra.mxu0 %v4130_v27  ;;  %2487 = vmatprep.subr.bf16.mxu1 %v4135_v28  ;;  %v4288_v27 = vld [vmem:[%s4746_s21 + $0xbc] ss:$72 sps:$4 sm:$0xff]   ;;  %v4229_v28 = vld [vmem:[%s5649_s1 + $0x210] ss:$8 sps:$4 sm:$0xff]  }
  0x59   : > { %2779 = vmatprep.subr.bf16.mxu0 %v4138_v30  ;;  %2466 = vmatprep.mubr.bf16.mxu1 %v4199_v41  ;;  %v4237_v30 = vld [vmem:[%s5649_s1 + $0x224] ss:$8 sps:$4 sm:$0xff]   ;;  %v4246_v37 = vld [vmem:[%s5649_s1 + $0x634] ss:$8 sps:$4 sm:$0xff]   ;;  %v4244_v41 = vld [vmem:[%s5649_s1 + $0x630] ss:$8 sps:$4 sm:$0xff]  }
  0x5a   : > { %2758 = vmatprep.mubr.bf16.mxu0 %v4204_v45  ;;  %v4311_v45 = vld [vmem:[%s4746_s21 + $0x128] ss:$72 sps:$4 sm:$0xff]  }
  0x5b   : > { %2488 = vmatpush1.bf16.msra.mxu1 %v4133_v31  ;;  %v4240_v31 = vld [vmem:[%s5649_s1 + $0x624] ss:$8 sps:$4 sm:$0xff]  }
  0x5c   : > { %2780 = vmatpush1.bf16.msra.mxu0 %v4136_v32  ;;  %2489 = vmatprep.subr.bf16.mxu1 %v4141_v34  ;;  %v4235_v32 = vld [vmem:[%s5649_s1 + $0x220] ss:$8 sps:$4 sm:$0xff]  }
  0x5d   : > { %2781 = vmatprep.subr.bf16.mxu0 %v4144_v35  ;;  %v4294_v34 = vld [vmem:[%s4746_s21 + $0xb8] ss:$72 sps:$4 sm:$0xff]  }
  0x5e   : > { %2467 = vmatmul.mubr.bf16.gmra.mrb[12].mxu1 %v4209_v48  ;;  %v4238_v35 = vld [vmem:[%s5649_s1 + $0x620] ss:$8 sps:$4 sm:$0xff]   ;;  %v4255_v48 = vld [vmem:[%s5649_s1 + $0x254] ss:$8 sps:$4 sm:$0xff]  }
  0x5f   : > { %2490 = vmatpush1.bf16.msra.mxu1 %v4139_v38  ;;  %2759 = vmatmul.mubr.bf16.gmra.mrb[12].mxu0 %v4210_v49  ;;  %v4301_v38 = vld [vmem:[%s4746_s21 + $0x12c] ss:$72 sps:$4 sm:$0xff]  }
  0x60   : > { %2782 = vmatpush1.bf16.msra.mxu0 %v4142_v39  ;;  %2491 = vmatprep.subr.bf16.mxu1 %v4147_v40  ;;  %v4306_v39 = vld [vmem:[%s4746_s21 + $0x14c] ss:$72 sps:$4 sm:$0xff]   ;;  %v4241_v40 = vld [vmem:[%s5649_s1 + $0x230] ss:$8 sps:$4 sm:$0xff]  }
  0x61   : > { %2783 = vmatprep.subr.bf16.mxu0 %v4150_v42  ;;  %2509 = vmatprep.mubr.bf16.mxu1 %v4219_v54  ;;  %v4249_v42 = vld [vmem:[%s5649_s1 + $0x244] ss:$8 sps:$4 sm:$0xff]   ;;  %v4258_v49 = vld [vmem:[%s5649_s1 + $0x654] ss:$8 sps:$4 sm:$0xff]  }
  0x62   : > { %2801 = vmatprep.mubr.bf16.mxu0 %v4225_v57  ;;  %v4261_v54 = vld [vmem:[%s5649_s1 + $0x264] ss:$8 sps:$4 sm:$0xff]   ;;  %v4262_v57 = vld [vmem:[%s5649_s1 + $0x660] ss:$8 sps:$4 sm:$0xff]  }
  0x63   : > { %2492 = vmatpush1.bf16.msra.mxu1 %v4145_v43  ;;  %v4252_v43 = vld [vmem:[%s5649_s1 + $0x644] ss:$8 sps:$4 sm:$0xff]  }
  0x64   : > { %2784 = vmatpush1.bf16.msra.mxu0 %v4148_v44  ;;  %2493 = vmatprep.subr.bf16.mxu1 %v4153_v46  ;;  %v4247_v44 = vld [vmem:[%s5649_s1 + $0x240] ss:$8 sps:$4 sm:$0xff]  }
  0x65   : > { %2785 = vmatprep.subr.bf16.mxu0 %v4156_v47  ;;  %v4312_v46 = vld [vmem:[%s4746_s21 + $0x148] ss:$72 sps:$4 sm:$0xff]  }
  0x66   : > { %v4250_v47 = vld [vmem:[%s5649_s1 + $0x640] ss:$8 sps:$4 sm:$0xff]  }
  0x67   : > { %2494 = vmatpush1.bf16.msra.mxu1 %v4151_v50  ;;  %v4319_v50 = vld [vmem:[%s4746_s21 + $0x1bc] ss:$72 sps:$4 sm:$0xff]  }
  0x68   : > { %2786 = vmatpush1.bf16.msra.mxu0 %v4154_v51  ;;  %2495 = vmatprep.subr.bf16.mxu1 %v4159_v52  ;;  %v4324_v51 = vld [vmem:[%s4746_s21 + $0x1dc] ss:$72 sps:$4 sm:$0xff]   ;;  %v4253_v52 = vld [vmem:[%s5649_s1 + $0x250] ss:$8 sps:$4 sm:$0xff]  }
  0x69   : > { %2787 = vmatprep.subr.bf16.mxu0 %v4162_v53  ;;  %v4256_v53 = vld [vmem:[%s5649_s1 + $0x650] ss:$8 sps:$4 sm:$0xff]  }
  0x6b   : > { %2496 = vmatpush1.bf16.msra.mxu1 %v4157_v55  ;;  %v4264_v55 = vld [vmem:[%s5649_s1 + $0x664] ss:$8 sps:$4 sm:$0xff]  }
  0x6c   : > { %2788 = vmatpush1.bf16.msra.mxu0 %v4160_v56  ;;  %2497 = vmatprep.subr.bf16.mxu1 %v4167_v58  ;;  %v4259_v56 = vld [vmem:[%s5649_s1 + $0x260] ss:$8 sps:$4 sm:$0xff]  }
  0x6d   : > { %2789 = vmatprep.subr.bf16.mxu0 %v4172_v59  ;;  %v4329_v58 = vld [vmem:[%s4746_s21 + $0x1b8] ss:$72 sps:$4 sm:$0xff]  }
  0x6e   : > { %v4330_v59 = vld [vmem:[%s4746_s21 + $0x1d8] ss:$72 sps:$4 sm:$0xff]  }
  0x6f   : > { %2498 = vmatpush1.bf16.msra.mxu1 %v4165_v60  ;;  %v4267_v60 = vld [vmem:[%s5649_s1 + $0x274] ss:$8 sps:$4 sm:$0xff]  }
  0x70   : > { %2790 = vmatpush1.bf16.msra.mxu0 %v4170_v61  ;;  %2499 = vmatprep.subr.bf16.mxu1 %v4177_v62  ;;  %v4270_v61 = vld [vmem:[%s5649_s1 + $0x674] ss:$8 sps:$4 sm:$0xff]  }
  0x71   : > { %2791 = vmatprep.subr.bf16.mxu0 %v4180_v63  ;;  %v4339_v62 = vld [vmem:[%s4746_s21 + $0x14] ss:$72 sps:$4 sm:$0xff]  }
  0x72   : > { %v4345_v63 = vld [vmem:[%s4746_s21 + $0x34] ss:$72 sps:$4 sm:$0xff]  }
  0x73   : > { %2500 = vmatpush1.bf16.msra.mxu1 %v4175_v0  ;;  %v4265_v0 = vld [vmem:[%s5649_s1 + $0x270] ss:$8 sps:$4 sm:$0xff]  }
  0x74   : > { %2792 = vmatpush1.bf16.msra.mxu0 %v4178_v1  ;;  %2501 = vmatprep.subr.bf16.mxu1 %v4185_v2  ;;  %v4268_v1 = vld [vmem:[%s5649_s1 + $0x670] ss:$8 sps:$4 sm:$0xff]   ;;  %v4273_v2 = vld [vmem:[%s5649_s1 + $0x284] ss:$8 sps:$4 sm:$0xff]  }
  0x75   : > { %2793 = vmatprep.subr.bf16.mxu0 %v4190_v3  ;;  %v4276_v3 = vld [vmem:[%s5649_s1 + $0x684] ss:$8 sps:$4 sm:$0xff]  }
  0x77   : > { %2502 = vmatpush1.bf16.msra.mxu1 %v4183_v4  ;;  %v4271_v4 = vld [vmem:[%s5649_s1 + $0x280] ss:$8 sps:$4 sm:$0xff]  }
  0x78   : > { %2794 = vmatpush1.bf16.msra.mxu0 %v4188_v5  ;;  %2503 = vmatprep.subr.bf16.mxu1 %v4195_v6  ;;  %v4274_v5 = vld [vmem:[%s5649_s1 + $0x680] ss:$8 sps:$4 sm:$0xff]   ;;  %v4279_v6 = vld [vmem:[%s5649_s1 + $0x294] ss:$8 sps:$4 sm:$0xff]  }
  0x79   : > { %2795 = vmatprep.subr.bf16.mxu0 %v4198_v7  ;;  %v4282_v7 = vld [vmem:[%s5649_s1 + $0x694] ss:$8 sps:$4 sm:$0xff]  }
  0x7b   : > { %2504 = vmatpush1.bf16.msra.mxu1 %v4193_v8  ;;  %v4277_v8 = vld [vmem:[%s5649_s1 + $0x290] ss:$8 sps:$4 sm:$0xff]  }
  0x7c   : > { %2796 = vmatpush1.bf16.msra.mxu0 %v4196_v9  ;;  %2505 = vmatprep.subr.bf16.mxu1 %v4203_v10  ;;  %v4280_v9 = vld [vmem:[%s5649_s1 + $0x690] ss:$8 sps:$4 sm:$0xff]   ;;  %v4287_v10 = vld [vmem:[%s5649_s1 + $0x2a4] ss:$8 sps:$4 sm:$0xff]  }
  0x7d   : > { %2797 = vmatprep.subr.bf16.mxu0 %v4208_v11  ;;  %v4292_v11 = vld [vmem:[%s5649_s1 + $0x6a4] ss:$8 sps:$4 sm:$0xff]  }
  0x7f   : > { %2506 = vmatpush1.bf16.msra.mxu1 %v4201_v12  ;;  %v4285_v12 = vld [vmem:[%s5649_s1 + $0x2a0] ss:$8 sps:$4 sm:$0xff]  }
  0x80   : > { %2798 = vmatpush1.bf16.msra.mxu0 %v4206_v13  ;;  %2507 = vmatprep.subr.bf16.mxu1 %v4213_v14  ;;  %v4290_v13 = vld [vmem:[%s5649_s1 + $0x6a0] ss:$8 sps:$4 sm:$0xff]   ;;  %v4297_v14 = vld [vmem:[%s5649_s1 + $0x2b4] ss:$8 sps:$4 sm:$0xff]  }
  0x81   : > { %2799 = vmatprep.subr.bf16.mxu0 %v4216_v15  ;;  %v4300_v15 = vld [vmem:[%s5649_s1 + $0x6b4] ss:$8 sps:$4 sm:$0xff]  }
  0x83   : > { %2508 = vmatpush1.bf16.msra.mxu1 %v4211_v16  ;;  %v4295_v16 = vld [vmem:[%s5649_s1 + $0x2b0] ss:$8 sps:$4 sm:$0xff]  }
  0x84   : > { %2800 = vmatpush1.bf16.msra.mxu0 %v4214_v17  ;;  %2550 = vmatprep.subr.bf16.mxu1 %v4222_v18  ;;  %v4298_v17 = vld [vmem:[%s5649_s1 + $0x6b0] ss:$8 sps:$4 sm:$0xff]   ;;  %v4305_v18 = vld [vmem:[%s5649_s1 + $0x2c4] ss:$8 sps:$4 sm:$0xff]  }
  0x85   : > { %2842 = vmatprep.subr.bf16.mxu0 %v4228_v19  ;;  %v4310_v19 = vld [vmem:[%s5649_s1 + $0x6c4] ss:$8 sps:$4 sm:$0xff]  }
  0x86   : > { %2510 = vmatmul.mubr.bf16.vlgmr.msra.gmra.mrb[0].mxu1 %v4217_v20  ;;  %v4303_v20 = vld [vmem:[%s5649_s1 + $0x2c0] ss:$8 sps:$4 sm:$0xff]  }
  0x87   : > { %2802 = vmatmul.mubr.bf16.vlgmr.msra.gmra.mrb[0].mxu0 %v4223_v22  ;;  %2551 = vmatpush1.bf16.msra.mxu1 %v4220_v21  ;;  %v4308_v21 = vld [vmem:[%s5649_s1 + $0x6c0] ss:$8 sps:$4 sm:$0xff]   ;;  %v4315_v22 = vld [vmem:[%s5649_s1 + $0x2d4] ss:$8 sps:$4 sm:$0xff]  }
  0x88   : > { %2843 = vmatpush1.bf16.msra.mxu0 %v4226_v23  ;;  %2552 = vmatprep.subr.bf16.mxu1 %v4231_v24  ;;  %v4318_v23 = vld [vmem:[%s5649_s1 + $0x6d4] ss:$8 sps:$4 sm:$0xff]   ;;  %v4313_v24 = vld [vmem:[%s5649_s1 + $0x2d0] ss:$8 sps:$4 sm:$0xff]  }
  0x89   : > { %2844 = vmatprep.subr.bf16.mxu0 %v4234_v25  ;;  %2519 = vmatprep.mubr.bf16.mxu1 %v4283_v26  ;;  %v4316_v25 = vld [vmem:[%s5649_s1 + $0x6d0] ss:$8 sps:$4 sm:$0xff]   ;;  %v4323_v26 = vld [vmem:[%s5649_s1 + $0x2e4] ss:$8 sps:$4 sm:$0xff]  }
  0x8a   : > { %2811 = vmatprep.mubr.bf16.mxu0 %v4288_v27  ;;  %v4328_v27 = vld [vmem:[%s5649_s1 + $0x6e4] ss:$8 sps:$4 sm:$0xff]  }
  0x8b   : > { %2553 = vmatpush1.bf16.msra.mxu1 %v4229_v28  ;;  %v4321_v28 = vld [vmem:[%s5649_s1 + $0x2e0] ss:$8 sps:$4 sm:$0xff]  }
  0x8c   : > { %2845 = vmatpush1.bf16.msra.mxu0 %v4232_v29  ;;  %2554 = vmatprep.subr.bf16.mxu1 %v4237_v30  ;;  %v4326_v29 = vld [vmem:[%s5649_s1 + $0x6e0] ss:$8 sps:$4 sm:$0xff]   ;;  %v4333_v30 = vld [vmem:[%s5649_s1 + $0x2f4] ss:$8 sps:$4 sm:$0xff]  }
  0x8d   : > { %2846 = vmatprep.subr.bf16.mxu0 %v4240_v31  ;;  %v4336_v31 = vld [vmem:[%s5649_s1 + $0x6f4] ss:$8 sps:$4 sm:$0xff]  }
  0x8e   : > { %2520 = vmatmul.mubr.bf16.gmra.mrb[4].mxu1 %v4293_v33  ;;  %v4334_v33 = vld [vmem:[%s5649_s1 + $0x6f0] ss:$8 sps:$4 sm:$0xff]  }
  0x8f   : > { %2812 = vmatmul.mubr.bf16.gmra.mrb[4].mxu0 %v4294_v34  ;;  %2555 = vmatpush1.bf16.msra.mxu1 %v4235_v32  ;;  %v4331_v32 = vld [vmem:[%s5649_s1 + $0x2f0] ss:$8 sps:$4 sm:$0xff]   ;;  %v4342_v34 = vld [vmem:[%s5649_s1 + $0x304] ss:$8 sps:$4 sm:$0xff]  }
  0x90   : > { %2847 = vmatpush1.bf16.msra.mxu0 %v4238_v35  ;;  %2556 = vmatprep.subr.bf16.mxu1 %v4243_v36  ;;  %v4348_v35 = vld [vmem:[%s5649_s1 + $0x704] ss:$8 sps:$4 sm:$0xff]   ;;  %v4337_v36 = vld [vmem:[%s4746_s21 + $0x10] ss:$72 sps:$4 sm:$0xff]  }
  0x91   : > { %2848 = vmatprep.subr.bf16.mxu0 %v4246_v37  ;;  %2529 = vmatprep.mubr.bf16.mxu1 %v4301_v38  ;;  %v4340_v37 = vld [vmem:[%s5649_s1 + $0x300] ss:$8 sps:$4 sm:$0xff]   ;;  %v4343_v38 = vld [vmem:[%s4746_s21 + $0x30] ss:$72 sps:$4 sm:$0xff]  }
  0x92   : > { %2821 = vmatprep.mubr.bf16.mxu0 %v4306_v39  ;;  %v4346_v39 = vld [vmem:[%s5649_s1 + $0x700] ss:$8 sps:$4 sm:$0xff]  }
  0x93   : > { %2557 = vmatpush1.bf16.msra.mxu1 %v4241_v40  ;;  %v4351_v40 = vld [vmem:[%s5649_s1 + $0x314] ss:$8 sps:$4 sm:$0xff]  }
  0x94   : > { %2849 = vmatpush1.bf16.msra.mxu0 %v4244_v41  ;;  %2558 = vmatprep.subr.bf16.mxu1 %v4249_v42  ;;  %v4354_v41 = vld [vmem:[%s5649_s1 + $0x714] ss:$8 sps:$4 sm:$0xff]   ;;  %v4403_v42 = vld [vmem:[%s4746_s21 + $0xa4] ss:$72 sps:$4 sm:$0xff]  }
  0x95   : > { %2850 = vmatprep.subr.bf16.mxu0 %v4252_v43  ;;  %v4409_v43 = vld [vmem:[%s4746_s21 + $0xc4] ss:$72 sps:$4 sm:$0xff]  }
  0x96   : > { %2530 = vmatmul.mubr.bf16.gmra.mrb[8].mxu1 %v4311_v45  ;;  %v4352_v45 = vld [vmem:[%s5649_s1 + $0x710] ss:$8 sps:$4 sm:$0xff]  }
  0x97   : > { %2822 = vmatmul.mubr.bf16.gmra.mrb[8].mxu0 %v4312_v46  ;;  %2559 = vmatpush1.bf16.msra.mxu1 %v4247_v44  ;;  %v4349_v44 = vld [vmem:[%s5649_s1 + $0x310] ss:$8 sps:$4 sm:$0xff]   ;;  %v4357_v46 = vld [vmem:[%s5649_s1 + $0x324] ss:$8 sps:$4 sm:$0xff]  }
  0x98   : > { %2851 = vmatpush1.bf16.msra.mxu0 %v4250_v47  ;;  %2560 = vmatprep.subr.bf16.mxu1 %v4255_v48  ;;  %v4360_v47 = vld [vmem:[%s5649_s1 + $0x724] ss:$8 sps:$4 sm:$0xff]   ;;  %v4355_v48 = vld [vmem:[%s5649_s1 + $0x320] ss:$8 sps:$4 sm:$0xff]  }
  0x99   : > { %2852 = vmatprep.subr.bf16.mxu0 %v4258_v49  ;;  %2539 = vmatprep.mubr.bf16.mxu1 %v4319_v50  ;;  %v4358_v49 = vld [vmem:[%s5649_s1 + $0x720] ss:$8 sps:$4 sm:$0xff]  }
  0x9a   : > { %2831 = vmatprep.mubr.bf16.mxu0 %v4324_v51  ;;  %v4405_v50 = vld [vmem:[%s4746_s21 + $0xa0] ss:$72 sps:$4 sm:$0xff]  }
  0x9b   : > { %2561 = vmatpush1.bf16.msra.mxu1 %v4253_v52  ;;  %v4414_v51 = vld [vmem:[%s4746_s21 + $0xc0] ss:$72 sps:$4 sm:$0xff]   ;;  %v4363_v52 = vld [vmem:[%s5649_s1 + $0x334] ss:$8 sps:$4 sm:$0xff]  }
  0x9c   : > { %2853 = vmatpush1.bf16.msra.mxu0 %v4256_v53  ;;  %2562 = vmatprep.subr.bf16.mxu1 %v4261_v54  ;;  %v4366_v53 = vld [vmem:[%s5649_s1 + $0x734] ss:$8 sps:$4 sm:$0xff]  }
  0x9d   : > { %2854 = vmatprep.subr.bf16.mxu0 %v4264_v55  ;;  %v4421_v54 = vld [vmem:[%s4746_s21 + $0x134] ss:$72 sps:$4 sm:$0xff]  }
  0x9e   : > { %2540 = vmatmul.mubr.bf16.gmra.mrb[12].mxu1 %v4329_v58  ;;  %v4427_v55 = vld [vmem:[%s4746_s21 + $0x154] ss:$72 sps:$4 sm:$0xff]   ;;  %v4369_v58 = vld [vmem:[%s5649_s1 + $0x344] ss:$8 sps:$4 sm:$0xff]  }
  0x9f   : > { %2832 = vmatmul.mubr.bf16.gmra.mrb[12].mxu0 %v4330_v59  ;;  %2563 = vmatpush1.bf16.msra.mxu1 %v4259_v56  ;;  %v4361_v56 = vld [vmem:[%s5649_s1 + $0x330] ss:$8 sps:$4 sm:$0xff]   ;;  %v4372_v59 = vld [vmem:[%s5649_s1 + $0x744] ss:$8 sps:$4 sm:$0xff]  }
  0xa0   : > { %2855 = vmatpush1.bf16.msra.mxu0 %v4262_v57  ;;  %2564 = vmatprep.subr.bf16.mxu1 %v4267_v60  ;;  %v4364_v57 = vld [vmem:[%s5649_s1 + $0x730] ss:$8 sps:$4 sm:$0xff]   ;;  %v4367_v60 = vld [vmem:[%s5649_s1 + $0x340] ss:$8 sps:$4 sm:$0xff]  }
  0xa1   : > { %2856 = vmatprep.subr.bf16.mxu0 %v4270_v61  ;;  %2582 = vmatprep.mubr.bf16.mxu1 %v4339_v62  ;;  %v4370_v61 = vld [vmem:[%s5649_s1 + $0x740] ss:$8 sps:$4 sm:$0xff]   ;;  %v4423_v62 = vld [vmem:[%s4746_s21 + $0x130] ss:$72 sps:$4 sm:$0xff]  }
  0xa2   : > { %2874 = vmatprep.mubr.bf16.mxu0 %v4345_v63  ;;  %v4432_v63 = vld [vmem:[%s4746_s21 + $0x150] ss:$72 sps:$4 sm:$0xff]  }
  0xa3   : > { %2565 = vmatpush1.bf16.msra.mxu1 %v4265_v0  ;;  %v4375_v0 = vld [vmem:[%s5649_s1 + $0x354] ss:$8 sps:$4 sm:$0xff]  }
  0xa4   : > { %2857 = vmatpush1.bf16.msra.mxu0 %v4268_v1  ;;  %2566 = vmatprep.subr.bf16.mxu1 %v4273_v2  ;;  %v4378_v1 = vld [vmem:[%s5649_s1 + $0x754] ss:$8 sps:$4 sm:$0xff]   ;;  %v4439_v2 = vld [vmem:[%s4746_s21 + $0x1c4] ss:$72 sps:$4 sm:$0xff]  }
  0xa5   : > { %2858 = vmatprep.subr.bf16.mxu0 %v4276_v3  ;;  %v4445_v3 = vld [vmem:[%s4746_s21 + $0x1e4] ss:$72 sps:$4 sm:$0xff]  }
  0xa7   : > { %2567 = vmatpush1.bf16.msra.mxu1 %v4271_v4  ;;  %v4373_v4 = vld [vmem:[%s5649_s1 + $0x350] ss:$8 sps:$4 sm:$0xff]  }
  0xa8   : > { %2859 = vmatpush1.bf16.msra.mxu0 %v4274_v5  ;;  %2568 = vmatprep.subr.bf16.mxu1 %v4279_v6  ;;  %v4376_v5 = vld [vmem:[%s5649_s1 + $0x750] ss:$8 sps:$4 sm:$0xff]   ;;  %v4381_v6 = vld [vmem:[%s5649_s1 + $0x364] ss:$8 sps:$4 sm:$0xff]  }
  0xa9   : > { %2860 = vmatprep.subr.bf16.mxu0 %v4282_v7  ;;  %v4384_v7 = vld [vmem:[%s5649_s1 + $0x764] ss:$8 sps:$4 sm:$0xff]  }
  0xab   : > { %2569 = vmatpush1.bf16.msra.mxu1 %v4277_v8  ;;  %v4379_v8 = vld [vmem:[%s5649_s1 + $0x360] ss:$8 sps:$4 sm:$0xff]  }
  0xac   : > { %2861 = vmatpush1.bf16.msra.mxu0 %v4280_v9  ;;  %2570 = vmatprep.subr.bf16.mxu1 %v4287_v10  ;;  %v4382_v9 = vld [vmem:[%s5649_s1 + $0x760] ss:$8 sps:$4 sm:$0xff]  }
  0xad   : > { %2862 = vmatprep.subr.bf16.mxu0 %v4292_v11  ;;  %v4441_v10 = vld [vmem:[%s4746_s21 + $0x1c0] ss:$72 sps:$4 sm:$0xff]  }
  0xae   : > { %v4450_v11 = vld [vmem:[%s4746_s21 + $0x1e0] ss:$72 sps:$4 sm:$0xff]  }
  0xaf   : > { %2571 = vmatpush1.bf16.msra.mxu1 %v4285_v12  ;;  %v4387_v12 = vld [vmem:[%s5649_s1 + $0x374] ss:$8 sps:$4 sm:$0xff]  }
  0xb0   : > { %2863 = vmatpush1.bf16.msra.mxu0 %v4290_v13  ;;  %2572 = vmatprep.subr.bf16.mxu1 %v4297_v14  ;;  %v4390_v13 = vld [vmem:[%s5649_s1 + $0x774] ss:$8 sps:$4 sm:$0xff]  }
  0xb1   : > { %2864 = vmatprep.subr.bf16.mxu0 %v4300_v15  ;;  %v4459_v14 = vld [vmem:[%s4746_s21 + $0x1c] ss:$72 sps:$4 sm:$0xff]  }
  0xb2   : > { %v4462_v15 = vld [vmem:[%s4746_s21 + $0x3c] ss:$72 sps:$4 sm:$0xff]  }
  0xb3   : > { %2573 = vmatpush1.bf16.msra.mxu1 %v4295_v16  ;;  %v4385_v16 = vld [vmem:[%s5649_s1 + $0x370] ss:$8 sps:$4 sm:$0xff]  }
  0xb4   : > { %2865 = vmatpush1.bf16.msra.mxu0 %v4298_v17  ;;  %2574 = vmatprep.subr.bf16.mxu1 %v4305_v18  ;;  %v4388_v17 = vld [vmem:[%s5649_s1 + $0x770] ss:$8 sps:$4 sm:$0xff]   ;;  %v4393_v18 = vld [vmem:[%s5649_s1 + $0x384] ss:$8 sps:$4 sm:$0xff]  }
  0xb5   : > { %2866 = vmatprep.subr.bf16.mxu0 %v4310_v19  ;;  %v4396_v19 = vld [vmem:[%s5649_s1 + $0x784] ss:$8 sps:$4 sm:$0xff]  }
  0xb7   : > { %2575 = vmatpush1.bf16.msra.mxu1 %v4303_v20  ;;  %v4391_v20 = vld [vmem:[%s5649_s1 + $0x380] ss:$8 sps:$4 sm:$0xff]  }
  0xb8   : > { %2867 = vmatpush1.bf16.msra.mxu0 %v4308_v21  ;;  %2576 = vmatprep.subr.bf16.mxu1 %v4315_v22  ;;  %v4394_v21 = vld [vmem:[%s5649_s1 + $0x780] ss:$8 sps:$4 sm:$0xff]   ;;  %v4399_v22 = vld [vmem:[%s5649_s1 + $0x394] ss:$8 sps:$4 sm:$0xff]  }
  0xb9   : > { %2868 = vmatprep.subr.bf16.mxu0 %v4318_v23  ;;  %v4402_v23 = vld [vmem:[%s5649_s1 + $0x794] ss:$8 sps:$4 sm:$0xff]  }
  0xbb   : > { %2577 = vmatpush1.bf16.msra.mxu1 %v4313_v24  ;;  %v4397_v24 = vld [vmem:[%s5649_s1 + $0x390] ss:$8 sps:$4 sm:$0xff]  }
  0xbc   : > { %2869 = vmatpush1.bf16.msra.mxu0 %v4316_v25  ;;  %2578 = vmatprep.subr.bf16.mxu1 %v4323_v26  ;;  %v4400_v25 = vld [vmem:[%s5649_s1 + $0x790] ss:$8 sps:$4 sm:$0xff]   ;;  %v4408_v26 = vld [vmem:[%s5649_s1 + $0x3a4] ss:$8 sps:$4 sm:$0xff]  }
  0xbd   : > { %2870 = vmatprep.subr.bf16.mxu0 %v4328_v27  ;;  %v4413_v27 = vld [vmem:[%s5649_s1 + $0x7a4] ss:$8 sps:$4 sm:$0xff]  }
  0xbf   : > { %2579 = vmatpush1.bf16.msra.mxu1 %v4321_v28  ;;  %v4406_v28 = vld [vmem:[%s5649_s1 + $0x3a0] ss:$8 sps:$4 sm:$0xff]  }
  0xc0   : > { %2871 = vmatpush1.bf16.msra.mxu0 %v4326_v29  ;;  %2580 = vmatprep.subr.bf16.mxu1 %v4333_v30  ;;  %v4411_v29 = vld [vmem:[%s5649_s1 + $0x7a0] ss:$8 sps:$4 sm:$0xff]   ;;  %v4417_v30 = vld [vmem:[%s5649_s1 + $0x3b4] ss:$8 sps:$4 sm:$0xff]  }
  0xc1   : > { %2872 = vmatprep.subr.bf16.mxu0 %v4336_v31  ;;  %v4420_v31 = vld [vmem:[%s5649_s1 + $0x7b4] ss:$8 sps:$4 sm:$0xff]  }
  0xc3   : > { %2581 = vmatpush1.bf16.msra.mxu1 %v4331_v32  ;;  %v4415_v32 = vld [vmem:[%s5649_s1 + $0x3b0] ss:$8 sps:$4 sm:$0xff]  }
  0xc4   : > { %2873 = vmatpush1.bf16.msra.mxu0 %v4334_v33  ;;  %2623 = vmatprep.subr.bf16.mxu1 %v4342_v34  ;;  %v4418_v33 = vld [vmem:[%s5649_s1 + $0x7b0] ss:$8 sps:$4 sm:$0xff]   ;;  %v4426_v34 = vld [vmem:[%s5649_s1 + $0x3c4] ss:$8 sps:$4 sm:$0xff]  }
  0xc5   : > { %2915 = vmatprep.subr.bf16.mxu0 %v4348_v35  ;;  %v4431_v35 = vld [vmem:[%s5649_s1 + $0x7c4] ss:$8 sps:$4 sm:$0xff]  }
  0xc6   : > { %2583 = vmatmul.mubr.bf16.vlgmr.msra.gmra.mrb[0].mxu1 %v4337_v36  ;;  %v4424_v36 = vld [vmem:[%s5649_s1 + $0x3c0] ss:$8 sps:$4 sm:$0xff]  }
  0xc7   : > { %2875 = vmatmul.mubr.bf16.vlgmr.msra.gmra.mrb[0].mxu0 %v4343_v38  ;;  %2624 = vmatpush1.bf16.msra.mxu1 %v4340_v37  ;;  %v4429_v37 = vld [vmem:[%s5649_s1 + $0x7c0] ss:$8 sps:$4 sm:$0xff]   ;;  %v4435_v38 = vld [vmem:[%s5649_s1 + $0x3d4] ss:$8 sps:$4 sm:$0xff]  }
  0xc8   : > { %2916 = vmatpush1.bf16.msra.mxu0 %v4346_v39  ;;  %2625 = vmatprep.subr.bf16.mxu1 %v4351_v40  ;;  %v4438_v39 = vld [vmem:[%s5649_s1 + $0x7d4] ss:$8 sps:$4 sm:$0xff]   ;;  %v4433_v40 = vld [vmem:[%s5649_s1 + $0x3d0] ss:$8 sps:$4 sm:$0xff]  }
  0xc9   : > { %2917 = vmatprep.subr.bf16.mxu0 %v4354_v41  ;;  %2592 = vmatprep.mubr.bf16.mxu1 %v4403_v42  ;;  %v4436_v41 = vld [vmem:[%s5649_s1 + $0x7d0] ss:$8 sps:$4 sm:$0xff]   ;;  %v4444_v42 = vld [vmem:[%s5649_s1 + $0x3e4] ss:$8 sps:$4 sm:$0xff]  }
  0xca   : > { %2884 = vmatprep.mubr.bf16.mxu0 %v4409_v43  ;;  %v4449_v43 = vld [vmem:[%s5649_s1 + $0x7e4] ss:$8 sps:$4 sm:$0xff]  }
  0xcb   : > { %2626 = vmatpush1.bf16.msra.mxu1 %v4349_v44  ;;  %v4442_v44 = vld [vmem:[%s5649_s1 + $0x3e0] ss:$8 sps:$4 sm:$0xff]  }
  0xcc   : > { %2918 = vmatpush1.bf16.msra.mxu0 %v4352_v45  ;;  %2627 = vmatprep.subr.bf16.mxu1 %v4357_v46  ;;  %v4447_v45 = vld [vmem:[%s5649_s1 + $0x7e0] ss:$8 sps:$4 sm:$0xff]   ;;  %v4453_v46 = vld [vmem:[%s5649_s1 + $0x3f4] ss:$8 sps:$4 sm:$0xff]  }
  0xcd   : > { %2919 = vmatprep.subr.bf16.mxu0 %v4360_v47  ;;  %v4456_v47 = vld [vmem:[%s5649_s1 + $0x7f4] ss:$8 sps:$4 sm:$0xff]  }
  0xce   : > { %2593 = vmatmul.mubr.bf16.gmra.mrb[4].mxu1 %v4405_v50  ;;  %v4465_v50 = vld [vmem:[%s5649_s1 + $0x804] ss:$8 sps:$4 sm:$0xff]  }
  0xcf   : > { %2885 = vmatmul.mubr.bf16.gmra.mrb[4].mxu0 %v4414_v51  ;;  %2628 = vmatpush1.bf16.msra.mxu1 %v4355_v48  ;;  %v4451_v48 = vld [vmem:[%s5649_s1 + $0x3f0] ss:$8 sps:$4 sm:$0xff]  }
  0xd0   : > { %2920 = vmatpush1.bf16.msra.mxu0 %v4358_v49  ;;  %2629 = vmatprep.subr.bf16.mxu1 %v4363_v52  ;;  %v4454_v49 = vld [vmem:[%s5649_s1 + $0x7f0] ss:$8 sps:$4 sm:$0xff]  }
  0xd1   : > { %2921 = vmatprep.subr.bf16.mxu0 %v4366_v53  ;;  %2602 = vmatprep.mubr.bf16.mxu1 %v4421_v54  ;;  %v4457_v51 = vld [vmem:[%s4746_s21 + $0x18] ss:$72 sps:$4 sm:$0xff]   ;;  %v4469_v54 = vld [vmem:[%s4746_s21 + $0xac] ss:$72 sps:$4 sm:$0xff]  }
  0xd2   : > { %2894 = vmatprep.mubr.bf16.mxu0 %v4427_v55  ;;  %v4460_v52 = vld [vmem:[%s4746_s21 + $0x38] ss:$72 sps:$4 sm:$0xff]   ;;  %v4468_v55 = vld [vmem:[%s5649_s1 + $0x814] ss:$8 sps:$4 sm:$0xff]  }
  0xd3   : > { %2630 = vmatpush1.bf16.msra.mxu1 %v4361_v56  ;;  %v4463_v53 = vld [vmem:[%s5649_s1 + $0x800] ss:$8 sps:$4 sm:$0xff]   ;;  %v4502_v56 = vld [vmem:[%s4746_s21 + $0xcc] ss:$72 sps:$4 sm:$0xff]  }
  0xd4   : > { %2922 = vmatpush1.bf16.msra.mxu0 %v4364_v57  ;;  %2631 = vmatprep.subr.bf16.mxu1 %v4369_v58  ;;  %v4466_v57 = vld [vmem:[%s5649_s1 + $0x810] ss:$8 sps:$4 sm:$0xff]   ;;  %v4474_v58 = vld [vmem:[%s5649_s1 + $0x824] ss:$8 sps:$4 sm:$0xff]  }
  0xd5   : > { %2923 = vmatprep.subr.bf16.mxu0 %v4372_v59  ;;  %v4471_v59 = vld [vmem:[%s4746_s21 + $0xa8] ss:$72 sps:$4 sm:$0xff]  }
  0xd6   : > { %2603 = vmatmul.mubr.bf16.gmra.mrb[8].mxu1 %v4423_v62  ;;  %v4478_v62 = vld [vmem:[%s4746_s21 + $0x13c] ss:$72 sps:$4 sm:$0xff]  }
  0xd7   : > { %2895 = vmatmul.mubr.bf16.gmra.mrb[8].mxu0 %v4432_v63  ;;  %2632 = vmatpush1.bf16.msra.mxu1 %v4367_v60  ;;  %v4504_v60 = vld [vmem:[%s4746_s21 + $0xc8] ss:$72 sps:$4 sm:$0xff]   ;;  %v4477_v63 = vld [vmem:[%s5649_s1 + $0x834] ss:$8 sps:$4 sm:$0xff]  }
  0xd8   : > { %2924 = vmatpush1.bf16.msra.mxu0 %v4370_v61  ;;  %2633 = vmatprep.subr.bf16.mxu1 %v4375_v0  ;;  %v4472_v61 = vld [vmem:[%s5649_s1 + $0x820] ss:$8 sps:$4 sm:$0xff]   ;;  %v4511_v0 = vld [vmem:[%s4746_s21 + $0x15c] ss:$72 sps:$4 sm:$0xff]  }
  0xd9   : > { %2925 = vmatprep.subr.bf16.mxu0 %v4378_v1  ;;  %2612 = vmatprep.mubr.bf16.mxu1 %v4439_v2  ;;  %v4475_v1 = vld [vmem:[%s5649_s1 + $0x830] ss:$8 sps:$4 sm:$0xff]   ;;  %v4483_v2 = vld [vmem:[%s5649_s1 + $0x844] ss:$8 sps:$4 sm:$0xff]  }
  0xda   : > { %2904 = vmatprep.mubr.bf16.mxu0 %v4445_v3  ;;  %v4480_v3 = vld [vmem:[%s4746_s21 + $0x138] ss:$72 sps:$4 sm:$0xff]  }
  0xdb   : > { %2634 = vmatpush1.bf16.msra.mxu1 %v4373_v4  ;;  %v4513_v4 = vld [vmem:[%s4746_s21 + $0x158] ss:$72 sps:$4 sm:$0xff]  }
  0xdc   : > { %2926 = vmatpush1.bf16.msra.mxu0 %v4376_v5  ;;  %2635 = vmatprep.subr.bf16.mxu1 %v4381_v6  ;;  %v4481_v5 = vld [vmem:[%s5649_s1 + $0x840] ss:$8 sps:$4 sm:$0xff]   ;;  %v4487_v6 = vld [vmem:[%s4746_s21 + $0x1cc] ss:$72 sps:$4 sm:$0xff]  }
  0xdd   : > { %2927 = vmatprep.subr.bf16.mxu0 %v4384_v7  ;;  %v4486_v7 = vld [vmem:[%s5649_s1 + $0x854] ss:$8 sps:$4 sm:$0xff]  }
  0xde   : > { %2613 = vmatmul.mubr.bf16.gmra.mrb[12].mxu1 %v4441_v10  ;;  %v4492_v10 = vld [vmem:[%s5649_s1 + $0x864] ss:$8 sps:$4 sm:$0xff]  }
  0xdf   : > { %2905 = vmatmul.mubr.bf16.gmra.mrb[12].mxu0 %v4450_v11  ;;  %2636 = vmatpush1.bf16.msra.mxu1 %v4379_v8  ;;  %v4520_v8 = vld [vmem:[%s4746_s21 + $0x1ec] ss:$72 sps:$4 sm:$0xff]   ;;  %v4489_v11 = vld [vmem:[%s4746_s21 + $0x1c8] ss:$72 sps:$4 sm:$0xff]  }
  0xe0   : > { %2928 = vmatpush1.bf16.msra.mxu0 %v4382_v9  ;;  %2637 = vmatprep.subr.bf16.mxu1 %v4387_v12  ;;  %v4484_v9 = vld [vmem:[%s5649_s1 + $0x850] ss:$8 sps:$4 sm:$0xff]  }
  0xe1   : > { %2929 = vmatprep.subr.bf16.mxu0 %v4390_v13  ;;  %2655 = vmatprep.mubr.bf16.mxu1 %v4459_v14  ;;  %v4522_v12 = vld [vmem:[%s4746_s21 + $0x1e8] ss:$72 sps:$4 sm:$0xff]   ;;  %v4531_v14 = vld [vmem:[%s4746_s21 + $0x44] ss:$72 sps:$4 sm:$0xff]  }
  0xe2   : > { %2947 = vmatprep.mubr.bf16.mxu0 %v4462_v15  ;;  %v4490_v13 = vld [vmem:[%s5649_s1 + $0x860] ss:$8 sps:$4 sm:$0xff]   ;;  %v4495_v15 = vld [vmem:[%s5649_s1 + $0x874] ss:$8 sps:$4 sm:$0xff]  }
  0xe3   : > { %2638 = vmatpush1.bf16.msra.mxu1 %v4385_v16  ;;  %v4493_v16 = vld [vmem:[%s5649_s1 + $0x870] ss:$8 sps:$4 sm:$0xff]  }
  0xe4   : > { %2930 = vmatpush1.bf16.msra.mxu0 %v4388_v17  ;;  %2639 = vmatprep.subr.bf16.mxu1 %v4393_v18  ;;  %v4498_v17 = vld [vmem:[%s5649_s1 + $0x884] ss:$8 sps:$4 sm:$0xff]   ;;  %v4496_v18 = vld [vmem:[%s5649_s1 + $0x880] ss:$8 sps:$4 sm:$0xff]  }
  0xe5   : > { %2931 = vmatprep.subr.bf16.mxu0 %v4396_v19  ;;  %v4501_v19 = vld [vmem:[%s5649_s1 + $0x894] ss:$8 sps:$4 sm:$0xff]  }
  0xe7   : > { %2640 = vmatpush1.bf16.msra.mxu1 %v4391_v20  ;;  %v4499_v20 = vld [vmem:[%s5649_s1 + $0x890] ss:$8 sps:$4 sm:$0xff]  }
  0xe8   : > { %2932 = vmatpush1.bf16.msra.mxu0 %v4394_v21  ;;  %2641 = vmatprep.subr.bf16.mxu1 %v4399_v22  ;;  %v4507_v21 = vld [vmem:[%s5649_s1 + $0x8a4] ss:$8 sps:$4 sm:$0xff]   ;;  %v4505_v22 = vld [vmem:[%s5649_s1 + $0x8a0] ss:$8 sps:$4 sm:$0xff]  }
  0xe9   : > { %2933 = vmatprep.subr.bf16.mxu0 %v4402_v23  ;;  %v4510_v23 = vld [vmem:[%s5649_s1 + $0x8b4] ss:$8 sps:$4 sm:$0xff]  }
  0xeb   : > { %2642 = vmatpush1.bf16.msra.mxu1 %v4397_v24  ;;  %v4508_v24 = vld [vmem:[%s5649_s1 + $0x8b0] ss:$8 sps:$4 sm:$0xff]  }
  0xec   : > { %2934 = vmatpush1.bf16.msra.mxu0 %v4400_v25  ;;  %2643 = vmatprep.subr.bf16.mxu1 %v4408_v26  ;;  %v4516_v25 = vld [vmem:[%s5649_s1 + $0x8c4] ss:$8 sps:$4 sm:$0xff]   ;;  %v4514_v26 = vld [vmem:[%s5649_s1 + $0x8c0] ss:$8 sps:$4 sm:$0xff]  }
  0xed   : > { %2935 = vmatprep.subr.bf16.mxu0 %v4413_v27  ;;  %v4519_v27 = vld [vmem:[%s5649_s1 + $0x8d4] ss:$8 sps:$4 sm:$0xff]  }
  0xef   : > { %2644 = vmatpush1.bf16.msra.mxu1 %v4406_v28  ;;  %v4517_v28 = vld [vmem:[%s5649_s1 + $0x8d0] ss:$8 sps:$4 sm:$0xff]  }
  0xf0   : > { %2936 = vmatpush1.bf16.msra.mxu0 %v4411_v29  ;;  %2645 = vmatprep.subr.bf16.mxu1 %v4417_v30  ;;  %v4525_v29 = vld [vmem:[%s5649_s1 + $0x8e4] ss:$8 sps:$4 sm:$0xff]   ;;  %v4523_v30 = vld [vmem:[%s5649_s1 + $0x8e0] ss:$8 sps:$4 sm:$0xff]  }
  0xf1   : > { %2937 = vmatprep.subr.bf16.mxu0 %v4420_v31  ;;  %v4528_v31 = vld [vmem:[%s5649_s1 + $0x8f4] ss:$8 sps:$4 sm:$0xff]  }
  0xf3   : > { %2646 = vmatpush1.bf16.msra.mxu1 %v4415_v32  ;;  %v4526_v32 = vld [vmem:[%s5649_s1 + $0x8f0] ss:$8 sps:$4 sm:$0xff]  }
  0xf4   : > { %2938 = vmatpush1.bf16.msra.mxu0 %v4418_v33  ;;  %2647 = vmatprep.subr.bf16.mxu1 %v4426_v34  ;;  %v4529_v33 = vld [vmem:[%s4746_s21 + $0x40] ss:$72 sps:$4 sm:$0xff]   ;;  %v4532_v34 = vld [vmem:[%s4746_s21 + $0xd4] ss:$72 sps:$4 sm:$0xff]  }
  0xf5   : > { %2939 = vmatprep.subr.bf16.mxu0 %v4431_v35  ;;  %v4534_v35 = vld [vmem:[%s4746_s21 + $0xd0] ss:$72 sps:$4 sm:$0xff]  }
  0xf7   : > { %2648 = vmatpush1.bf16.msra.mxu1 %v4424_v36  ;;  %v4535_v36 = vld [vmem:[%s4746_s21 + $0x164] ss:$72 sps:$4 sm:$0xff]  }
  0xf8   : > { %2940 = vmatpush1.bf16.msra.mxu0 %v4429_v37  ;;  %2649 = vmatprep.subr.bf16.mxu1 %v4435_v38  ;;  %v4537_v37 = vld [vmem:[%s4746_s21 + $0x160] ss:$72 sps:$4 sm:$0xff]   ;;  %v4538_v38 = vld [vmem:[%s4746_s21 + $0x1f4] ss:$72 sps:$4 sm:$0xff]  }
  0xf9   : > { %2941 = vmatprep.subr.bf16.mxu0 %v4438_v39  ;;  %v4540_v39 = vld [vmem:[%s4746_s21 + $0x1f0] ss:$72 sps:$4 sm:$0xff]  }
  0xfb   : > { %2650 = vmatpush1.bf16.msra.mxu1 %v4433_v40  ;;  %v4541_v40 = vld [vmem:[%s5651_s3 + $0x40] sm:$0xff]  }
  0xfc   : > { %2942 = vmatpush1.bf16.msra.mxu0 %v4436_v41  ;;  %2651 = vmatprep.subr.bf16.mxu1 %v4444_v42  ;;  %v4542_v41 = vld [vmem:[%s5651_s3] sm:$0xff]   ;;  %v4543_v42 = vld [vmem:[%s5651_s3 + $0x48] sm:$0xff]  }
  0xfd   : > { %2943 = vmatprep.subr.bf16.mxu0 %v4449_v43  ;;  %v4544_v43 = vld [vmem:[%s5651_s3 + $0x8] sm:$0xff]  }
  0xff   : > { %2652 = vmatpush1.bf16.msra.mxu1 %v4442_v44  ;;  %v4545_v44 = vld [vmem:[%s5651_s3 + $0x50] sm:$0xff]  }
 0x100   : > { %2944 = vmatpush1.bf16.msra.mxu0 %v4447_v45  ;;  %2653 = vmatprep.subr.bf16.mxu1 %v4453_v46  ;;  %v4546_v45 = vld [vmem:[%s5651_s3 + $0x10] sm:$0xff]   ;;  %v4547_v46 = vld [vmem:[%s5651_s3 + $0x58] sm:$0xff]  }
 0x101   : > { %2945 = vmatprep.subr.bf16.mxu0 %v4456_v47  ;;  %v4548_v47 = vld [vmem:[%s5651_s3 + $0x18] sm:$0xff]  }
 0x103   : > { %2654 = vmatpush1.bf16.msra.mxu1 %v4451_v48  ;;  %v4549_v48 = vld [vmem:[%s5651_s3 + $0x60] sm:$0xff]  }
 0x104   : > { %2946 = vmatpush1.bf16.msra.mxu0 %v4454_v49  ;;  %3808 = vmatprep.subr.bf16.mxu1 %v4541_v40  ;;  %v4550_v49 = vld [vmem:[%s5651_s3 + $0x20] sm:$0xff]  }
 0x105   : > { %2988 = vmatprep.subr.bf16.mxu0 %v4465_v50  ;;  %v4551_v50 = vld [vmem:[%s5651_s3 + $0x68] sm:$0xff]  }
 0x106   : > { %2656 = vmatmul.mubr.bf16.vlgmr.msra.gmra.mrb[0].mxu1 %v4457_v51  ;;  %v4552_v51 = vld [vmem:[%s5651_s3 + $0x28] sm:$0xff]  }
 0x107   : > { %2948 = vmatmul.mubr.bf16.vlgmr.msra.gmra.mrb[0].mxu0 %v4460_v52  ;;  %2665 = vmatprep.mubr.bf16.mxu1 %v4469_v54  ;;  %v4553_v52 = vld [vmem:[%s5651_s3 + $0x70] sm:$0xff]   ;;  %v4555_v54 = vld [vmem:[%s5651_s3 + $0x78] sm:$0xff]  }
 0x108   : > { %2989 = vmatpush1.bf16.msra.mxu0 %v4463_v53  ;;  %2957 = vmatprep.mubr.bf16.mxu0 %v4502_v56  ;;  %v4554_v53 = vld [vmem:[%s5651_s3 + $0x30] sm:$0xff]  }
 0x109   : > { %2990 = vmatprep.subr.bf16.mxu0 %v4468_v55  ;;  %3809 = vmatpush3.bf16.msra.mxu1 %v4542_v41  ;;  %v4556_v55 = vld [vmem:[%s5651_s3 + $0x38] sm:$0xff]  }
 0x10a   : > { %3810 = vmatprep.subr.bf16.mxu1 %v4543_v42 }
 0x10c   : > { %2991 = vmatpush1.bf16.msra.mxu0 %v4466_v57 }
 0x10d   : > { %2992 = vmatprep.subr.bf16.mxu0 %v4474_v58  ;;  %3811 = vmatpush3.bf16.msra.mxu1 %v4544_v43 }
 0x10e   : > { %2666 = vmatmul.mubr.bf16.gmra.mrb[4].mxu1 %v4471_v59  ;;  %3812 = vmatprep.subr.bf16.mxu1 %v4545_v44 }
 0x10f   : > { %2958 = vmatmul.mubr.bf16.gmra.mrb[4].mxu0 %v4504_v60  ;;  %2675 = vmatprep.mubr.bf16.mxu1 %v4478_v62 }
 0x110   : > { %2993 = vmatpush1.bf16.msra.mxu0 %v4472_v61  ;;  %2967 = vmatprep.mubr.bf16.mxu0 %v4511_v0 }
 0x111   : > { %2994 = vmatprep.subr.bf16.mxu0 %v4477_v63  ;;  %3813 = vmatpush3.bf16.msra.mxu1 %v4546_v45 }
 0x112   : > { %3814 = vmatprep.subr.bf16.mxu1 %v4547_v46 }
 0x114   : > { %2995 = vmatpush1.bf16.msra.mxu0 %v4475_v1 }
 0x115   : > { %2996 = vmatprep.subr.bf16.mxu0 %v4483_v2  ;;  %3815 = vmatpush3.bf16.msra.mxu1 %v4548_v47 }
 0x116   : > { %2676 = vmatmul.mubr.bf16.gmra.mrb[8].mxu1 %v4480_v3  ;;  %3816 = vmatprep.subr.bf16.mxu1 %v4549_v48 }
 0x117   : > { %2968 = vmatmul.mubr.bf16.gmra.mrb[8].mxu0 %v4513_v4  ;;  %2685 = vmatprep.mubr.bf16.mxu1 %v4487_v6 }
 0x118   : > { %2997 = vmatpush1.bf16.msra.mxu0 %v4481_v5  ;;  %2977 = vmatprep.mubr.bf16.mxu0 %v4520_v8  ;;  %v594_v8 = vlaneseq }
 0x119   : > { %2998 = vmatprep.subr.bf16.mxu0 %v4486_v7  ;;  %3817 = vmatpush3.bf16.msra.mxu1 %v4550_v49 }
 0x11a   : > { %3818 = vmatprep.subr.bf16.mxu1 %v4551_v50 }
 0x11c   : > { %2999 = vmatpush1.bf16.msra.mxu0 %v4484_v9  ;;  %v595_v9 = vshrl.u32 %v594_v8, 7 }
 0x11d   : > { %3000 = vmatprep.subr.bf16.mxu0 %v4492_v10  ;;  %3819 = vmatpush3.bf16.msra.mxu1 %v4552_v51 }
 0x11e   : > { %2686 = vmatmul.mubr.bf16.gmra.mrb[12].mxu1 %v4489_v11  ;;  %3820 = vmatprep.subr.bf16.mxu1 %v4553_v52  ;;  %v596_v10 = vsub.s32 0, %v595_v9  ;;  %v592_v11 = vld [vmem:[%s5650_s2] sm:$0x3] }
 0x11f   : > { %2978 = vmatmul.mubr.bf16.gmra.mrb[12].mxu0 %v4522_v12  ;;  %v600_v12 = vsub.s32 1, %v595_v9 }
 0x120   : > { %3001 = vmatpush1.bf16.msra.mxu0 %v4490_v13  ;;  %3020 = vmatprep.mubr.bf16.mxu0 %v4531_v14  ;;  %v5608_v13 = vrot.slane %v592_v11, %v596_v10 }
 0x121   : > { %3002 = vmatprep.subr.bf16.mxu0 %v4495_v15  ;;  %3821 = vmatpush3.bf16.msra.mxu1 %v4554_v53  ;;  %v5610_v14 = vrot.slane %v592_v11, %v600_v12 }
 0x122   : > { %3822 = vmatprep.subr.bf16.mxu1 %v4555_v54 }
 0x124   : > { %3003 = vmatpush1.bf16.msra.mxu0 %v4493_v16 }
 0x125   : > { %3004 = vmatprep.subr.bf16.mxu0 %v4498_v17  ;;  %3823 = vmatpush3.bf16.msra.mxu1 %v4556_v55 }
 0x128   : > { %3005 = vmatpush1.bf16.msra.mxu0 %v4496_v18 }
 0x129   : > { %3006 = vmatprep.subr.bf16.mxu0 %v4501_v19 }
 0x12c   : > { %3007 = vmatpush1.bf16.msra.mxu0 %v4499_v20 }
 0x12d   : > { %3008 = vmatprep.subr.bf16.mxu0 %v4507_v21 }
 0x130   : > { %3009 = vmatpush1.bf16.msra.mxu0 %v4505_v22 }
 0x131   : > { %3010 = vmatprep.subr.bf16.mxu0 %v4510_v23 }
 0x134   : > { %3011 = vmatpush1.bf16.msra.mxu0 %v4508_v24 }
 0x135   : > { %3012 = vmatprep.subr.bf16.mxu0 %v4516_v25 }
 0x138   : > { %3013 = vmatpush1.bf16.msra.mxu0 %v4514_v26 }
 0x139   : > { %3014 = vmatprep.subr.bf16.mxu0 %v4519_v27 }
 0x13c   : > { %3015 = vmatpush1.bf16.msra.mxu0 %v4517_v28 }
 0x13d   : > { %3016 = vmatprep.subr.bf16.mxu0 %v4525_v29 }
 0x140   : > { %3017 = vmatpush1.bf16.msra.mxu0 %v4523_v30 }
 0x141   : > { %3018 = vmatprep.subr.bf16.mxu0 %v4528_v31 }
 0x144   : > { %3019 = vmatpush1.bf16.msra.mxu0 %v4526_v32 }
 0x147   : > { %3021 = vmatmul.mubr.bf16.vlgmr.msra.gmra.mrb[0].mxu0 %v4529_v33 }
 0x148   : > { %3030 = vmatprep.mubr.bf16.mxu0 %v4532_v34 }
 0x14f   : > { %3031 = vmatmul.mubr.bf16.gmra.mrb[4].mxu0 %v4534_v35 }
 0x150   : > { %3040 = vmatprep.mubr.bf16.mxu0 %v4535_v36 }
 0x157   : > { %3041 = vmatmul.mubr.bf16.gmra.mrb[8].mxu0 %v4537_v37 }
 0x158   : > { %3050 = vmatprep.mubr.bf16.mxu0 %v4538_v38 }
 0x15f   : > { %3051 = vmatmul.mubr.bf16.gmra.mrb[12].mxu0 %v4540_v39 }
 0x1d9   : > { %v2657_v56 = vpop.f32.mrb[0].mxu1 }
 0x1da   : > { %v2659_v57 = vpop.f32.mrb[1].mxu1  ;;  %v3848_v15 = vadd.f32 %v2657_v56, %v5608_v13 }
 0x1db   : > { %v2661_v58 = vpop.f32.mrb[2].mxu1  ;;  %v3850_v16 = vadd.f32 %v2659_v57, %v5610_v14 }
 0x1dc   : > { %v2663_v59 = vpop.f32.mrb[3].mxu1  ;;  %v3852_v18 = vadd.f32 %v2661_v58, %v5608_v13 }
 0x1dd   : > { %v3854_v21 = vadd.f32 %v2663_v59, %v5610_v14 }
 0x1e1   : > { %v2667_v60 = vpop.f32.mrb[4].mxu1 }
 0x1e2   : > { %v2669_v61 = vpop.f32.mrb[5].mxu1  ;;  %v3856_v31 = vadd.f32 %v2667_v60, %v5608_v13 }
 0x1e3   : > { %v2671_v62 = vpop.f32.mrb[6].mxu1  ;;  %v3858_v33 = vadd.f32 %v2669_v61, %v5610_v14 }
 0x1e4   : > { %v2673_v63 = vpop.f32.mrb[7].mxu1  ;;  %v3860_v36 = vadd.f32 %v2671_v62, %v5608_v13 }
 0x1e5   : > { %v3862_v39 = vadd.f32 %v2673_v63, %v5610_v14 }
 0x1e9   : > { %v2677_v0 = vpop.f32.mrb[8].mxu1 }
 0x1ea   : > { %v2679_v1 = vpop.f32.mrb[9].mxu1  ;;  %v3864_v49 = vadd.f32 %v2677_v0, %v5608_v13 }
 0x1eb   : > { %v2681_v2 = vpop.f32.mrb[10].mxu1  ;;  %v3866_v51 = vadd.f32 %v2679_v1, %v5610_v14 }
 0x1ec   : > { %v2683_v3 = vpop.f32.mrb[11].mxu1  ;;  %v3868_v54 = vadd.f32 %v2681_v2, %v5608_v13 }
 0x1ed   : > { %v3870_v57 = vadd.f32 %v2683_v3, %v5610_v14 }
 0x1f1   : > { %v5597_v4 = vpop.f32.mrb[12].mxu1 }
 0x1f2   : > { %v5599_v5 = vpop.f32.mrb[13].mxu1  ;;  %v3872_v1 = vadd.f32 %v5597_v4, %v5608_v13 }
 0x1f3   : > { %v5601_v6 = vpop.f32.mrb[14].mxu1  ;;  %v3874_v2 = vadd.f32 %v5599_v5, %v5610_v14 }
 0x1f4   : > { %v5603_v7 = vpop.f32.mrb[15].mxu1  ;;  %v3876_v12 = vadd.f32 %v5601_v6, %v5608_v13 }
 0x21a   : > { %v3022_v17 = vpop.f32.mrb[0].mxu0 }
 0x21b   : > { %v3849_v19 = vadd.f32 %v3848_v15, %v3022_v17  ;;  %v3024_v20 = vpop.f32.mrb[1].mxu0  ;;  %v3878_v17 = vadd.f32 %v5603_v7, %v5610_v14  ;;  %v3750_v14 = vld [vmem:[%s5652_s4] ss:$0 sm:$0xff] }
 0x21c   : > { %v3851_v22 = vadd.f32 %v3850_v16, %v3024_v20  ;;  %v3026_v23 = vpop.f32.mrb[2].mxu0 }
 0x21d   : > { %v3853_v24 = vadd.f32 %v3852_v18, %v3026_v23  ;;  %v3028_v25 = vpop.f32.mrb[3].mxu0  ;;  %v3061_v27 = vmax.f32 %v3849_v19, 0.0 }
 0x21e   : > { %v3855_v26 = vadd.f32 %v3854_v21, %v3028_v25  ;;  %v3062_v29 = vmax.f32 %v3851_v22, 0.0 }
 0x21f   : > { %v3063_v28 = vmax.f32 %v3853_v24, 0.0 }
 0x220   : > { %v3064_v30 = vmax.f32 %v3855_v26, 0.0 }
 0x221   : > { %v3077_v32 = vpack.c.bf16 %v3063_v28, %v3061_v27 }
 0x222   : > { %v3078_v34 = vpack.c.bf16 %v3064_v30, %v3062_v29  ;;  %v3032_v35 = vpop.f32.mrb[4].mxu0 }
 0x223   : > { %v3857_v37 = vadd.f32 %v3856_v31, %v3032_v35  ;;  %v3034_v38 = vpop.f32.mrb[5].mxu0 }
 0x224   : > { %v3859_v40 = vadd.f32 %v3858_v33, %v3034_v38  ;;  %v3036_v41 = vpop.f32.mrb[6].mxu0  ;;  %3252 = vmatprep.mubr.bf16.mxu1 %v3078_v34 }
 0x225   : > { %v3861_v42 = vadd.f32 %v3860_v36, %v3036_v41  ;;  %v3038_v43 = vpop.f32.mrb[7].mxu0  ;;  %3253 = vmatmul.mubr.bf16.vlgmr.msra.gmra.mrb[16].mxu1 %v3077_v32  ;;  %v3065_v45 = vmax.f32 %v3857_v37, 0.0 }
 0x226   : > { %v3863_v44 = vadd.f32 %v3862_v39, %v3038_v43  ;;  %v3066_v47 = vmax.f32 %v3859_v40, 0.0 }
 0x227   : > { %v3067_v46 = vmax.f32 %v3861_v42, 0.0 }
 0x228   : > { %v3068_v48 = vmax.f32 %v3863_v44, 0.0 }
 0x229   : > { %v3079_v50 = vpack.c.bf16 %v3067_v46, %v3065_v45 }
 0x22a   : > { %v3080_v52 = vpack.c.bf16 %v3068_v48, %v3066_v47  ;;  %v3042_v53 = vpop.f32.mrb[8].mxu0 }
 0x22b   : > { %v3865_v55 = vadd.f32 %v3864_v49, %v3042_v53  ;;  %v3044_v56 = vpop.f32.mrb[9].mxu0 }
 0x22c   : > { %v3867_v58 = vadd.f32 %v3866_v51, %v3044_v56  ;;  %v3046_v59 = vpop.f32.mrb[10].mxu0  ;;  %3260 = vmatprep.mubr.bf16.mxu1 %v3080_v52 }
 0x22d   : > { %v3869_v60 = vadd.f32 %v3868_v54, %v3046_v59  ;;  %v3048_v61 = vpop.f32.mrb[11].mxu0  ;;  %3261 = vmatmul.mubr.bf16.gmra.mrb[20].mxu1 %v3079_v50  ;;  %v3069_v63 = vmax.f32 %v3865_v55, 0.0 }
 0x22e   : > { %v3871_v62 = vadd.f32 %v3870_v57, %v3048_v61  ;;  %v3070_v8 = vmax.f32 %v3867_v58, 0.0 }
 0x22f   : > { %v3071_v0 = vmax.f32 %v3869_v60, 0.0 }
 0x230   : > { %v3072_v9 = vmax.f32 %v3871_v62, 0.0 }
 0x231   : > { %v3081_v10 = vpack.c.bf16 %v3071_v0, %v3069_v63 }
 0x232   : > { %v3082_v11 = vpack.c.bf16 %v3072_v9, %v3070_v8  ;;  %v3052_v3 = vpop.f32.mrb[12].mxu0 }
 0x233   : > { %v3873_v15 = vadd.f32 %v3872_v1, %v3052_v3  ;;  %v3054_v16 = vpop.f32.mrb[13].mxu0 }
 0x234   : > { %v3875_v18 = vadd.f32 %v3874_v2, %v3054_v16  ;;  %v3056_v19 = vpop.f32.mrb[14].mxu0  ;;  %3268 = vmatprep.mubr.bf16.mxu1 %v3082_v11 }
 0x235   : > { %v3877_v20 = vadd.f32 %v3876_v12, %v3056_v19  ;;  %v3058_v21 = vpop.f32.mrb[15].mxu0  ;;  %3269 = vmatmul.mubr.bf16.gmra.mrb[24].mxu1 %v3081_v10  ;;  %v3073_v22 = vmax.f32 %v3873_v15, 0.0 }
 0x236   : > { %v3879_v4 = vadd.f32 %v3878_v17, %v3058_v21  ;;  %v3074_v23 = vmax.f32 %v3875_v18, 0.0 }
 0x237   : > { %v3075_v5 = vmax.f32 %v3877_v20, 0.0 }
 0x238   : > { %v3076_v24 = vmax.f32 %v3879_v4, 0.0 }
 0x239   : > { %v3083_v25 = vpack.c.bf16 %v3075_v5, %v3073_v22 }
 0x23a   : > { %v3084_v26 = vpack.c.bf16 %v3076_v24, %v3074_v23 }
 0x23c   : > { %3276 = vmatprep.mubr.bf16.mxu1 %v3084_v26 }
 0x23d   : > { %3277 = vmatmul.mubr.bf16.gmra.mrb[28].mxu1 %v3083_v25 }
 0x2f8   : > { %v3824_v6 = vpop.f32.mrb[16].mxu1 }
 0x2f9   : > { %v3825_v13 = vpop.f32.mrb[17].mxu1 }
 0x2fa   : > { %v3826_v27 = vadd.f32 %v3825_v13, %v3824_v6  ;;  %v3827_v7 = vpop.f32.mrb[18].mxu1 }
 0x2fb   : > { %v3828_v28 = vpop.f32.mrb[19].mxu1 }
 0x2fc   : > { %v3829_v29 = vadd.f32 %v3828_v28, %v3827_v7  ;;  %v3255_v30 = vadd.f32 %v3826_v27, %v3750_v14 }
 0x2fe   : > { %v3258_v31 = vadd.f32 %v3829_v29, %v3750_v14 }
 0x300   : > { %v3788_v32 = vpack.c.bf16 %v3258_v31, %v3255_v30  ;;  %v3830_v33 = vpop.f32.mrb[20].mxu1 }
 0x301   : > { %v3831_v34 = vpop.f32.mrb[21].mxu1 }
 0x302   : > { %3789 = vst [vmem:[%s5639_s15] sm:$0xff] %v3788_v32   ;;  %v3832_v35 = vadd.f32 %v3831_v34, %v3830_v33  ;;  %v3833_v36 = vpop.f32.mrb[22].mxu1 }
 0x303   : > { %v3834_v37 = vpop.f32.mrb[23].mxu1 }
 0x304   : > { %v3835_v38 = vadd.f32 %v3834_v37, %v3833_v36  ;;  %v3263_v39 = vadd.f32 %v3832_v35, %v3750_v14 }
 0x306   : > { %v3266_v40 = vadd.f32 %v3835_v38, %v3750_v14 }
 0x308   : > { %v3793_v41 = vpack.c.bf16 %v3266_v40, %v3263_v39  ;;  %v3836_v42 = vpop.f32.mrb[24].mxu1 }
 0x309   : > { %v3837_v43 = vpop.f32.mrb[25].mxu1 }
 0x30a   : > { %3805 = vst [vmem:[%s5639_s15 + $0x8] sm:$0xff] %v3793_v41   ;;  %v3838_v44 = vadd.f32 %v3837_v43, %v3836_v42  ;;  %v3839_v45 = vpop.f32.mrb[26].mxu1 }
 0x30b   : > { %v3840_v46 = vpop.f32.mrb[27].mxu1 }
 0x30c   : > { %v3841_v47 = vadd.f32 %v3840_v46, %v3839_v45  ;;  %v3271_v48 = vadd.f32 %v3838_v44, %v3750_v14 }
 0x30e   : > { %v3274_v49 = vadd.f32 %v3841_v47, %v3750_v14 }
 0x310   : > { %v3798_v50 = vpack.c.bf16 %v3274_v49, %v3271_v48  ;;  %v3842_v51 = vpop.f32.mrb[28].mxu1 }
 0x311   : > { %v3843_v52 = vpop.f32.mrb[29].mxu1 }
 0x312   : > { %3806 = vst [vmem:[%s5639_s15 + $0x10] sm:$0xff] %v3798_v50   ;;  %v3844_v53 = vadd.f32 %v3843_v52, %v3842_v51  ;;  %v3845_v54 = vpop.f32.mrb[30].mxu1 }
 0x313   : > { %v3846_v55 = vpop.f32.mrb[31].mxu1 }
 0x314   : > { %v3847_v56 = vadd.f32 %v3846_v55, %v3845_v54  ;;  %v3279_v57 = vadd.f32 %v3844_v53, %v3750_v14 }
 0x316   : > { %v3282_v58 = vadd.f32 %v3847_v56, %v3750_v14 }
 0x318   : > { %v3803_v59 = vpack.c.bf16 %v3282_v58, %v3279_v57 }
 0x31a   : > { %3807 = vst [vmem:[%s5639_s15 + $0x18] sm:$0xff] %v3803_v59  }
 0x31b PF: > { %s15_s18 = sadd.s32 1, %s4563_s18  }
 0x31c   : > { %p12_p4 = scmp.ge.s32.totalorder %s15_s18, 4  }
 0x31e   :  { %14 = sbr.rel (!%p12_p4) target bundleno = 1 (0x1), region = 70 }

</bundles_post_ra>
